<compile_context>
chip_gen: v7x
topology: tpu7x:2x2x1
jax: 0.10.0
libtpu: 0.0.40
codegen_flags: <defaults>
</compile_context>

<pallas_src>
import jax
import jax.numpy as jnp
from jax import lax
from jax.experimental import pallas as pl
from jax.experimental.pallas import tpu as pltpu

# Hyperparameters implied by the PyTorch script (hidden kept small/tile-friendly
# for the demo; the spec's hidden_size=50 would simply be padded to 56/64).
INPUT_SIZE = 1
HIDDEN_SIZE = 32
NUM_LAYERS = 3
OUTPUT_SIZE = 1
BATCH_BLOCK = 128   # lane width / MXU dim: one batch block fills the lane axis
UNROLL = 8          # partial unroll for the in-kernel time loops


def _chunk_len(T):
    for c in (8, 4, 2):
        if T % c == 0:
            return c
    return 1


def rnn_relu_kernel(x_ref, wih0_ref, wih_ref, whh_ref, b_ref, wfc_ref, bfc_ref,
                    out_ref, seq_ref):
    """Multi-layer Elman RNN (relu) + per-timestep Linear for one batch block.

    Everything is kept in a transposed (hidden, batch) layout so the 128-wide
    batch block sits on the lane axis (lane-dense VPU ops and stores).

    x_ref:    (T, BB)       input, time on sublanes, batch block on lanes
    wih0_ref: (H, 1)        layer-0 W_ih (INPUT_SIZE == 1)
    wih_ref:  (L-1, H, H)   layers 1..L-1 W_ih (PyTorch layout, used as W @ h^T)
    whh_ref:  (L, H, H)     W_hh (PyTorch layout, used as W @ h^T)
    b_ref:    (L, H, 1)     b_ih + b_hh per layer, as columns
    wfc_ref:  (H, 1)        fc weight as a column
    bfc_ref:  (1, 1)        fc bias
    out_ref:  (T, BB)       lane-dense output block
    seq_ref:  (T, H, BB)    per-layer hidden outputs (transposed), reused in place
    """
    T, BB = x_ref.shape
    H = HIDDEN_SIZE
    unroll = min(T, UNROLL)

    # ---- Layer-0 input projection (I == 1): per-timestep VPU outer product,
    # bias folded in.  Off the serialized recurrence; bounded temporaries.
    wih0 = wih0_ref[...]                                    # (H, 1)
    b0 = b_ref[0]                                           # (H, 1)

    def l0_proj(t, carry):
        seq_ref[t] = x_ref[pl.ds(t, 1), :] * wih0 + b0      # (1,BB)*(H,1) -> (H,BB)
        return carry

    lax.fori_loop(0, T, l0_proj, 0, unroll=unroll)

    h0 = jnp.zeros((H, BB), dtype=jnp.float32)

    def run_recurrence(whh_l):
        # Serial chain: only relu(proj[t] + W_hh @ h) is on the critical path.
        def step(t, h):
            h_new = jnp.maximum(
                seq_ref[t]
                + jnp.dot(whh_l, h, preferred_element_type=jnp.float32),
                0.0)
            seq_ref[t] = h_new
            return h_new

        lax.fori_loop(0, T, step, h0, unroll=unroll)

    run_recurrence(whh_ref[0])

    for l in range(1, NUM_LAYERS):
        # Hoisted input projection for layer l: independent (H,H)@(H,BB)
        # matmuls applied in place, one timestep at a time (off the serial
        # chain; no full-buffer read-modify-write / giant live value).
        wih_l = wih_ref[l - 1]
        b_l = b_ref[l]

        def in_proj(t, carry, wih_l=wih_l, b_l=b_l):
            seq_ref[t] = (
                jnp.dot(wih_l, seq_ref[t], preferred_element_type=jnp.float32)
                + b_l)
            return carry

        lax.fori_loop(0, T, in_proj, 0, unroll=unroll)
        run_recurrence(whh_ref[l])

    # ---- Final Linear (O == 1): VPU multiply + sublane reduce over H, chunked
    # over T so the temporary stays bounded; stores are lane-dense (BB == 128).
    CH = _chunk_len(T)
    wfc = wfc_ref[...]                                      # (H, 1)
    bfc = bfc_ref[...]                                      # (1, 1)

    def fc_chunk(c, carry):
        sl = pl.ds(pl.multiple_of(c * CH, CH), CH)
        y = jnp.sum(seq_ref[sl] * wfc[None, :, :], axis=1)  # (CH, BB)
        out_ref[sl, :] = y + bfc
        return carry

    lax.fori_loop(0, T // CH, fc_chunk, 0)


def init_params(key):
    """Deterministic init matching PyTorch nn.RNN / nn.Linear parameter shapes."""
    k = 1.0 / jnp.sqrt(jnp.float32(HIDDEN_SIZE))
    keys = jax.random.split(key, 4 * NUM_LAYERS + 2)

    def u(kk, shape):
        return jax.random.uniform(kk, shape, jnp.float32, minval=-k, maxval=k)

    w_ih, w_hh, b_ih, b_hh = [], [], [], []
    for l in range(NUM_LAYERS):
        in_dim = INPUT_SIZE if l == 0 else HIDDEN_SIZE
        w_ih.append(u(keys[4 * l + 0], (HIDDEN_SIZE, in_dim)))   # PyTorch W_ih
        w_hh.append(u(keys[4 * l + 1], (HIDDEN_SIZE, HIDDEN_SIZE)))
        b_ih.append(u(keys[4 * l + 2], (HIDDEN_SIZE,)))
        b_hh.append(u(keys[4 * l + 3], (HIDDEN_SIZE,)))
    w_fc = u(keys[-2], (OUTPUT_SIZE, HIDDEN_SIZE))
    b_fc = u(keys[-1], (OUTPUT_SIZE,))
    return w_ih, w_hh, b_ih, b_hh, w_fc, b_fc


def rnn_forward(x, params):
    """x: (B, T, INPUT_SIZE) float32, batch_first like the PyTorch module.
    Initial hidden state is zeros (the module's self.hidden / init_hidden)."""
    w_ih, w_hh, b_ih, b_hh, w_fc, b_fc = params
    B, T, _ = x.shape
    H = HIDDEN_SIZE

    # Parameter glue stays in plain JAX.  In the transposed (H, batch) layout
    # the PyTorch weights are used directly as W @ h^T, so no transposes.
    wih0 = w_ih[0].astype(jnp.float32)                      # (H, 1)
    wih_rest = jnp.stack(w_ih[1:], axis=0)                  # (L-1, H, H)
    whh = jnp.stack(w_hh, axis=0)                           # (L, H, H)
    b = jnp.stack([(bi + bh).reshape(H, 1)
                   for bi, bh in zip(b_ih, b_hh)], axis=0)  # (L, H, 1)
    wfc = w_fc.reshape(H, 1)                                # (O, H) -> (H, 1), O == 1
    bfc = b_fc.reshape(1, 1)                                # (1, 1)

    # Squeeze the INPUT_SIZE == 1 dim, go time-major with batch on the lane
    # axis, pad batch to a multiple of the 128-wide batch block.
    BB = BATCH_BLOCK
    B_pad = ((B + BB - 1) // BB) * BB
    x_tm = jnp.transpose(x[..., 0], (1, 0)).astype(jnp.float32)   # (T, B)
    x_tm = jnp.pad(x_tm, ((0, 0), (0, B_pad - B)))                # (T, B_pad)

    grid = (B_pad // BB,)   # >= 2 blocks shard across v7x's two TensorCores

    # VMEM budget: scratch + double-buffered x/out tiles + padded weights.
    seq_bytes = T * H * BB * 4
    io_bytes = 2 * 2 * T * BB * 4
    wt_bytes = 1 << 19
    vmem_limit = int(min(60 * 2**20,                              # < v7x 64 MiB
                         max(32 * 2**20, 2 * (seq_bytes + io_bytes) + wt_bytes)))

    def full_spec(a):
        return pl.BlockSpec(a.shape, lambda i, _nd=a.ndim: (0,) * _nd)

    out_tm = pl.pallas_call(
        rnn_relu_kernel,
        out_shape=jax.ShapeDtypeStruct((T, B_pad), jnp.float32),
        grid=grid,
        in_specs=[
            pl.BlockSpec((T, BB), lambda i: (0, i)),
            full_spec(wih0), full_spec(wih_rest), full_spec(whh),
            full_spec(b), full_spec(wfc), full_spec(bfc),
        ],
        out_specs=pl.BlockSpec((T, BB), lambda i: (0, i)),
        scratch_shapes=[pltpu.VMEM((T, H, BB), jnp.float32)],
        compiler_params=pltpu.CompilerParams(
            dimension_semantics=("parallel",),
            vmem_limit_bytes=vmem_limit,
        ),
    )(x_tm, wih0, wih_rest, whh, b, wfc, bfc)

    # Back to PyTorch batch_first layout (B, T, O) with O == 1.
    return jnp.transpose(out_tm[:, :B], (1, 0))[..., None]


def rnn_reference(x, params):
    """Pure-JAX reference mirroring PyTorch nn.RNN(relu) + nn.Linear."""
    w_ih, w_hh, b_ih, b_hh, w_fc, b_fc = params
    B, T, _ = x.shape
    layer_in = x
    for l in range(NUM_LAYERS):
        h = jnp.zeros((B, HIDDEN_SIZE), jnp.float32)
        outs = []
        for t in range(T):
            h = jax.nn.relu(layer_in[:, t, :] @ w_ih[l].T + b_ih[l]
                            + h @ w_hh[l].T + b_hh[l])
            outs.append(h)
        layer_in = jnp.stack(outs, axis=1)
    return layer_in @ w_fc.T + b_fc


if __name__ == "__main__":
    key = jax.random.PRNGKey(0)
    pkey, xkey = jax.random.split(key)
    params = init_params(pkey)

    B, T = 2, 8
    x = jax.random.normal(xkey, (B, T, INPUT_SIZE), dtype=jnp.float32)

    out = jax.block_until_ready(rnn_forward(x, params))
    ref = jax.block_until_ready(rnn_reference(x, params))

    assert out.shape == (B, T, OUTPUT_SIZE)
    assert jnp.allclose(out, ref, rtol=1e-4, atol=1e-4)
    print("KERNEL_OK")
</pallas_src>

<mosaic_0001>
module attributes {stable_mosaic.version = 11 : i64} {
  func.func @rnn_relu_kernel(%arg0: i32, %arg1: memref<8x128xf32, #tpu.memory_space<vmem>>, %arg2: memref<32x1xf32, #tpu.memory_space<vmem>>, %arg3: memref<2x32x32xf32, #tpu.memory_space<vmem>>, %arg4: memref<3x32x32xf32, #tpu.memory_space<vmem>>, %arg5: memref<3x32x1xf32, #tpu.memory_space<vmem>>, %arg6: memref<32x1xf32, #tpu.memory_space<vmem>>, %arg7: memref<1x1xf32, #tpu.memory_space<vmem>>, %arg8: memref<8x128xf32, #tpu.memory_space<vmem>>, %arg9: memref<8x32x128xf32, #tpu.memory_space<vmem>>) attributes {dimension_semantics = [#tpu.dimension_semantics<parallel>], iteration_bounds = array<i64: 1>, scalar_prefetch = 0 : i64, scratch_operands = 1 : i64, tpu.core_type = #tpu.core_type<tc>, window_params = [{transform_indices = @transform_0, window_bounds = array<i64: 8, 128>}, {pipeline_mode = #tpu.pipeline_mode<synchronous>, transform_indices = @transform_1, window_bounds = array<i64: 32, 1>}, {pipeline_mode = #tpu.pipeline_mode<synchronous>, transform_indices = @transform_2, window_bounds = array<i64: 2, 32, 32>}, {pipeline_mode = #tpu.pipeline_mode<synchronous>, transform_indices = @transform_3, window_bounds = array<i64: 3, 32, 32>}, {pipeline_mode = #tpu.pipeline_mode<synchronous>, transform_indices = @transform_4, window_bounds = array<i64: 3, 32, 1>}, {pipeline_mode = #tpu.pipeline_mode<synchronous>, transform_indices = @transform_5, window_bounds = array<i64: 32, 1>}, {pipeline_mode = #tpu.pipeline_mode<synchronous>, transform_indices = @transform_6, window_bounds = array<i64: 1, 1>}, {transform_indices = @transform_7, window_bounds = array<i64: 8, 128>}]} {
    %c0 = arith.constant 0 : index
    %c0_0 = arith.constant 0 : index
    %0 = vector.load %arg2[%c0, %c0_0] : memref<32x1xf32, #tpu.memory_space<vmem>>, vector<32x1xf32>
    %c0_1 = arith.constant 0 : index
    %c0_2 = arith.constant 0 : index
    %c0_3 = arith.constant 0 : index
    %1 = vector.load %arg5[%c0_1, %c0_2, %c0_3] : memref<3x32x1xf32, #tpu.memory_space<vmem>>, vector<1x32x1xf32>
    %2 = vector.shape_cast %1 : vector<1x32x1xf32> to vector<32x1xf32>
    %c0_i32 = arith.constant 0 : i32
    %3 = arith.index_cast %c0_i32 : i32 to index
    %c0_4 = arith.constant 0 : index
    %4 = vector.load %arg1[%3, %c0_4] : memref<8x128xf32, #tpu.memory_space<vmem>>, vector<1x128xf32>
    %5 = vector.broadcast %4 : vector<1x128xf32> to vector<32x128xf32>
    %6 = vector.broadcast %0 : vector<32x1xf32> to vector<32x128xf32>
    %7 = arith.mulf %5, %6 : vector<32x128xf32>
    %8 = vector.broadcast %2 : vector<32x1xf32> to vector<32x128xf32>
    %9 = arith.addf %7, %8 : vector<32x128xf32>
    %10 = arith.index_cast %c0_i32 : i32 to index
    %c0_5 = arith.constant 0 : index
    %c0_6 = arith.constant 0 : index
    %11 = vector.load %arg9[%10, %c0_5, %c0_6] : memref<8x32x128xf32, #tpu.memory_space<vmem>>, vector<1x32x128xf32>
    %12 = vector.shape_cast %11 : vector<1x32x128xf32> to vector<32x128xf32>
    %13 = vector.shape_cast %9 : vector<32x128xf32> to vector<1x32x128xf32>
    tpu.vector_store %arg9[%10, %c0_5, %c0_6], %13 {strides = array<i32>} : memref<8x32x128xf32, #tpu.memory_space<vmem>>, vector<1x32x128xf32>,
    %c1_i32 = arith.constant 1 : i32
    %14 = arith.index_cast %c1_i32 : i32 to index
    %c0_7 = arith.constant 0 : index
    %15 = vector.load %arg1[%14, %c0_7] : memref<8x128xf32, #tpu.memory_space<vmem>>, vector<1x128xf32>
    %16 = vector.broadcast %15 : vector<1x128xf32> to vector<32x128xf32>
    %17 = vector.broadcast %0 : vector<32x1xf32> to vector<32x128xf32>
    %18 = arith.mulf %16, %17 : vector<32x128xf32>
    %19 = vector.broadcast %2 : vector<32x1xf32> to vector<32x128xf32>
    %20 = arith.addf %18, %19 : vector<32x128xf32>
    %21 = arith.index_cast %c1_i32 : i32 to index
    %c0_8 = arith.constant 0 : index
    %c0_9 = arith.constant 0 : index
    %22 = vector.load %arg9[%21, %c0_8, %c0_9] : memref<8x32x128xf32, #tpu.memory_space<vmem>>, vector<1x32x128xf32>
    %23 = vector.shape_cast %22 : vector<1x32x128xf32> to vector<32x128xf32>
    %24 = vector.shape_cast %20 : vector<32x128xf32> to vector<1x32x128xf32>
    tpu.vector_store %arg9[%21, %c0_8, %c0_9], %24 {strides = array<i32>} : memref<8x32x128xf32, #tpu.memory_space<vmem>>, vector<1x32x128xf32>,
    %c2_i32 = arith.constant 2 : i32
    %25 = arith.index_cast %c2_i32 : i32 to index
    %c0_10 = arith.constant 0 : index
    %26 = vector.load %arg1[%25, %c0_10] : memref<8x128xf32, #tpu.memory_space<vmem>>, vector<1x128xf32>
    %27 = vector.broadcast %26 : vector<1x128xf32> to vector<32x128xf32>
    %28 = vector.broadcast %0 : vector<32x1xf32> to vector<32x128xf32>
    %29 = arith.mulf %27, %28 : vector<32x128xf32>
    %30 = vector.broadcast %2 : vector<32x1xf32> to vector<32x128xf32>
    %31 = arith.addf %29, %30 : vector<32x128xf32>
    %32 = arith.index_cast %c2_i32 : i32 to index
    %c0_11 = arith.constant 0 : index
    %c0_12 = arith.constant 0 : index
    %33 = vector.load %arg9[%32, %c0_11, %c0_12] : memref<8x32x128xf32, #tpu.memory_space<vmem>>, vector<1x32x128xf32>
    %34 = vector.shape_cast %33 : vector<1x32x128xf32> to vector<32x128xf32>
    %35 = vector.shape_cast %31 : vector<32x128xf32> to vector<1x32x128xf32>
    tpu.vector_store %arg9[%32, %c0_11, %c0_12], %35 {strides = array<i32>} : memref<8x32x128xf32, #tpu.memory_space<vmem>>, vector<1x32x128xf32>,
    %c3_i32 = arith.constant 3 : i32
    %36 = arith.index_cast %c3_i32 : i32 to index
    %c0_13 = arith.constant 0 : index
    %37 = vector.load %arg1[%36, %c0_13] : memref<8x128xf32, #tpu.memory_space<vmem>>, vector<1x128xf32>
    %38 = vector.broadcast %37 : vector<1x128xf32> to vector<32x128xf32>
    %39 = vector.broadcast %0 : vector<32x1xf32> to vector<32x128xf32>
    %40 = arith.mulf %38, %39 : vector<32x128xf32>
    %41 = vector.broadcast %2 : vector<32x1xf32> to vector<32x128xf32>
    %42 = arith.addf %40, %41 : vector<32x128xf32>
    %43 = arith.index_cast %c3_i32 : i32 to index
    %c0_14 = arith.constant 0 : index
    %c0_15 = arith.constant 0 : index
    %44 = vector.load %arg9[%43, %c0_14, %c0_15] : memref<8x32x128xf32, #tpu.memory_space<vmem>>, vector<1x32x128xf32>
    %45 = vector.shape_cast %44 : vector<1x32x128xf32> to vector<32x128xf32>
    %46 = vector.shape_cast %42 : vector<32x128xf32> to vector<1x32x128xf32>
    tpu.vector_store %arg9[%43, %c0_14, %c0_15], %46 {strides = array<i32>} : memref<8x32x128xf32, #tpu.memory_space<vmem>>, vector<1x32x128xf32>,
    %c4_i32 = arith.constant 4 : i32
    %47 = arith.index_cast %c4_i32 : i32 to index
    %c0_16 = arith.constant 0 : index
    %48 = vector.load %arg1[%47, %c0_16] : memref<8x128xf32, #tpu.memory_space<vmem>>, vector<1x128xf32>
    %49 = vector.broadcast %48 : vector<1x128xf32> to vector<32x128xf32>
    %50 = vector.broadcast %0 : vector<32x1xf32> to vector<32x128xf32>
    %51 = arith.mulf %49, %50 : vector<32x128xf32>
    %52 = vector.broadcast %2 : vector<32x1xf32> to vector<32x128xf32>
    %53 = arith.addf %51, %52 : vector<32x128xf32>
    %54 = arith.index_cast %c4_i32 : i32 to index
    %c0_17 = arith.constant 0 : index
    %c0_18 = arith.constant 0 : index
    %55 = vector.load %arg9[%54, %c0_17, %c0_18] : memref<8x32x128xf32, #tpu.memory_space<vmem>>, vector<1x32x128xf32>
    %56 = vector.shape_cast %55 : vector<1x32x128xf32> to vector<32x128xf32>
    %57 = vector.shape_cast %53 : vector<32x128xf32> to vector<1x32x128xf32>
    tpu.vector_store %arg9[%54, %c0_17, %c0_18], %57 {strides = array<i32>} : memref<8x32x128xf32, #tpu.memory_space<vmem>>, vector<1x32x128xf32>,
    %c5_i32 = arith.constant 5 : i32
    %58 = arith.index_cast %c5_i32 : i32 to index
    %c0_19 = arith.constant 0 : index
    %59 = vector.load %arg1[%58, %c0_19] : memref<8x128xf32, #tpu.memory_space<vmem>>, vector<1x128xf32>
    %60 = vector.broadcast %59 : vector<1x128xf32> to vector<32x128xf32>
    %61 = vector.broadcast %0 : vector<32x1xf32> to vector<32x128xf32>
    %62 = arith.mulf %60, %61 : vector<32x128xf32>
    %63 = vector.broadcast %2 : vector<32x1xf32> to vector<32x128xf32>
    %64 = arith.addf %62, %63 : vector<32x128xf32>
    %65 = arith.index_cast %c5_i32 : i32 to index
    %c0_20 = arith.constant 0 : index
    %c0_21 = arith.constant 0 : index
    %66 = vector.load %arg9[%65, %c0_20, %c0_21] : memref<8x32x128xf32, #tpu.memory_space<vmem>>, vector<1x32x128xf32>
    %67 = vector.shape_cast %66 : vector<1x32x128xf32> to vector<32x128xf32>
    %68 = vector.shape_cast %64 : vector<32x128xf32> to vector<1x32x128xf32>
    tpu.vector_store %arg9[%65, %c0_20, %c0_21], %68 {strides = array<i32>} : memref<8x32x128xf32, #tpu.memory_space<vmem>>, vector<1x32x128xf32>,
    %c6_i32 = arith.constant 6 : i32
    %69 = arith.index_cast %c6_i32 : i32 to index
    %c0_22 = arith.constant 0 : index
    %70 = vector.load %arg1[%69, %c0_22] : memref<8x128xf32, #tpu.memory_space<vmem>>, vector<1x128xf32>
    %71 = vector.broadcast %70 : vector<1x128xf32> to vector<32x128xf32>
    %72 = vector.broadcast %0 : vector<32x1xf32> to vector<32x128xf32>
    %73 = arith.mulf %71, %72 : vector<32x128xf32>
    %74 = vector.broadcast %2 : vector<32x1xf32> to vector<32x128xf32>
    %75 = arith.addf %73, %74 : vector<32x128xf32>
    %76 = arith.index_cast %c6_i32 : i32 to index
    %c0_23 = arith.constant 0 : index
    %c0_24 = arith.constant 0 : index
    %77 = vector.load %arg9[%76, %c0_23, %c0_24] : memref<8x32x128xf32, #tpu.memory_space<vmem>>, vector<1x32x128xf32>
    %78 = vector.shape_cast %77 : vector<1x32x128xf32> to vector<32x128xf32>
    %79 = vector.shape_cast %75 : vector<32x128xf32> to vector<1x32x128xf32>
    tpu.vector_store %arg9[%76, %c0_23, %c0_24], %79 {strides = array<i32>} : memref<8x32x128xf32, #tpu.memory_space<vmem>>, vector<1x32x128xf32>,
    %c7_i32 = arith.constant 7 : i32
    %80 = arith.index_cast %c7_i32 : i32 to index
    %c0_25 = arith.constant 0 : index
    %81 = vector.load %arg1[%80, %c0_25] : memref<8x128xf32, #tpu.memory_space<vmem>>, vector<1x128xf32>
    %82 = vector.broadcast %81 : vector<1x128xf32> to vector<32x128xf32>
    %83 = vector.broadcast %0 : vector<32x1xf32> to vector<32x128xf32>
    %84 = arith.mulf %82, %83 : vector<32x128xf32>
    %85 = vector.broadcast %2 : vector<32x1xf32> to vector<32x128xf32>
    %86 = arith.addf %84, %85 : vector<32x128xf32>
    %87 = arith.index_cast %c7_i32 : i32 to index
    %c0_26 = arith.constant 0 : index
    %c0_27 = arith.constant 0 : index
    %88 = vector.load %arg9[%87, %c0_26, %c0_27] : memref<8x32x128xf32, #tpu.memory_space<vmem>>, vector<1x32x128xf32>
    %89 = vector.shape_cast %88 : vector<1x32x128xf32> to vector<32x128xf32>
    %90 = vector.shape_cast %86 : vector<32x128xf32> to vector<1x32x128xf32>
    tpu.vector_store %arg9[%87, %c0_26, %c0_27], %90 {strides = array<i32>} : memref<8x32x128xf32, #tpu.memory_space<vmem>>, vector<1x32x128xf32>,
    %c8_i32 = arith.constant 8 : i32
    %cst = arith.constant 0.000000e+00 : f32
    %91 = vector.broadcast %cst : f32 to vector<32x128xf32>
    %c0_28 = arith.constant 0 : index
    %c0_29 = arith.constant 0 : index
    %c0_30 = arith.constant 0 : index
    %92 = vector.load %arg4[%c0_28, %c0_29, %c0_30] : memref<3x32x32xf32, #tpu.memory_space<vmem>>, vector<1x32x32xf32>
    %93 = vector.shape_cast %92 : vector<1x32x32xf32> to vector<32x32xf32>
    %c0_i32_31 = arith.constant 0 : i32
    %94 = arith.index_cast %c0_i32_31 : i32 to index
    %c0_32 = arith.constant 0 : index
    %c0_33 = arith.constant 0 : index
    %95 = vector.load %arg9[%94, %c0_32, %c0_33] : memref<8x32x128xf32, #tpu.memory_space<vmem>>, vector<1x32x128xf32>
    %96 = vector.shape_cast %95 : vector<1x32x128xf32> to vector<32x128xf32>
    %cst_34 = arith.constant dense<0.000000e+00> : vector<32x128xf32>
    %97 = tpu.matmul %93, %91, %cst_34 {dimension_numbers = #tpu.dot_dimension_numbers<[1], [0], [0], [1], [0, 0, 1, 1], [], []>} : vector<32x32xf32>, vector<32x128xf32>, vector<32x128xf32> -> vector<32x128xf32>
    %98 = arith.addf %96, %97 : vector<32x128xf32>
    %cst_35 = arith.constant 0.000000e+00 : f32
    %99 = vector.broadcast %cst_35 : f32 to vector<32x128xf32>
    %100 = arith.maximumf %98, %99 : vector<32x128xf32>
    %101 = arith.index_cast %c0_i32_31 : i32 to index
    %c0_36 = arith.constant 0 : index
    %c0_37 = arith.constant 0 : index
    %102 = vector.load %arg9[%101, %c0_36, %c0_37] : memref<8x32x128xf32, #tpu.memory_space<vmem>>, vector<1x32x128xf32>
    %103 = vector.shape_cast %102 : vector<1x32x128xf32> to vector<32x128xf32>
    %104 = vector.shape_cast %100 : vector<32x128xf32> to vector<1x32x128xf32>
    tpu.vector_store %arg9[%101, %c0_36, %c0_37], %104 {strides = array<i32>} : memref<8x32x128xf32, #tpu.memory_space<vmem>>, vector<1x32x128xf32>,
    %c1_i32_38 = arith.constant 1 : i32
    %105 = arith.index_cast %c1_i32_38 : i32 to index
    %c0_39 = arith.constant 0 : index
    %c0_40 = arith.constant 0 : index
    %106 = vector.load %arg9[%105, %c0_39, %c0_40] : memref<8x32x128xf32, #tpu.memory_space<vmem>>, vector<1x32x128xf32>
    %107 = vector.shape_cast %106 : vector<1x32x128xf32> to vector<32x128xf32>
    %cst_41 = arith.constant dense<0.000000e+00> : vector<32x128xf32>
    %108 = tpu.matmul %93, %100, %cst_41 {dimension_numbers = #tpu.dot_dimension_numbers<[1], [0], [0], [1], [0, 0, 1, 1], [], []>} : vector<32x32xf32>, vector<32x128xf32>, vector<32x128xf32> -> vector<32x128xf32>
    %109 = arith.addf %107, %108 : vector<32x128xf32>
    %cst_42 = arith.constant 0.000000e+00 : f32
    %110 = vector.broadcast %cst_42 : f32 to vector<32x128xf32>
    %111 = arith.maximumf %109, %110 : vector<32x128xf32>
    %112 = arith.index_cast %c1_i32_38 : i32 to index
    %c0_43 = arith.constant 0 : index
    %c0_44 = arith.constant 0 : index
    %113 = vector.load %arg9[%112, %c0_43, %c0_44] : memref<8x32x128xf32, #tpu.memory_space<vmem>>, vector<1x32x128xf32>
    %114 = vector.shape_cast %113 : vector<1x32x128xf32> to vector<32x128xf32>
    %115 = vector.shape_cast %111 : vector<32x128xf32> to vector<1x32x128xf32>
    tpu.vector_store %arg9[%112, %c0_43, %c0_44], %115 {strides = array<i32>} : memref<8x32x128xf32, #tpu.memory_space<vmem>>, vector<1x32x128xf32>,
    %c2_i32_45 = arith.constant 2 : i32
    %116 = arith.index_cast %c2_i32_45 : i32 to index
    %c0_46 = arith.constant 0 : index
    %c0_47 = arith.constant 0 : index
    %117 = vector.load %arg9[%116, %c0_46, %c0_47] : memref<8x32x128xf32, #tpu.memory_space<vmem>>, vector<1x32x128xf32>
    %118 = vector.shape_cast %117 : vector<1x32x128xf32> to vector<32x128xf32>
    %cst_48 = arith.constant dense<0.000000e+00> : vector<32x128xf32>
    %119 = tpu.matmul %93, %111, %cst_48 {dimension_numbers = #tpu.dot_dimension_numbers<[1], [0], [0], [1], [0, 0, 1, 1], [], []>} : vector<32x32xf32>, vector<32x128xf32>, vector<32x128xf32> -> vector<32x128xf32>
    %120 = arith.addf %118, %119 : vector<32x128xf32>
    %cst_49 = arith.constant 0.000000e+00 : f32
    %121 = vector.broadcast %cst_49 : f32 to vector<32x128xf32>
    %122 = arith.maximumf %120, %121 : vector<32x128xf32>
    %123 = arith.index_cast %c2_i32_45 : i32 to index
    %c0_50 = arith.constant 0 : index
    %c0_51 = arith.constant 0 : index
    %124 = vector.load %arg9[%123, %c0_50, %c0_51] : memref<8x32x128xf32, #tpu.memory_space<vmem>>, vector<1x32x128xf32>
    %125 = vector.shape_cast %124 : vector<1x32x128xf32> to vector<32x128xf32>
    %126 = vector.shape_cast %122 : vector<32x128xf32> to vector<1x32x128xf32>
    tpu.vector_store %arg9[%123, %c0_50, %c0_51], %126 {strides = array<i32>} : memref<8x32x128xf32, #tpu.memory_space<vmem>>, vector<1x32x128xf32>,
    %c3_i32_52 = arith.constant 3 : i32
    %127 = arith.index_cast %c3_i32_52 : i32 to index
    %c0_53 = arith.constant 0 : index
    %c0_54 = arith.constant 0 : index
    %128 = vector.load %arg9[%127, %c0_53, %c0_54] : memref<8x32x128xf32, #tpu.memory_space<vmem>>, vector<1x32x128xf32>
    %129 = vector.shape_cast %128 : vector<1x32x128xf32> to vector<32x128xf32>
    %cst_55 = arith.constant dense<0.000000e+00> : vector<32x128xf32>
    %130 = tpu.matmul %93, %122, %cst_55 {dimension_numbers = #tpu.dot_dimension_numbers<[1], [0], [0], [1], [0, 0, 1, 1], [], []>} : vector<32x32xf32>, vector<32x128xf32>, vector<32x128xf32> -> vector<32x128xf32>
    %131 = arith.addf %129, %130 : vector<32x128xf32>
    %cst_56 = arith.constant 0.000000e+00 : f32
    %132 = vector.broadcast %cst_56 : f32 to vector<32x128xf32>
    %133 = arith.maximumf %131, %132 : vector<32x128xf32>
    %134 = arith.index_cast %c3_i32_52 : i32 to index
    %c0_57 = arith.constant 0 : index
    %c0_58 = arith.constant 0 : index
    %135 = vector.load %arg9[%134, %c0_57, %c0_58] : memref<8x32x128xf32, #tpu.memory_space<vmem>>, vector<1x32x128xf32>
    %136 = vector.shape_cast %135 : vector<1x32x128xf32> to vector<32x128xf32>
    %137 = vector.shape_cast %133 : vector<32x128xf32> to vector<1x32x128xf32>
    tpu.vector_store %arg9[%134, %c0_57, %c0_58], %137 {strides = array<i32>} : memref<8x32x128xf32, #tpu.memory_space<vmem>>, vector<1x32x128xf32>,
    %c4_i32_59 = arith.constant 4 : i32
    %138 = arith.index_cast %c4_i32_59 : i32 to index
    %c0_60 = arith.constant 0 : index
    %c0_61 = arith.constant 0 : index
    %139 = vector.load %arg9[%138, %c0_60, %c0_61] : memref<8x32x128xf32, #tpu.memory_space<vmem>>, vector<1x32x128xf32>
    %140 = vector.shape_cast %139 : vector<1x32x128xf32> to vector<32x128xf32>
    %cst_62 = arith.constant dense<0.000000e+00> : vector<32x128xf32>
    %141 = tpu.matmul %93, %133, %cst_62 {dimension_numbers = #tpu.dot_dimension_numbers<[1], [0], [0], [1], [0, 0, 1, 1], [], []>} : vector<32x32xf32>, vector<32x128xf32>, vector<32x128xf32> -> vector<32x128xf32>
    %142 = arith.addf %140, %141 : vector<32x128xf32>
    %cst_63 = arith.constant 0.000000e+00 : f32
    %143 = vector.broadcast %cst_63 : f32 to vector<32x128xf32>
    %144 = arith.maximumf %142, %143 : vector<32x128xf32>
    %145 = arith.index_cast %c4_i32_59 : i32 to index
    %c0_64 = arith.constant 0 : index
    %c0_65 = arith.constant 0 : index
    %146 = vector.load %arg9[%145, %c0_64, %c0_65] : memref<8x32x128xf32, #tpu.memory_space<vmem>>, vector<1x32x128xf32>
    %147 = vector.shape_cast %146 : vector<1x32x128xf32> to vector<32x128xf32>
    %148 = vector.shape_cast %144 : vector<32x128xf32> to vector<1x32x128xf32>
    tpu.vector_store %arg9[%145, %c0_64, %c0_65], %148 {strides = array<i32>} : memref<8x32x128xf32, #tpu.memory_space<vmem>>, vector<1x32x128xf32>,
    %c5_i32_66 = arith.constant 5 : i32
    %149 = arith.index_cast %c5_i32_66 : i32 to index
    %c0_67 = arith.constant 0 : index
    %c0_68 = arith.constant 0 : index
    %150 = vector.load %arg9[%149, %c0_67, %c0_68] : memref<8x32x128xf32, #tpu.memory_space<vmem>>, vector<1x32x128xf32>
    %151 = vector.shape_cast %150 : vector<1x32x128xf32> to vector<32x128xf32>
    %cst_69 = arith.constant dense<0.000000e+00> : vector<32x128xf32>
    %152 = tpu.matmul %93, %144, %cst_69 {dimension_numbers = #tpu.dot_dimension_numbers<[1], [0], [0], [1], [0, 0, 1, 1], [], []>} : vector<32x32xf32>, vector<32x128xf32>, vector<32x128xf32> -> vector<32x128xf32>
    %153 = arith.addf %151, %152 : vector<32x128xf32>
    %cst_70 = arith.constant 0.000000e+00 : f32
    %154 = vector.broadcast %cst_70 : f32 to vector<32x128xf32>
    %155 = arith.maximumf %153, %154 : vector<32x128xf32>
    %156 = arith.index_cast %c5_i32_66 : i32 to index
    %c0_71 = arith.constant 0 : index
    %c0_72 = arith.constant 0 : index
    %157 = vector.load %arg9[%156, %c0_71, %c0_72] : memref<8x32x128xf32, #tpu.memory_space<vmem>>, vector<1x32x128xf32>
    %158 = vector.shape_cast %157 : vector<1x32x128xf32> to vector<32x128xf32>
    %159 = vector.shape_cast %155 : vector<32x128xf32> to vector<1x32x128xf32>
    tpu.vector_store %arg9[%156, %c0_71, %c0_72], %159 {strides = array<i32>} : memref<8x32x128xf32, #tpu.memory_space<vmem>>, vector<1x32x128xf32>,
    %c6_i32_73 = arith.constant 6 : i32
    %160 = arith.index_cast %c6_i32_73 : i32 to index
    %c0_74 = arith.constant 0 : index
    %c0_75 = arith.constant 0 : index
    %161 = vector.load %arg9[%160, %c0_74, %c0_75] : memref<8x32x128xf32, #tpu.memory_space<vmem>>, vector<1x32x128xf32>
    %162 = vector.shape_cast %161 : vector<1x32x128xf32> to vector<32x128xf32>
    %cst_76 = arith.constant dense<0.000000e+00> : vector<32x128xf32>
    %163 = tpu.matmul %93, %155, %cst_76 {dimension_numbers = #tpu.dot_dimension_numbers<[1], [0], [0], [1], [0, 0, 1, 1], [], []>} : vector<32x32xf32>, vector<32x128xf32>, vector<32x128xf32> -> vector<32x128xf32>
    %164 = arith.addf %162, %163 : vector<32x128xf32>
    %cst_77 = arith.constant 0.000000e+00 : f32
    %165 = vector.broadcast %cst_77 : f32 to vector<32x128xf32>
    %166 = arith.maximumf %164, %165 : vector<32x128xf32>
    %167 = arith.index_cast %c6_i32_73 : i32 to index
    %c0_78 = arith.constant 0 : index
    %c0_79 = arith.constant 0 : index
    %168 = vector.load %arg9[%167, %c0_78, %c0_79] : memref<8x32x128xf32, #tpu.memory_space<vmem>>, vector<1x32x128xf32>
    %169 = vector.shape_cast %168 : vector<1x32x128xf32> to vector<32x128xf32>
    %170 = vector.shape_cast %166 : vector<32x128xf32> to vector<1x32x128xf32>
    tpu.vector_store %arg9[%167, %c0_78, %c0_79], %170 {strides = array<i32>} : memref<8x32x128xf32, #tpu.memory_space<vmem>>, vector<1x32x128xf32>,
    %c7_i32_80 = arith.constant 7 : i32
    %171 = arith.index_cast %c7_i32_80 : i32 to index
    %c0_81 = arith.constant 0 : index
    %c0_82 = arith.constant 0 : index
    %172 = vector.load %arg9[%171, %c0_81, %c0_82] : memref<8x32x128xf32, #tpu.memory_space<vmem>>, vector<1x32x128xf32>
    %173 = vector.shape_cast %172 : vector<1x32x128xf32> to vector<32x128xf32>
    %cst_83 = arith.constant dense<0.000000e+00> : vector<32x128xf32>
    %174 = tpu.matmul %93, %166, %cst_83 {dimension_numbers = #tpu.dot_dimension_numbers<[1], [0], [0], [1], [0, 0, 1, 1], [], []>} : vector<32x32xf32>, vector<32x128xf32>, vector<32x128xf32> -> vector<32x128xf32>
    %175 = arith.addf %173, %174 : vector<32x128xf32>
    %cst_84 = arith.constant 0.000000e+00 : f32
    %176 = vector.broadcast %cst_84 : f32 to vector<32x128xf32>
    %177 = arith.maximumf %175, %176 : vector<32x128xf32>
    %178 = arith.index_cast %c7_i32_80 : i32 to index
    %c0_85 = arith.constant 0 : index
    %c0_86 = arith.constant 0 : index
    %179 = vector.load %arg9[%178, %c0_85, %c0_86] : memref<8x32x128xf32, #tpu.memory_space<vmem>>, vector<1x32x128xf32>
    %180 = vector.shape_cast %179 : vector<1x32x128xf32> to vector<32x128xf32>
    %181 = vector.shape_cast %177 : vector<32x128xf32> to vector<1x32x128xf32>
    tpu.vector_store %arg9[%178, %c0_85, %c0_86], %181 {strides = array<i32>} : memref<8x32x128xf32, #tpu.memory_space<vmem>>, vector<1x32x128xf32>,
    %c8_i32_87 = arith.constant 8 : i32
    %c0_88 = arith.constant 0 : index
    %c0_89 = arith.constant 0 : index
    %c0_90 = arith.constant 0 : index
    %182 = vector.load %arg3[%c0_88, %c0_89, %c0_90] : memref<2x32x32xf32, #tpu.memory_space<vmem>>, vector<1x32x32xf32>
    %183 = vector.shape_cast %182 : vector<1x32x32xf32> to vector<32x32xf32>
    %c1 = arith.constant 1 : index
    %c0_91 = arith.constant 0 : index
    %c0_92 = arith.constant 0 : index
    %184 = vector.load %arg5[%c1, %c0_91, %c0_92] : memref<3x32x1xf32, #tpu.memory_space<vmem>>, vector<1x32x1xf32>
    %185 = vector.shape_cast %184 : vector<1x32x1xf32> to vector<32x1xf32>
    %c0_i32_93 = arith.constant 0 : i32
    %186 = arith.index_cast %c0_i32_93 : i32 to index
    %c0_94 = arith.constant 0 : index
    %c0_95 = arith.constant 0 : index
    %187 = vector.load %arg9[%186, %c0_94, %c0_95] : memref<8x32x128xf32, #tpu.memory_space<vmem>>, vector<1x32x128xf32>
    %188 = vector.shape_cast %187 : vector<1x32x128xf32> to vector<32x128xf32>
    %cst_96 = arith.constant dense<0.000000e+00> : vector<32x128xf32>
    %189 = tpu.matmul %183, %188, %cst_96 {dimension_numbers = #tpu.dot_dimension_numbers<[1], [0], [0], [1], [0, 0, 1, 1], [], []>} : vector<32x32xf32>, vector<32x128xf32>, vector<32x128xf32> -> vector<32x128xf32>
    %190 = vector.broadcast %185 : vector<32x1xf32> to vector<32x128xf32>
    %191 = arith.addf %189, %190 : vector<32x128xf32>
    %192 = arith.index_cast %c0_i32_93 : i32 to index
    %c0_97 = arith.constant 0 : index
    %c0_98 = arith.constant 0 : index
    %193 = vector.load %arg9[%192, %c0_97, %c0_98] : memref<8x32x128xf32, #tpu.memory_space<vmem>>, vector<1x32x128xf32>
    %194 = vector.shape_cast %193 : vector<1x32x128xf32> to vector<32x128xf32>
    %195 = vector.shape_cast %191 : vector<32x128xf32> to vector<1x32x128xf32>
    tpu.vector_store %arg9[%192, %c0_97, %c0_98], %195 {strides = array<i32>} : memref<8x32x128xf32, #tpu.memory_space<vmem>>, vector<1x32x128xf32>,
    %c1_i32_99 = arith.constant 1 : i32
    %196 = arith.index_cast %c1_i32_99 : i32 to index
    %c0_100 = arith.constant 0 : index
    %c0_101 = arith.constant 0 : index
    %197 = vector.load %arg9[%196, %c0_100, %c0_101] : memref<8x32x128xf32, #tpu.memory_space<vmem>>, vector<1x32x128xf32>
    %198 = vector.shape_cast %197 : vector<1x32x128xf32> to vector<32x128xf32>
    %cst_102 = arith.constant dense<0.000000e+00> : vector<32x128xf32>
    %199 = tpu.matmul %183, %198, %cst_102 {dimension_numbers = #tpu.dot_dimension_numbers<[1], [0], [0], [1], [0, 0, 1, 1], [], []>} : vector<32x32xf32>, vector<32x128xf32>, vector<32x128xf32> -> vector<32x128xf32>
    %200 = vector.broadcast %185 : vector<32x1xf32> to vector<32x128xf32>
    %201 = arith.addf %199, %200 : vector<32x128xf32>
    %202 = arith.index_cast %c1_i32_99 : i32 to index
    %c0_103 = arith.constant 0 : index
    %c0_104 = arith.constant 0 : index
    %203 = vector.load %arg9[%202, %c0_103, %c0_104] : memref<8x32x128xf32, #tpu.memory_space<vmem>>, vector<1x32x128xf32>
    %204 = vector.shape_cast %203 : vector<1x32x128xf32> to vector<32x128xf32>
    %205 = vector.shape_cast %201 : vector<32x128xf32> to vector<1x32x128xf32>
    tpu.vector_store %arg9[%202, %c0_103, %c0_104], %205 {strides = array<i32>} : memref<8x32x128xf32, #tpu.memory_space<vmem>>, vector<1x32x128xf32>,
    %c2_i32_105 = arith.constant 2 : i32
    %206 = arith.index_cast %c2_i32_105 : i32 to index
    %c0_106 = arith.constant 0 : index
    %c0_107 = arith.constant 0 : index
    %207 = vector.load %arg9[%206, %c0_106, %c0_107] : memref<8x32x128xf32, #tpu.memory_space<vmem>>, vector<1x32x128xf32>
    %208 = vector.shape_cast %207 : vector<1x32x128xf32> to vector<32x128xf32>
    %cst_108 = arith.constant dense<0.000000e+00> : vector<32x128xf32>
    %209 = tpu.matmul %183, %208, %cst_108 {dimension_numbers = #tpu.dot_dimension_numbers<[1], [0], [0], [1], [0, 0, 1, 1], [], []>} : vector<32x32xf32>, vector<32x128xf32>, vector<32x128xf32> -> vector<32x128xf32>
    %210 = vector.broadcast %185 : vector<32x1xf32> to vector<32x128xf32>
    %211 = arith.addf %209, %210 : vector<32x128xf32>
    %212 = arith.index_cast %c2_i32_105 : i32 to index
    %c0_109 = arith.constant 0 : index
    %c0_110 = arith.constant 0 : index
    %213 = vector.load %arg9[%212, %c0_109, %c0_110] : memref<8x32x128xf32, #tpu.memory_space<vmem>>, vector<1x32x128xf32>
    %214 = vector.shape_cast %213 : vector<1x32x128xf32> to vector<32x128xf32>
    %215 = vector.shape_cast %211 : vector<32x128xf32> to vector<1x32x128xf32>
    tpu.vector_store %arg9[%212, %c0_109, %c0_110], %215 {strides = array<i32>} : memref<8x32x128xf32, #tpu.memory_space<vmem>>, vector<1x32x128xf32>,
    %c3_i32_111 = arith.constant 3 : i32
    %216 = arith.index_cast %c3_i32_111 : i32 to index
    %c0_112 = arith.constant 0 : index
    %c0_113 = arith.constant 0 : index
    %217 = vector.load %arg9[%216, %c0_112, %c0_113] : memref<8x32x128xf32, #tpu.memory_space<vmem>>, vector<1x32x128xf32>
    %218 = vector.shape_cast %217 : vector<1x32x128xf32> to vector<32x128xf32>
    %cst_114 = arith.constant dense<0.000000e+00> : vector<32x128xf32>
    %219 = tpu.matmul %183, %218, %cst_114 {dimension_numbers = #tpu.dot_dimension_numbers<[1], [0], [0], [1], [0, 0, 1, 1], [], []>} : vector<32x32xf32>, vector<32x128xf32>, vector<32x128xf32> -> vector<32x128xf32>
    %220 = vector.broadcast %185 : vector<32x1xf32> to vector<32x128xf32>
    %221 = arith.addf %219, %220 : vector<32x128xf32>
    %222 = arith.index_cast %c3_i32_111 : i32 to index
    %c0_115 = arith.constant 0 : index
    %c0_116 = arith.constant 0 : index
    %223 = vector.load %arg9[%222, %c0_115, %c0_116] : memref<8x32x128xf32, #tpu.memory_space<vmem>>, vector<1x32x128xf32>
    %224 = vector.shape_cast %223 : vector<1x32x128xf32> to vector<32x128xf32>
    %225 = vector.shape_cast %221 : vector<32x128xf32> to vector<1x32x128xf32>
    tpu.vector_store %arg9[%222, %c0_115, %c0_116], %225 {strides = array<i32>} : memref<8x32x128xf32, #tpu.memory_space<vmem>>, vector<1x32x128xf32>,
    %c4_i32_117 = arith.constant 4 : i32
    %226 = arith.index_cast %c4_i32_117 : i32 to index
    %c0_118 = arith.constant 0 : index
    %c0_119 = arith.constant 0 : index
    %227 = vector.load %arg9[%226, %c0_118, %c0_119] : memref<8x32x128xf32, #tpu.memory_space<vmem>>, vector<1x32x128xf32>
    %228 = vector.shape_cast %227 : vector<1x32x128xf32> to vector<32x128xf32>
    %cst_120 = arith.constant dense<0.000000e+00> : vector<32x128xf32>
    %229 = tpu.matmul %183, %228, %cst_120 {dimension_numbers = #tpu.dot_dimension_numbers<[1], [0], [0], [1], [0, 0, 1, 1], [], []>} : vector<32x32xf32>, vector<32x128xf32>, vector<32x128xf32> -> vector<32x128xf32>
    %230 = vector.broadcast %185 : vector<32x1xf32> to vector<32x128xf32>
    %231 = arith.addf %229, %230 : vector<32x128xf32>
    %232 = arith.index_cast %c4_i32_117 : i32 to index
    %c0_121 = arith.constant 0 : index
    %c0_122 = arith.constant 0 : index
    %233 = vector.load %arg9[%232, %c0_121, %c0_122] : memref<8x32x128xf32, #tpu.memory_space<vmem>>, vector<1x32x128xf32>
    %234 = vector.shape_cast %233 : vector<1x32x128xf32> to vector<32x128xf32>
    %235 = vector.shape_cast %231 : vector<32x128xf32> to vector<1x32x128xf32>
    tpu.vector_store %arg9[%232, %c0_121, %c0_122], %235 {strides = array<i32>} : memref<8x32x128xf32, #tpu.memory_space<vmem>>, vector<1x32x128xf32>,
    %c5_i32_123 = arith.constant 5 : i32
    %236 = arith.index_cast %c5_i32_123 : i32 to index
    %c0_124 = arith.constant 0 : index
    %c0_125 = arith.constant 0 : index
    %237 = vector.load %arg9[%236, %c0_124, %c0_125] : memref<8x32x128xf32, #tpu.memory_space<vmem>>, vector<1x32x128xf32>
    %238 = vector.shape_cast %237 : vector<1x32x128xf32> to vector<32x128xf32>
    %cst_126 = arith.constant dense<0.000000e+00> : vector<32x128xf32>
    %239 = tpu.matmul %183, %238, %cst_126 {dimension_numbers = #tpu.dot_dimension_numbers<[1], [0], [0], [1], [0, 0, 1, 1], [], []>} : vector<32x32xf32>, vector<32x128xf32>, vector<32x128xf32> -> vector<32x128xf32>
    %240 = vector.broadcast %185 : vector<32x1xf32> to vector<32x128xf32>
    %241 = arith.addf %239, %240 : vector<32x128xf32>
    %242 = arith.index_cast %c5_i32_123 : i32 to index
    %c0_127 = arith.constant 0 : index
    %c0_128 = arith.constant 0 : index
    %243 = vector.load %arg9[%242, %c0_127, %c0_128] : memref<8x32x128xf32, #tpu.memory_space<vmem>>, vector<1x32x128xf32>
    %244 = vector.shape_cast %243 : vector<1x32x128xf32> to vector<32x128xf32>
    %245 = vector.shape_cast %241 : vector<32x128xf32> to vector<1x32x128xf32>
    tpu.vector_store %arg9[%242, %c0_127, %c0_128], %245 {strides = array<i32>} : memref<8x32x128xf32, #tpu.memory_space<vmem>>, vector<1x32x128xf32>,
    %c6_i32_129 = arith.constant 6 : i32
    %246 = arith.index_cast %c6_i32_129 : i32 to index
    %c0_130 = arith.constant 0 : index
    %c0_131 = arith.constant 0 : index
    %247 = vector.load %arg9[%246, %c0_130, %c0_131] : memref<8x32x128xf32, #tpu.memory_space<vmem>>, vector<1x32x128xf32>
    %248 = vector.shape_cast %247 : vector<1x32x128xf32> to vector<32x128xf32>
    %cst_132 = arith.constant dense<0.000000e+00> : vector<32x128xf32>
    %249 = tpu.matmul %183, %248, %cst_132 {dimension_numbers = #tpu.dot_dimension_numbers<[1], [0], [0], [1], [0, 0, 1, 1], [], []>} : vector<32x32xf32>, vector<32x128xf32>, vector<32x128xf32> -> vector<32x128xf32>
    %250 = vector.broadcast %185 : vector<32x1xf32> to vector<32x128xf32>
    %251 = arith.addf %249, %250 : vector<32x128xf32>
    %252 = arith.index_cast %c6_i32_129 : i32 to index
    %c0_133 = arith.constant 0 : index
    %c0_134 = arith.constant 0 : index
    %253 = vector.load %arg9[%252, %c0_133, %c0_134] : memref<8x32x128xf32, #tpu.memory_space<vmem>>, vector<1x32x128xf32>
    %254 = vector.shape_cast %253 : vector<1x32x128xf32> to vector<32x128xf32>
    %255 = vector.shape_cast %251 : vector<32x128xf32> to vector<1x32x128xf32>
    tpu.vector_store %arg9[%252, %c0_133, %c0_134], %255 {strides = array<i32>} : memref<8x32x128xf32, #tpu.memory_space<vmem>>, vector<1x32x128xf32>,
    %c7_i32_135 = arith.constant 7 : i32
    %256 = arith.index_cast %c7_i32_135 : i32 to index
    %c0_136 = arith.constant 0 : index
    %c0_137 = arith.constant 0 : index
    %257 = vector.load %arg9[%256, %c0_136, %c0_137] : memref<8x32x128xf32, #tpu.memory_space<vmem>>, vector<1x32x128xf32>
    %258 = vector.shape_cast %257 : vector<1x32x128xf32> to vector<32x128xf32>
    %cst_138 = arith.constant dense<0.000000e+00> : vector<32x128xf32>
    %259 = tpu.matmul %183, %258, %cst_138 {dimension_numbers = #tpu.dot_dimension_numbers<[1], [0], [0], [1], [0, 0, 1, 1], [], []>} : vector<32x32xf32>, vector<32x128xf32>, vector<32x128xf32> -> vector<32x128xf32>
    %260 = vector.broadcast %185 : vector<32x1xf32> to vector<32x128xf32>
    %261 = arith.addf %259, %260 : vector<32x128xf32>
    %262 = arith.index_cast %c7_i32_135 : i32 to index
    %c0_139 = arith.constant 0 : index
    %c0_140 = arith.constant 0 : index
    %263 = vector.load %arg9[%262, %c0_139, %c0_140] : memref<8x32x128xf32, #tpu.memory_space<vmem>>, vector<1x32x128xf32>
    %264 = vector.shape_cast %263 : vector<1x32x128xf32> to vector<32x128xf32>
    %265 = vector.shape_cast %261 : vector<32x128xf32> to vector<1x32x128xf32>
    tpu.vector_store %arg9[%262, %c0_139, %c0_140], %265 {strides = array<i32>} : memref<8x32x128xf32, #tpu.memory_space<vmem>>, vector<1x32x128xf32>,
    %c8_i32_141 = arith.constant 8 : i32
    %c1_142 = arith.constant 1 : index
    %c0_143 = arith.constant 0 : index
    %c0_144 = arith.constant 0 : index
    %266 = vector.load %arg4[%c1_142, %c0_143, %c0_144] : memref<3x32x32xf32, #tpu.memory_space<vmem>>, vector<1x32x32xf32>
    %267 = vector.shape_cast %266 : vector<1x32x32xf32> to vector<32x32xf32>
    %c0_i32_145 = arith.constant 0 : i32
    %268 = arith.index_cast %c0_i32_145 : i32 to index
    %c0_146 = arith.constant 0 : index
    %c0_147 = arith.constant 0 : index
    %269 = vector.load %arg9[%268, %c0_146, %c0_147] : memref<8x32x128xf32, #tpu.memory_space<vmem>>, vector<1x32x128xf32>
    %270 = vector.shape_cast %269 : vector<1x32x128xf32> to vector<32x128xf32>
    %cst_148 = arith.constant dense<0.000000e+00> : vector<32x128xf32>
    %271 = tpu.matmul %267, %91, %cst_148 {dimension_numbers = #tpu.dot_dimension_numbers<[1], [0], [0], [1], [0, 0, 1, 1], [], []>} : vector<32x32xf32>, vector<32x128xf32>, vector<32x128xf32> -> vector<32x128xf32>
    %272 = arith.addf %270, %271 : vector<32x128xf32>
    %cst_149 = arith.constant 0.000000e+00 : f32
    %273 = vector.broadcast %cst_149 : f32 to vector<32x128xf32>
    %274 = arith.maximumf %272, %273 : vector<32x128xf32>
    %275 = arith.index_cast %c0_i32_145 : i32 to index
    %c0_150 = arith.constant 0 : index
    %c0_151 = arith.constant 0 : index
    %276 = vector.load %arg9[%275, %c0_150, %c0_151] : memref<8x32x128xf32, #tpu.memory_space<vmem>>, vector<1x32x128xf32>
    %277 = vector.shape_cast %276 : vector<1x32x128xf32> to vector<32x128xf32>
    %278 = vector.shape_cast %274 : vector<32x128xf32> to vector<1x32x128xf32>
    tpu.vector_store %arg9[%275, %c0_150, %c0_151], %278 {strides = array<i32>} : memref<8x32x128xf32, #tpu.memory_space<vmem>>, vector<1x32x128xf32>,
    %c1_i32_152 = arith.constant 1 : i32
    %279 = arith.index_cast %c1_i32_152 : i32 to index
    %c0_153 = arith.constant 0 : index
    %c0_154 = arith.constant 0 : index
    %280 = vector.load %arg9[%279, %c0_153, %c0_154] : memref<8x32x128xf32, #tpu.memory_space<vmem>>, vector<1x32x128xf32>
    %281 = vector.shape_cast %280 : vector<1x32x128xf32> to vector<32x128xf32>
    %cst_155 = arith.constant dense<0.000000e+00> : vector<32x128xf32>
    %282 = tpu.matmul %267, %274, %cst_155 {dimension_numbers = #tpu.dot_dimension_numbers<[1], [0], [0], [1], [0, 0, 1, 1], [], []>} : vector<32x32xf32>, vector<32x128xf32>, vector<32x128xf32> -> vector<32x128xf32>
    %283 = arith.addf %281, %282 : vector<32x128xf32>
    %cst_156 = arith.constant 0.000000e+00 : f32
    %284 = vector.broadcast %cst_156 : f32 to vector<32x128xf32>
    %285 = arith.maximumf %283, %284 : vector<32x128xf32>
    %286 = arith.index_cast %c1_i32_152 : i32 to index
    %c0_157 = arith.constant 0 : index
    %c0_158 = arith.constant 0 : index
    %287 = vector.load %arg9[%286, %c0_157, %c0_158] : memref<8x32x128xf32, #tpu.memory_space<vmem>>, vector<1x32x128xf32>
    %288 = vector.shape_cast %287 : vector<1x32x128xf32> to vector<32x128xf32>
    %289 = vector.shape_cast %285 : vector<32x128xf32> to vector<1x32x128xf32>
    tpu.vector_store %arg9[%286, %c0_157, %c0_158], %289 {strides = array<i32>} : memref<8x32x128xf32, #tpu.memory_space<vmem>>, vector<1x32x128xf32>,
    %c2_i32_159 = arith.constant 2 : i32
    %290 = arith.index_cast %c2_i32_159 : i32 to index
    %c0_160 = arith.constant 0 : index
    %c0_161 = arith.constant 0 : index
    %291 = vector.load %arg9[%290, %c0_160, %c0_161] : memref<8x32x128xf32, #tpu.memory_space<vmem>>, vector<1x32x128xf32>
    %292 = vector.shape_cast %291 : vector<1x32x128xf32> to vector<32x128xf32>
    %cst_162 = arith.constant dense<0.000000e+00> : vector<32x128xf32>
    %293 = tpu.matmul %267, %285, %cst_162 {dimension_numbers = #tpu.dot_dimension_numbers<[1], [0], [0], [1], [0, 0, 1, 1], [], []>} : vector<32x32xf32>, vector<32x128xf32>, vector<32x128xf32> -> vector<32x128xf32>
    %294 = arith.addf %292, %293 : vector<32x128xf32>
    %cst_163 = arith.constant 0.000000e+00 : f32
    %295 = vector.broadcast %cst_163 : f32 to vector<32x128xf32>
    %296 = arith.maximumf %294, %295 : vector<32x128xf32>
    %297 = arith.index_cast %c2_i32_159 : i32 to index
    %c0_164 = arith.constant 0 : index
    %c0_165 = arith.constant 0 : index
    %298 = vector.load %arg9[%297, %c0_164, %c0_165] : memref<8x32x128xf32, #tpu.memory_space<vmem>>, vector<1x32x128xf32>
    %299 = vector.shape_cast %298 : vector<1x32x128xf32> to vector<32x128xf32>
    %300 = vector.shape_cast %296 : vector<32x128xf32> to vector<1x32x128xf32>
    tpu.vector_store %arg9[%297, %c0_164, %c0_165], %300 {strides = array<i32>} : memref<8x32x128xf32, #tpu.memory_space<vmem>>, vector<1x32x128xf32>,
    %c3_i32_166 = arith.constant 3 : i32
    %301 = arith.index_cast %c3_i32_166 : i32 to index
    %c0_167 = arith.constant 0 : index
    %c0_168 = arith.constant 0 : index
    %302 = vector.load %arg9[%301, %c0_167, %c0_168] : memref<8x32x128xf32, #tpu.memory_space<vmem>>, vector<1x32x128xf32>
    %303 = vector.shape_cast %302 : vector<1x32x128xf32> to vector<32x128xf32>
    %cst_169 = arith.constant dense<0.000000e+00> : vector<32x128xf32>
    %304 = tpu.matmul %267, %296, %cst_169 {dimension_numbers = #tpu.dot_dimension_numbers<[1], [0], [0], [1], [0, 0, 1, 1], [], []>} : vector<32x32xf32>, vector<32x128xf32>, vector<32x128xf32> -> vector<32x128xf32>
    %305 = arith.addf %303, %304 : vector<32x128xf32>
    %cst_170 = arith.constant 0.000000e+00 : f32
    %306 = vector.broadcast %cst_170 : f32 to vector<32x128xf32>
    %307 = arith.maximumf %305, %306 : vector<32x128xf32>
    %308 = arith.index_cast %c3_i32_166 : i32 to index
    %c0_171 = arith.constant 0 : index
    %c0_172 = arith.constant 0 : index
    %309 = vector.load %arg9[%308, %c0_171, %c0_172] : memref<8x32x128xf32, #tpu.memory_space<vmem>>, vector<1x32x128xf32>
    %310 = vector.shape_cast %309 : vector<1x32x128xf32> to vector<32x128xf32>
    %311 = vector.shape_cast %307 : vector<32x128xf32> to vector<1x32x128xf32>
    tpu.vector_store %arg9[%308, %c0_171, %c0_172], %311 {strides = array<i32>} : memref<8x32x128xf32, #tpu.memory_space<vmem>>, vector<1x32x128xf32>,
    %c4_i32_173 = arith.constant 4 : i32
    %312 = arith.index_cast %c4_i32_173 : i32 to index
    %c0_174 = arith.constant 0 : index
    %c0_175 = arith.constant 0 : index
    %313 = vector.load %arg9[%312, %c0_174, %c0_175] : memref<8x32x128xf32, #tpu.memory_space<vmem>>, vector<1x32x128xf32>
    %314 = vector.shape_cast %313 : vector<1x32x128xf32> to vector<32x128xf32>
    %cst_176 = arith.constant dense<0.000000e+00> : vector<32x128xf32>
    %315 = tpu.matmul %267, %307, %cst_176 {dimension_numbers = #tpu.dot_dimension_numbers<[1], [0], [0], [1], [0, 0, 1, 1], [], []>} : vector<32x32xf32>, vector<32x128xf32>, vector<32x128xf32> -> vector<32x128xf32>
    %316 = arith.addf %314, %315 : vector<32x128xf32>
    %cst_177 = arith.constant 0.000000e+00 : f32
    %317 = vector.broadcast %cst_177 : f32 to vector<32x128xf32>
    %318 = arith.maximumf %316, %317 : vector<32x128xf32>
    %319 = arith.index_cast %c4_i32_173 : i32 to index
    %c0_178 = arith.constant 0 : index
    %c0_179 = arith.constant 0 : index
    %320 = vector.load %arg9[%319, %c0_178, %c0_179] : memref<8x32x128xf32, #tpu.memory_space<vmem>>, vector<1x32x128xf32>
    %321 = vector.shape_cast %320 : vector<1x32x128xf32> to vector<32x128xf32>
    %322 = vector.shape_cast %318 : vector<32x128xf32> to vector<1x32x128xf32>
    tpu.vector_store %arg9[%319, %c0_178, %c0_179], %322 {strides = array<i32>} : memref<8x32x128xf32, #tpu.memory_space<vmem>>, vector<1x32x128xf32>,
    %c5_i32_180 = arith.constant 5 : i32
    %323 = arith.index_cast %c5_i32_180 : i32 to index
    %c0_181 = arith.constant 0 : index
    %c0_182 = arith.constant 0 : index
    %324 = vector.load %arg9[%323, %c0_181, %c0_182] : memref<8x32x128xf32, #tpu.memory_space<vmem>>, vector<1x32x128xf32>
    %325 = vector.shape_cast %324 : vector<1x32x128xf32> to vector<32x128xf32>
    %cst_183 = arith.constant dense<0.000000e+00> : vector<32x128xf32>
    %326 = tpu.matmul %267, %318, %cst_183 {dimension_numbers = #tpu.dot_dimension_numbers<[1], [0], [0], [1], [0, 0, 1, 1], [], []>} : vector<32x32xf32>, vector<32x128xf32>, vector<32x128xf32> -> vector<32x128xf32>
    %327 = arith.addf %325, %326 : vector<32x128xf32>
    %cst_184 = arith.constant 0.000000e+00 : f32
    %328 = vector.broadcast %cst_184 : f32 to vector<32x128xf32>
    %329 = arith.maximumf %327, %328 : vector<32x128xf32>
    %330 = arith.index_cast %c5_i32_180 : i32 to index
    %c0_185 = arith.constant 0 : index
    %c0_186 = arith.constant 0 : index
    %331 = vector.load %arg9[%330, %c0_185, %c0_186] : memref<8x32x128xf32, #tpu.memory_space<vmem>>, vector<1x32x128xf32>
    %332 = vector.shape_cast %331 : vector<1x32x128xf32> to vector<32x128xf32>
    %333 = vector.shape_cast %329 : vector<32x128xf32> to vector<1x32x128xf32>
    tpu.vector_store %arg9[%330, %c0_185, %c0_186], %333 {strides = array<i32>} : memref<8x32x128xf32, #tpu.memory_space<vmem>>, vector<1x32x128xf32>,
    %c6_i32_187 = arith.constant 6 : i32
    %334 = arith.index_cast %c6_i32_187 : i32 to index
    %c0_188 = arith.constant 0 : index
    %c0_189 = arith.constant 0 : index
    %335 = vector.load %arg9[%334, %c0_188, %c0_189] : memref<8x32x128xf32, #tpu.memory_space<vmem>>, vector<1x32x128xf32>
    %336 = vector.shape_cast %335 : vector<1x32x128xf32> to vector<32x128xf32>
    %cst_190 = arith.constant dense<0.000000e+00> : vector<32x128xf32>
    %337 = tpu.matmul %267, %329, %cst_190 {dimension_numbers = #tpu.dot_dimension_numbers<[1], [0], [0], [1], [0, 0, 1, 1], [], []>} : vector<32x32xf32>, vector<32x128xf32>, vector<32x128xf32> -> vector<32x128xf32>
    %338 = arith.addf %336, %337 : vector<32x128xf32>
    %cst_191 = arith.constant 0.000000e+00 : f32
    %339 = vector.broadcast %cst_191 : f32 to vector<32x128xf32>
    %340 = arith.maximumf %338, %339 : vector<32x128xf32>
    %341 = arith.index_cast %c6_i32_187 : i32 to index
    %c0_192 = arith.constant 0 : index
    %c0_193 = arith.constant 0 : index
    %342 = vector.load %arg9[%341, %c0_192, %c0_193] : memref<8x32x128xf32, #tpu.memory_space<vmem>>, vector<1x32x128xf32>
    %343 = vector.shape_cast %342 : vector<1x32x128xf32> to vector<32x128xf32>
    %344 = vector.shape_cast %340 : vector<32x128xf32> to vector<1x32x128xf32>
    tpu.vector_store %arg9[%341, %c0_192, %c0_193], %344 {strides = array<i32>} : memref<8x32x128xf32, #tpu.memory_space<vmem>>, vector<1x32x128xf32>,
    %c7_i32_194 = arith.constant 7 : i32
    %345 = arith.index_cast %c7_i32_194 : i32 to index
    %c0_195 = arith.constant 0 : index
    %c0_196 = arith.constant 0 : index
    %346 = vector.load %arg9[%345, %c0_195, %c0_196] : memref<8x32x128xf32, #tpu.memory_space<vmem>>, vector<1x32x128xf32>
    %347 = vector.shape_cast %346 : vector<1x32x128xf32> to vector<32x128xf32>
    %cst_197 = arith.constant dense<0.000000e+00> : vector<32x128xf32>
    %348 = tpu.matmul %267, %340, %cst_197 {dimension_numbers = #tpu.dot_dimension_numbers<[1], [0], [0], [1], [0, 0, 1, 1], [], []>} : vector<32x32xf32>, vector<32x128xf32>, vector<32x128xf32> -> vector<32x128xf32>
    %349 = arith.addf %347, %348 : vector<32x128xf32>
    %cst_198 = arith.constant 0.000000e+00 : f32
    %350 = vector.broadcast %cst_198 : f32 to vector<32x128xf32>
    %351 = arith.maximumf %349, %350 : vector<32x128xf32>
    %352 = arith.index_cast %c7_i32_194 : i32 to index
    %c0_199 = arith.constant 0 : index
    %c0_200 = arith.constant 0 : index
    %353 = vector.load %arg9[%352, %c0_199, %c0_200] : memref<8x32x128xf32, #tpu.memory_space<vmem>>, vector<1x32x128xf32>
    %354 = vector.shape_cast %353 : vector<1x32x128xf32> to vector<32x128xf32>
    %355 = vector.shape_cast %351 : vector<32x128xf32> to vector<1x32x128xf32>
    tpu.vector_store %arg9[%352, %c0_199, %c0_200], %355 {strides = array<i32>} : memref<8x32x128xf32, #tpu.memory_space<vmem>>, vector<1x32x128xf32>,
    %c8_i32_201 = arith.constant 8 : i32
    %c1_202 = arith.constant 1 : index
    %c0_203 = arith.constant 0 : index
    %c0_204 = arith.constant 0 : index
    %356 = vector.load %arg3[%c1_202, %c0_203, %c0_204] : memref<2x32x32xf32, #tpu.memory_space<vmem>>, vector<1x32x32xf32>
    %357 = vector.shape_cast %356 : vector<1x32x32xf32> to vector<32x32xf32>
    %c2 = arith.constant 2 : index
    %c0_205 = arith.constant 0 : index
    %c0_206 = arith.constant 0 : index
    %358 = vector.load %arg5[%c2, %c0_205, %c0_206] : memref<3x32x1xf32, #tpu.memory_space<vmem>>, vector<1x32x1xf32>
    %359 = vector.shape_cast %358 : vector<1x32x1xf32> to vector<32x1xf32>
    %c0_i32_207 = arith.constant 0 : i32
    %360 = arith.index_cast %c0_i32_207 : i32 to index
    %c0_208 = arith.constant 0 : index
    %c0_209 = arith.constant 0 : index
    %361 = vector.load %arg9[%360, %c0_208, %c0_209] : memref<8x32x128xf32, #tpu.memory_space<vmem>>, vector<1x32x128xf32>
    %362 = vector.shape_cast %361 : vector<1x32x128xf32> to vector<32x128xf32>
    %cst_210 = arith.constant dense<0.000000e+00> : vector<32x128xf32>
    %363 = tpu.matmul %357, %362, %cst_210 {dimension_numbers = #tpu.dot_dimension_numbers<[1], [0], [0], [1], [0, 0, 1, 1], [], []>} : vector<32x32xf32>, vector<32x128xf32>, vector<32x128xf32> -> vector<32x128xf32>
    %364 = vector.broadcast %359 : vector<32x1xf32> to vector<32x128xf32>
    %365 = arith.addf %363, %364 : vector<32x128xf32>
    %366 = arith.index_cast %c0_i32_207 : i32 to index
    %c0_211 = arith.constant 0 : index
    %c0_212 = arith.constant 0 : index
    %367 = vector.load %arg9[%366, %c0_211, %c0_212] : memref<8x32x128xf32, #tpu.memory_space<vmem>>, vector<1x32x128xf32>
    %368 = vector.shape_cast %367 : vector<1x32x128xf32> to vector<32x128xf32>
    %369 = vector.shape_cast %365 : vector<32x128xf32> to vector<1x32x128xf32>
    tpu.vector_store %arg9[%366, %c0_211, %c0_212], %369 {strides = array<i32>} : memref<8x32x128xf32, #tpu.memory_space<vmem>>, vector<1x32x128xf32>,
    %c1_i32_213 = arith.constant 1 : i32
    %370 = arith.index_cast %c1_i32_213 : i32 to index
    %c0_214 = arith.constant 0 : index
    %c0_215 = arith.constant 0 : index
    %371 = vector.load %arg9[%370, %c0_214, %c0_215] : memref<8x32x128xf32, #tpu.memory_space<vmem>>, vector<1x32x128xf32>
    %372 = vector.shape_cast %371 : vector<1x32x128xf32> to vector<32x128xf32>
    %cst_216 = arith.constant dense<0.000000e+00> : vector<32x128xf32>
    %373 = tpu.matmul %357, %372, %cst_216 {dimension_numbers = #tpu.dot_dimension_numbers<[1], [0], [0], [1], [0, 0, 1, 1], [], []>} : vector<32x32xf32>, vector<32x128xf32>, vector<32x128xf32> -> vector<32x128xf32>
    %374 = vector.broadcast %359 : vector<32x1xf32> to vector<32x128xf32>
    %375 = arith.addf %373, %374 : vector<32x128xf32>
    %376 = arith.index_cast %c1_i32_213 : i32 to index
    %c0_217 = arith.constant 0 : index
    %c0_218 = arith.constant 0 : index
    %377 = vector.load %arg9[%376, %c0_217, %c0_218] : memref<8x32x128xf32, #tpu.memory_space<vmem>>, vector<1x32x128xf32>
    %378 = vector.shape_cast %377 : vector<1x32x128xf32> to vector<32x128xf32>
    %379 = vector.shape_cast %375 : vector<32x128xf32> to vector<1x32x128xf32>
    tpu.vector_store %arg9[%376, %c0_217, %c0_218], %379 {strides = array<i32>} : memref<8x32x128xf32, #tpu.memory_space<vmem>>, vector<1x32x128xf32>,
    %c2_i32_219 = arith.constant 2 : i32
    %380 = arith.index_cast %c2_i32_219 : i32 to index
    %c0_220 = arith.constant 0 : index
    %c0_221 = arith.constant 0 : index
    %381 = vector.load %arg9[%380, %c0_220, %c0_221] : memref<8x32x128xf32, #tpu.memory_space<vmem>>, vector<1x32x128xf32>
    %382 = vector.shape_cast %381 : vector<1x32x128xf32> to vector<32x128xf32>
    %cst_222 = arith.constant dense<0.000000e+00> : vector<32x128xf32>
    %383 = tpu.matmul %357, %382, %cst_222 {dimension_numbers = #tpu.dot_dimension_numbers<[1], [0], [0], [1], [0, 0, 1, 1], [], []>} : vector<32x32xf32>, vector<32x128xf32>, vector<32x128xf32> -> vector<32x128xf32>
    %384 = vector.broadcast %359 : vector<32x1xf32> to vector<32x128xf32>
    %385 = arith.addf %383, %384 : vector<32x128xf32>
    %386 = arith.index_cast %c2_i32_219 : i32 to index
    %c0_223 = arith.constant 0 : index
    %c0_224 = arith.constant 0 : index
    %387 = vector.load %arg9[%386, %c0_223, %c0_224] : memref<8x32x128xf32, #tpu.memory_space<vmem>>, vector<1x32x128xf32>
    %388 = vector.shape_cast %387 : vector<1x32x128xf32> to vector<32x128xf32>
    %389 = vector.shape_cast %385 : vector<32x128xf32> to vector<1x32x128xf32>
    tpu.vector_store %arg9[%386, %c0_223, %c0_224], %389 {strides = array<i32>} : memref<8x32x128xf32, #tpu.memory_space<vmem>>, vector<1x32x128xf32>,
    %c3_i32_225 = arith.constant 3 : i32
    %390 = arith.index_cast %c3_i32_225 : i32 to index
    %c0_226 = arith.constant 0 : index
    %c0_227 = arith.constant 0 : index
    %391 = vector.load %arg9[%390, %c0_226, %c0_227] : memref<8x32x128xf32, #tpu.memory_space<vmem>>, vector<1x32x128xf32>
    %392 = vector.shape_cast %391 : vector<1x32x128xf32> to vector<32x128xf32>
    %cst_228 = arith.constant dense<0.000000e+00> : vector<32x128xf32>
    %393 = tpu.matmul %357, %392, %cst_228 {dimension_numbers = #tpu.dot_dimension_numbers<[1], [0], [0], [1], [0, 0, 1, 1], [], []>} : vector<32x32xf32>, vector<32x128xf32>, vector<32x128xf32> -> vector<32x128xf32>
    %394 = vector.broadcast %359 : vector<32x1xf32> to vector<32x128xf32>
    %395 = arith.addf %393, %394 : vector<32x128xf32>
    %396 = arith.index_cast %c3_i32_225 : i32 to index
    %c0_229 = arith.constant 0 : index
    %c0_230 = arith.constant 0 : index
    %397 = vector.load %arg9[%396, %c0_229, %c0_230] : memref<8x32x128xf32, #tpu.memory_space<vmem>>, vector<1x32x128xf32>
    %398 = vector.shape_cast %397 : vector<1x32x128xf32> to vector<32x128xf32>
    %399 = vector.shape_cast %395 : vector<32x128xf32> to vector<1x32x128xf32>
    tpu.vector_store %arg9[%396, %c0_229, %c0_230], %399 {strides = array<i32>} : memref<8x32x128xf32, #tpu.memory_space<vmem>>, vector<1x32x128xf32>,
    %c4_i32_231 = arith.constant 4 : i32
    %400 = arith.index_cast %c4_i32_231 : i32 to index
    %c0_232 = arith.constant 0 : index
    %c0_233 = arith.constant 0 : index
    %401 = vector.load %arg9[%400, %c0_232, %c0_233] : memref<8x32x128xf32, #tpu.memory_space<vmem>>, vector<1x32x128xf32>
    %402 = vector.shape_cast %401 : vector<1x32x128xf32> to vector<32x128xf32>
    %cst_234 = arith.constant dense<0.000000e+00> : vector<32x128xf32>
    %403 = tpu.matmul %357, %402, %cst_234 {dimension_numbers = #tpu.dot_dimension_numbers<[1], [0], [0], [1], [0, 0, 1, 1], [], []>} : vector<32x32xf32>, vector<32x128xf32>, vector<32x128xf32> -> vector<32x128xf32>
    %404 = vector.broadcast %359 : vector<32x1xf32> to vector<32x128xf32>
    %405 = arith.addf %403, %404 : vector<32x128xf32>
    %406 = arith.index_cast %c4_i32_231 : i32 to index
    %c0_235 = arith.constant 0 : index
    %c0_236 = arith.constant 0 : index
    %407 = vector.load %arg9[%406, %c0_235, %c0_236] : memref<8x32x128xf32, #tpu.memory_space<vmem>>, vector<1x32x128xf32>
    %408 = vector.shape_cast %407 : vector<1x32x128xf32> to vector<32x128xf32>
    %409 = vector.shape_cast %405 : vector<32x128xf32> to vector<1x32x128xf32>
    tpu.vector_store %arg9[%406, %c0_235, %c0_236], %409 {strides = array<i32>} : memref<8x32x128xf32, #tpu.memory_space<vmem>>, vector<1x32x128xf32>,
    %c5_i32_237 = arith.constant 5 : i32
    %410 = arith.index_cast %c5_i32_237 : i32 to index
    %c0_238 = arith.constant 0 : index
    %c0_239 = arith.constant 0 : index
    %411 = vector.load %arg9[%410, %c0_238, %c0_239] : memref<8x32x128xf32, #tpu.memory_space<vmem>>, vector<1x32x128xf32>
    %412 = vector.shape_cast %411 : vector<1x32x128xf32> to vector<32x128xf32>
    %cst_240 = arith.constant dense<0.000000e+00> : vector<32x128xf32>
    %413 = tpu.matmul %357, %412, %cst_240 {dimension_numbers = #tpu.dot_dimension_numbers<[1], [0], [0], [1], [0, 0, 1, 1], [], []>} : vector<32x32xf32>, vector<32x128xf32>, vector<32x128xf32> -> vector<32x128xf32>
    %414 = vector.broadcast %359 : vector<32x1xf32> to vector<32x128xf32>
    %415 = arith.addf %413, %414 : vector<32x128xf32>
    %416 = arith.index_cast %c5_i32_237 : i32 to index
    %c0_241 = arith.constant 0 : index
    %c0_242 = arith.constant 0 : index
    %417 = vector.load %arg9[%416, %c0_241, %c0_242] : memref<8x32x128xf32, #tpu.memory_space<vmem>>, vector<1x32x128xf32>
    %418 = vector.shape_cast %417 : vector<1x32x128xf32> to vector<32x128xf32>
    %419 = vector.shape_cast %415 : vector<32x128xf32> to vector<1x32x128xf32>
    tpu.vector_store %arg9[%416, %c0_241, %c0_242], %419 {strides = array<i32>} : memref<8x32x128xf32, #tpu.memory_space<vmem>>, vector<1x32x128xf32>,
    %c6_i32_243 = arith.constant 6 : i32
    %420 = arith.index_cast %c6_i32_243 : i32 to index
    %c0_244 = arith.constant 0 : index
    %c0_245 = arith.constant 0 : index
    %421 = vector.load %arg9[%420, %c0_244, %c0_245] : memref<8x32x128xf32, #tpu.memory_space<vmem>>, vector<1x32x128xf32>
    %422 = vector.shape_cast %421 : vector<1x32x128xf32> to vector<32x128xf32>
    %cst_246 = arith.constant dense<0.000000e+00> : vector<32x128xf32>
    %423 = tpu.matmul %357, %422, %cst_246 {dimension_numbers = #tpu.dot_dimension_numbers<[1], [0], [0], [1], [0, 0, 1, 1], [], []>} : vector<32x32xf32>, vector<32x128xf32>, vector<32x128xf32> -> vector<32x128xf32>
    %424 = vector.broadcast %359 : vector<32x1xf32> to vector<32x128xf32>
    %425 = arith.addf %423, %424 : vector<32x128xf32>
    %426 = arith.index_cast %c6_i32_243 : i32 to index
    %c0_247 = arith.constant 0 : index
    %c0_248 = arith.constant 0 : index
    %427 = vector.load %arg9[%426, %c0_247, %c0_248] : memref<8x32x128xf32, #tpu.memory_space<vmem>>, vector<1x32x128xf32>
    %428 = vector.shape_cast %427 : vector<1x32x128xf32> to vector<32x128xf32>
    %429 = vector.shape_cast %425 : vector<32x128xf32> to vector<1x32x128xf32>
    tpu.vector_store %arg9[%426, %c0_247, %c0_248], %429 {strides = array<i32>} : memref<8x32x128xf32, #tpu.memory_space<vmem>>, vector<1x32x128xf32>,
    %c7_i32_249 = arith.constant 7 : i32
    %430 = arith.index_cast %c7_i32_249 : i32 to index
    %c0_250 = arith.constant 0 : index
    %c0_251 = arith.constant 0 : index
    %431 = vector.load %arg9[%430, %c0_250, %c0_251] : memref<8x32x128xf32, #tpu.memory_space<vmem>>, vector<1x32x128xf32>
    %432 = vector.shape_cast %431 : vector<1x32x128xf32> to vector<32x128xf32>
    %cst_252 = arith.constant dense<0.000000e+00> : vector<32x128xf32>
    %433 = tpu.matmul %357, %432, %cst_252 {dimension_numbers = #tpu.dot_dimension_numbers<[1], [0], [0], [1], [0, 0, 1, 1], [], []>} : vector<32x32xf32>, vector<32x128xf32>, vector<32x128xf32> -> vector<32x128xf32>
    %434 = vector.broadcast %359 : vector<32x1xf32> to vector<32x128xf32>
    %435 = arith.addf %433, %434 : vector<32x128xf32>
    %436 = arith.index_cast %c7_i32_249 : i32 to index
    %c0_253 = arith.constant 0 : index
    %c0_254 = arith.constant 0 : index
    %437 = vector.load %arg9[%436, %c0_253, %c0_254] : memref<8x32x128xf32, #tpu.memory_space<vmem>>, vector<1x32x128xf32>
    %438 = vector.shape_cast %437 : vector<1x32x128xf32> to vector<32x128xf32>
    %439 = vector.shape_cast %435 : vector<32x128xf32> to vector<1x32x128xf32>
    tpu.vector_store %arg9[%436, %c0_253, %c0_254], %439 {strides = array<i32>} : memref<8x32x128xf32, #tpu.memory_space<vmem>>, vector<1x32x128xf32>,
    %c8_i32_255 = arith.constant 8 : i32
    %c2_256 = arith.constant 2 : index
    %c0_257 = arith.constant 0 : index
    %c0_258 = arith.constant 0 : index
    %440 = vector.load %arg4[%c2_256, %c0_257, %c0_258] : memref<3x32x32xf32, #tpu.memory_space<vmem>>, vector<1x32x32xf32>
    %441 = vector.shape_cast %440 : vector<1x32x32xf32> to vector<32x32xf32>
    %c0_i32_259 = arith.constant 0 : i32
    %442 = arith.index_cast %c0_i32_259 : i32 to index
    %c0_260 = arith.constant 0 : index
    %c0_261 = arith.constant 0 : index
    %443 = vector.load %arg9[%442, %c0_260, %c0_261] : memref<8x32x128xf32, #tpu.memory_space<vmem>>, vector<1x32x128xf32>
    %444 = vector.shape_cast %443 : vector<1x32x128xf32> to vector<32x128xf32>
    %cst_262 = arith.constant dense<0.000000e+00> : vector<32x128xf32>
    %445 = tpu.matmul %441, %91, %cst_262 {dimension_numbers = #tpu.dot_dimension_numbers<[1], [0], [0], [1], [0, 0, 1, 1], [], []>} : vector<32x32xf32>, vector<32x128xf32>, vector<32x128xf32> -> vector<32x128xf32>
    %446 = arith.addf %444, %445 : vector<32x128xf32>
    %cst_263 = arith.constant 0.000000e+00 : f32
    %447 = vector.broadcast %cst_263 : f32 to vector<32x128xf32>
    %448 = arith.maximumf %446, %447 : vector<32x128xf32>
    %449 = arith.index_cast %c0_i32_259 : i32 to index
    %c0_264 = arith.constant 0 : index
    %c0_265 = arith.constant 0 : index
    %450 = vector.load %arg9[%449, %c0_264, %c0_265] : memref<8x32x128xf32, #tpu.memory_space<vmem>>, vector<1x32x128xf32>
    %451 = vector.shape_cast %450 : vector<1x32x128xf32> to vector<32x128xf32>
    %452 = vector.shape_cast %448 : vector<32x128xf32> to vector<1x32x128xf32>
    tpu.vector_store %arg9[%449, %c0_264, %c0_265], %452 {strides = array<i32>} : memref<8x32x128xf32, #tpu.memory_space<vmem>>, vector<1x32x128xf32>,
    %c1_i32_266 = arith.constant 1 : i32
    %453 = arith.index_cast %c1_i32_266 : i32 to index
    %c0_267 = arith.constant 0 : index
    %c0_268 = arith.constant 0 : index
    %454 = vector.load %arg9[%453, %c0_267, %c0_268] : memref<8x32x128xf32, #tpu.memory_space<vmem>>, vector<1x32x128xf32>
    %455 = vector.shape_cast %454 : vector<1x32x128xf32> to vector<32x128xf32>
    %cst_269 = arith.constant dense<0.000000e+00> : vector<32x128xf32>
    %456 = tpu.matmul %441, %448, %cst_269 {dimension_numbers = #tpu.dot_dimension_numbers<[1], [0], [0], [1], [0, 0, 1, 1], [], []>} : vector<32x32xf32>, vector<32x128xf32>, vector<32x128xf32> -> vector<32x128xf32>
    %457 = arith.addf %455, %456 : vector<32x128xf32>
    %cst_270 = arith.constant 0.000000e+00 : f32
    %458 = vector.broadcast %cst_270 : f32 to vector<32x128xf32>
    %459 = arith.maximumf %457, %458 : vector<32x128xf32>
    %460 = arith.index_cast %c1_i32_266 : i32 to index
    %c0_271 = arith.constant 0 : index
    %c0_272 = arith.constant 0 : index
    %461 = vector.load %arg9[%460, %c0_271, %c0_272] : memref<8x32x128xf32, #tpu.memory_space<vmem>>, vector<1x32x128xf32>
    %462 = vector.shape_cast %461 : vector<1x32x128xf32> to vector<32x128xf32>
    %463 = vector.shape_cast %459 : vector<32x128xf32> to vector<1x32x128xf32>
    tpu.vector_store %arg9[%460, %c0_271, %c0_272], %463 {strides = array<i32>} : memref<8x32x128xf32, #tpu.memory_space<vmem>>, vector<1x32x128xf32>,
    %c2_i32_273 = arith.constant 2 : i32
    %464 = arith.index_cast %c2_i32_273 : i32 to index
    %c0_274 = arith.constant 0 : index
    %c0_275 = arith.constant 0 : index
    %465 = vector.load %arg9[%464, %c0_274, %c0_275] : memref<8x32x128xf32, #tpu.memory_space<vmem>>, vector<1x32x128xf32>
    %466 = vector.shape_cast %465 : vector<1x32x128xf32> to vector<32x128xf32>
    %cst_276 = arith.constant dense<0.000000e+00> : vector<32x128xf32>
    %467 = tpu.matmul %441, %459, %cst_276 {dimension_numbers = #tpu.dot_dimension_numbers<[1], [0], [0], [1], [0, 0, 1, 1], [], []>} : vector<32x32xf32>, vector<32x128xf32>, vector<32x128xf32> -> vector<32x128xf32>
    %468 = arith.addf %466, %467 : vector<32x128xf32>
    %cst_277 = arith.constant 0.000000e+00 : f32
    %469 = vector.broadcast %cst_277 : f32 to vector<32x128xf32>
    %470 = arith.maximumf %468, %469 : vector<32x128xf32>
    %471 = arith.index_cast %c2_i32_273 : i32 to index
    %c0_278 = arith.constant 0 : index
    %c0_279 = arith.constant 0 : index
    %472 = vector.load %arg9[%471, %c0_278, %c0_279] : memref<8x32x128xf32, #tpu.memory_space<vmem>>, vector<1x32x128xf32>
    %473 = vector.shape_cast %472 : vector<1x32x128xf32> to vector<32x128xf32>
    %474 = vector.shape_cast %470 : vector<32x128xf32> to vector<1x32x128xf32>
    tpu.vector_store %arg9[%471, %c0_278, %c0_279], %474 {strides = array<i32>} : memref<8x32x128xf32, #tpu.memory_space<vmem>>, vector<1x32x128xf32>,
    %c3_i32_280 = arith.constant 3 : i32
    %475 = arith.index_cast %c3_i32_280 : i32 to index
    %c0_281 = arith.constant 0 : index
    %c0_282 = arith.constant 0 : index
    %476 = vector.load %arg9[%475, %c0_281, %c0_282] : memref<8x32x128xf32, #tpu.memory_space<vmem>>, vector<1x32x128xf32>
    %477 = vector.shape_cast %476 : vector<1x32x128xf32> to vector<32x128xf32>
    %cst_283 = arith.constant dense<0.000000e+00> : vector<32x128xf32>
    %478 = tpu.matmul %441, %470, %cst_283 {dimension_numbers = #tpu.dot_dimension_numbers<[1], [0], [0], [1], [0, 0, 1, 1], [], []>} : vector<32x32xf32>, vector<32x128xf32>, vector<32x128xf32> -> vector<32x128xf32>
    %479 = arith.addf %477, %478 : vector<32x128xf32>
    %cst_284 = arith.constant 0.000000e+00 : f32
    %480 = vector.broadcast %cst_284 : f32 to vector<32x128xf32>
    %481 = arith.maximumf %479, %480 : vector<32x128xf32>
    %482 = arith.index_cast %c3_i32_280 : i32 to index
    %c0_285 = arith.constant 0 : index
    %c0_286 = arith.constant 0 : index
    %483 = vector.load %arg9[%482, %c0_285, %c0_286] : memref<8x32x128xf32, #tpu.memory_space<vmem>>, vector<1x32x128xf32>
    %484 = vector.shape_cast %483 : vector<1x32x128xf32> to vector<32x128xf32>
    %485 = vector.shape_cast %481 : vector<32x128xf32> to vector<1x32x128xf32>
    tpu.vector_store %arg9[%482, %c0_285, %c0_286], %485 {strides = array<i32>} : memref<8x32x128xf32, #tpu.memory_space<vmem>>, vector<1x32x128xf32>,
    %c4_i32_287 = arith.constant 4 : i32
    %486 = arith.index_cast %c4_i32_287 : i32 to index
    %c0_288 = arith.constant 0 : index
    %c0_289 = arith.constant 0 : index
    %487 = vector.load %arg9[%486, %c0_288, %c0_289] : memref<8x32x128xf32, #tpu.memory_space<vmem>>, vector<1x32x128xf32>
    %488 = vector.shape_cast %487 : vector<1x32x128xf32> to vector<32x128xf32>
    %cst_290 = arith.constant dense<0.000000e+00> : vector<32x128xf32>
    %489 = tpu.matmul %441, %481, %cst_290 {dimension_numbers = #tpu.dot_dimension_numbers<[1], [0], [0], [1], [0, 0, 1, 1], [], []>} : vector<32x32xf32>, vector<32x128xf32>, vector<32x128xf32> -> vector<32x128xf32>
    %490 = arith.addf %488, %489 : vector<32x128xf32>
    %cst_291 = arith.constant 0.000000e+00 : f32
    %491 = vector.broadcast %cst_291 : f32 to vector<32x128xf32>
    %492 = arith.maximumf %490, %491 : vector<32x128xf32>
    %493 = arith.index_cast %c4_i32_287 : i32 to index
    %c0_292 = arith.constant 0 : index
    %c0_293 = arith.constant 0 : index
    %494 = vector.load %arg9[%493, %c0_292, %c0_293] : memref<8x32x128xf32, #tpu.memory_space<vmem>>, vector<1x32x128xf32>
    %495 = vector.shape_cast %494 : vector<1x32x128xf32> to vector<32x128xf32>
    %496 = vector.shape_cast %492 : vector<32x128xf32> to vector<1x32x128xf32>
    tpu.vector_store %arg9[%493, %c0_292, %c0_293], %496 {strides = array<i32>} : memref<8x32x128xf32, #tpu.memory_space<vmem>>, vector<1x32x128xf32>,
    %c5_i32_294 = arith.constant 5 : i32
    %497 = arith.index_cast %c5_i32_294 : i32 to index
    %c0_295 = arith.constant 0 : index
    %c0_296 = arith.constant 0 : index
    %498 = vector.load %arg9[%497, %c0_295, %c0_296] : memref<8x32x128xf32, #tpu.memory_space<vmem>>, vector<1x32x128xf32>
    %499 = vector.shape_cast %498 : vector<1x32x128xf32> to vector<32x128xf32>
    %cst_297 = arith.constant dense<0.000000e+00> : vector<32x128xf32>
    %500 = tpu.matmul %441, %492, %cst_297 {dimension_numbers = #tpu.dot_dimension_numbers<[1], [0], [0], [1], [0, 0, 1, 1], [], []>} : vector<32x32xf32>, vector<32x128xf32>, vector<32x128xf32> -> vector<32x128xf32>
    %501 = arith.addf %499, %500 : vector<32x128xf32>
    %cst_298 = arith.constant 0.000000e+00 : f32
    %502 = vector.broadcast %cst_298 : f32 to vector<32x128xf32>
    %503 = arith.maximumf %501, %502 : vector<32x128xf32>
    %504 = arith.index_cast %c5_i32_294 : i32 to index
    %c0_299 = arith.constant 0 : index
    %c0_300 = arith.constant 0 : index
    %505 = vector.load %arg9[%504, %c0_299, %c0_300] : memref<8x32x128xf32, #tpu.memory_space<vmem>>, vector<1x32x128xf32>
    %506 = vector.shape_cast %505 : vector<1x32x128xf32> to vector<32x128xf32>
    %507 = vector.shape_cast %503 : vector<32x128xf32> to vector<1x32x128xf32>
    tpu.vector_store %arg9[%504, %c0_299, %c0_300], %507 {strides = array<i32>} : memref<8x32x128xf32, #tpu.memory_space<vmem>>, vector<1x32x128xf32>,
    %c6_i32_301 = arith.constant 6 : i32
    %508 = arith.index_cast %c6_i32_301 : i32 to index
    %c0_302 = arith.constant 0 : index
    %c0_303 = arith.constant 0 : index
    %509 = vector.load %arg9[%508, %c0_302, %c0_303] : memref<8x32x128xf32, #tpu.memory_space<vmem>>, vector<1x32x128xf32>
    %510 = vector.shape_cast %509 : vector<1x32x128xf32> to vector<32x128xf32>
    %cst_304 = arith.constant dense<0.000000e+00> : vector<32x128xf32>
    %511 = tpu.matmul %441, %503, %cst_304 {dimension_numbers = #tpu.dot_dimension_numbers<[1], [0], [0], [1], [0, 0, 1, 1], [], []>} : vector<32x32xf32>, vector<32x128xf32>, vector<32x128xf32> -> vector<32x128xf32>
    %512 = arith.addf %510, %511 : vector<32x128xf32>
    %cst_305 = arith.constant 0.000000e+00 : f32
    %513 = vector.broadcast %cst_305 : f32 to vector<32x128xf32>
    %514 = arith.maximumf %512, %513 : vector<32x128xf32>
    %515 = arith.index_cast %c6_i32_301 : i32 to index
    %c0_306 = arith.constant 0 : index
    %c0_307 = arith.constant 0 : index
    %516 = vector.load %arg9[%515, %c0_306, %c0_307] : memref<8x32x128xf32, #tpu.memory_space<vmem>>, vector<1x32x128xf32>
    %517 = vector.shape_cast %516 : vector<1x32x128xf32> to vector<32x128xf32>
    %518 = vector.shape_cast %514 : vector<32x128xf32> to vector<1x32x128xf32>
    tpu.vector_store %arg9[%515, %c0_306, %c0_307], %518 {strides = array<i32>} : memref<8x32x128xf32, #tpu.memory_space<vmem>>, vector<1x32x128xf32>,
    %c7_i32_308 = arith.constant 7 : i32
    %519 = arith.index_cast %c7_i32_308 : i32 to index
    %c0_309 = arith.constant 0 : index
    %c0_310 = arith.constant 0 : index
    %520 = vector.load %arg9[%519, %c0_309, %c0_310] : memref<8x32x128xf32, #tpu.memory_space<vmem>>, vector<1x32x128xf32>
    %521 = vector.shape_cast %520 : vector<1x32x128xf32> to vector<32x128xf32>
    %cst_311 = arith.constant dense<0.000000e+00> : vector<32x128xf32>
    %522 = tpu.matmul %441, %514, %cst_311 {dimension_numbers = #tpu.dot_dimension_numbers<[1], [0], [0], [1], [0, 0, 1, 1], [], []>} : vector<32x32xf32>, vector<32x128xf32>, vector<32x128xf32> -> vector<32x128xf32>
    %523 = arith.addf %521, %522 : vector<32x128xf32>
    %cst_312 = arith.constant 0.000000e+00 : f32
    %524 = vector.broadcast %cst_312 : f32 to vector<32x128xf32>
    %525 = arith.maximumf %523, %524 : vector<32x128xf32>
    %526 = arith.index_cast %c7_i32_308 : i32 to index
    %c0_313 = arith.constant 0 : index
    %c0_314 = arith.constant 0 : index
    %527 = vector.load %arg9[%526, %c0_313, %c0_314] : memref<8x32x128xf32, #tpu.memory_space<vmem>>, vector<1x32x128xf32>
    %528 = vector.shape_cast %527 : vector<1x32x128xf32> to vector<32x128xf32>
    %529 = vector.shape_cast %525 : vector<32x128xf32> to vector<1x32x128xf32>
    tpu.vector_store %arg9[%526, %c0_313, %c0_314], %529 {strides = array<i32>} : memref<8x32x128xf32, #tpu.memory_space<vmem>>, vector<1x32x128xf32>,
    %c8_i32_315 = arith.constant 8 : i32
    %c0_316 = arith.constant 0 : index
    %c0_317 = arith.constant 0 : index
    %530 = vector.load %arg6[%c0_316, %c0_317] : memref<32x1xf32, #tpu.memory_space<vmem>>, vector<32x1xf32>
    %c0_318 = arith.constant 0 : index
    %c0_319 = arith.constant 0 : index
    %531 = vector.load %arg7[%c0_318, %c0_319] : memref<1x1xf32, #tpu.memory_space<vmem>>, vector<1x1xf32>
    %c0_i32_320 = arith.constant 0 : i32
    %c8_i32_321 = arith.constant 8 : i32
    %532 = arith.muli %c0_i32_320, %c8_i32_321 : i32
    %533 = tpu.assume_multiple %532, 8 : i32
    %534 = arith.index_cast %533 : i32 to index
    %c0_322 = arith.constant 0 : index
    %c0_323 = arith.constant 0 : index
    %535 = vector.load %arg9[%534, %c0_322, %c0_323] : memref<8x32x128xf32, #tpu.memory_space<vmem>>, vector<8x32x128xf32>
    %536 = vector.shape_cast %530 : vector<32x1xf32> to vector<1x32x1xf32>
    %537 = vector.broadcast %536 : vector<1x32x1xf32> to vector<8x32x128xf32>
    %538 = arith.mulf %535, %537 : vector<8x32x128xf32>
    %cst_324 = arith.constant dense<0.000000e+00> : vector<8x128xf32>
    %539 = vector.multi_reduction <add>, %538, %cst_324 [1] : vector<8x32x128xf32> to vector<8x128xf32>
    %540 = vector.broadcast %531 : vector<1x1xf32> to vector<8x128xf32>
    %541 = arith.addf %539, %540 : vector<8x128xf32>
    %542 = arith.index_cast %533 : i32 to index
    %c0_325 = arith.constant 0 : index
    %543 = vector.load %arg8[%542, %c0_325] : memref<8x128xf32, #tpu.memory_space<vmem>>, vector<8x128xf32>
    tpu.vector_store %arg8[%542, %c0_325], %541 {strides = array<i32>} : memref<8x128xf32, #tpu.memory_space<vmem>>, vector<8x128xf32>,
    %c1_i32_326 = arith.constant 1 : i32
    return
  }
  func.func @transform_0(%arg0: i32) -> (i32, i32) {
    %c0_i32 = arith.constant 0 : i32
    %c0_i32_0 = arith.constant 0 : i32
    return %c0_i32, %arg0 : i32, i32
  }
  func.func @transform_1(%arg0: i32) -> (i32, i32) {
    %c0_i32 = arith.constant 0 : i32
    %c0_i32_0 = arith.constant 0 : i32
    %c0_i32_1 = arith.constant 0 : i32
    return %c0_i32, %c0_i32_0 : i32, i32
  }
  func.func @transform_2(%arg0: i32) -> (i32, i32, i32) {
    %c0_i32 = arith.constant 0 : i32
    %c0_i32_0 = arith.constant 0 : i32
    %c0_i32_1 = arith.constant 0 : i32
    %c0_i32_2 = arith.constant 0 : i32
    return %c0_i32, %c0_i32_0, %c0_i32_1 : i32, i32, i32
  }
  func.func @transform_3(%arg0: i32) -> (i32, i32, i32) {
    %c0_i32 = arith.constant 0 : i32
    %c0_i32_0 = arith.constant 0 : i32
    %c0_i32_1 = arith.constant 0 : i32
    %c0_i32_2 = arith.constant 0 : i32
    return %c0_i32, %c0_i32_0, %c0_i32_1 : i32, i32, i32
  }
  func.func @transform_4(%arg0: i32) -> (i32, i32, i32) {
    %c0_i32 = arith.constant 0 : i32
    %c0_i32_0 = arith.constant 0 : i32
    %c0_i32_1 = arith.constant 0 : i32
    %c0_i32_2 = arith.constant 0 : i32
    return %c0_i32, %c0_i32_0, %c0_i32_1 : i32, i32, i32
  }
  func.func @transform_5(%arg0: i32) -> (i32, i32) {
    %c0_i32 = arith.constant 0 : i32
    %c0_i32_0 = arith.constant 0 : i32
    %c0_i32_1 = arith.constant 0 : i32
    return %c0_i32, %c0_i32_0 : i32, i32
  }
  func.func @transform_6(%arg0: i32) -> (i32, i32) {
    %c0_i32 = arith.constant 0 : i32
    %c0_i32_0 = arith.constant 0 : i32
    %c0_i32_1 = arith.constant 0 : i32
    return %c0_i32, %c0_i32_0 : i32, i32
  }
  func.func @transform_7(%arg0: i32) -> (i32, i32) {
    %c0_i32 = arith.constant 0 : i32
    %c0_i32_0 = arith.constant 0 : i32
    return %c0_i32, %arg0 : i32, i32
  }
}

</mosaic_0001>

<bundles_post_ra>
// kernel: tpu_custom_call.1
= control target key start
LH: loop header
LB: loop body
LE: loop exit
PB: predicated region body
PF: predicated region fallthrough
CT: control target
= control target key end

     0   :  { %s6905_s0 = inlined_call_operand.vmem [shape: f32[8,128], index: 0, kind: input, shape index: {}]   ;;  %s6906_s1 = inlined_call_operand.vmem [shape: f32[32,1], index: 1, kind: input, shape index: {}]   ;;  %s6907_s2 = inlined_call_operand.vmem [shape: f32[2,32,32], index: 2, kind: input, shape index: {}]   ;;  %s6908_s3 = inlined_call_operand.vmem [shape: f32[3,32,32], index: 3, kind: input, shape index: {}]   ;;  %s6909_s4 = inlined_call_operand.vmem [shape: f32[3,32,1], index: 4, kind: input, shape index: {}]   ;;  %s6910_s5 = inlined_call_operand.vmem [shape: f32[32,1], index: 5, kind: input, shape index: {}]   ;;  %s6911_s6 = inlined_call_operand.<no memory space> [shape: f32[1,1], index: 6, kind: input, shape index: {}]   ;;  %s6912_s7 = inlined_call_operand.hbm [shape: f32[8,128], index: 7, kind: output, shape index: {}]  }
   0x1   :  { %v12_v0 = vstv %s6911_s6 }
   0x2   :  { %13 = vst [vmem:[#allocation3] sm:$0x1] %v12_v0 }
   0x3   :  { %v6032_v1 = vld [vmem:[%s6908_s3] sm:$0xff]  ;;  %vm228_vm0 = vcmask 261120   ;;  %v6037_v2 = vld [vmem:[%s6908_s3 + $0x8] sm:$0xff]  ;;  %v5983_v3 = vmov 0.0   ;;  %v6045_v4 = vld [vmem:[%s6908_s3 + $0x10] sm:$0xff]  ;;  %v5984_v6 = vmov 0  }
   0x4   :  { %4984 = vmatprep.subr.mxu0 %v5983_v3  ;;  %4986 = vmatprep.mubr.msk.f32.mxu0 %vm228_vm0, %v6032_v1  ;;  %v29_v5 = vld [vmem:[%s6906_s1] sm:$0xff]  ;;  %v6061_v8 = vld [vmem:[%s6908_s3 + $0x18] sm:$0xff]  ;;  %v30_v9 = vld [vmem:[%s6906_s1 + $0x8] sm:$0xff] }
   0x5   :  { %4985 = vmatpush3.msra.mxu0 %v5983_v3  ;;  %5957 = vset.pattern.permute.xlu0 %v5984_v6  ;;  %v33_v7 = vld [vmem:[%s6909_s4] sm:$0xff]  ;;  %v34_v10 = vld [vmem:[%s6909_s4 + $0x8] sm:$0xff]  ;;  %v31_v11 = vld [vmem:[%s6906_s1 + $0x10] sm:$0xff] }
   0x6   :  { %4987 = vmatmul.mubr.msk.f32.vlgmr.msra.gmra.mrb[0].mxu0 %vm228_vm0, %v6037_v2  ;;  %44 = vperm.xlu0 %5957, %v29_v5  }
   0x7   :  { %4989 = vmatprep.mubr.msk.f32.mxu0 %vm228_vm0, %v6045_v4  ;;  %5958 = vset.pattern.permute.xlu1 %v5984_v6 }
   0x8   :  { %68 = vperm.xlu1 %5958, %v33_v7   ;;  %5000 = vmatprep.mubr.msk.f32.mxu1 %vm228_vm0, %v6032_v1 }
   0xa   :  { %4990 = vmatmul.mubr.msk.f32.gmra.mrb[2].mxu0 %vm228_vm0, %v6061_v8  ;;  %49 = vperm.xlu0 %5957, %v30_v9  }
   0xb   :  { %5014 = vmatprep.mubr.msk.f32.mxu0 %vm228_vm0, %v6032_v1 }
   0xc   :  { %14 = vsyncpa [#allocation5], 0  ;;  %73 = vperm.xlu1 %5958, %v34_v10   ;;  %v32_v12 = vld [vmem:[%s6906_s1 + $0x18] sm:$0xff]  ;;  %v35_v13 = vld [vmem:[%s6909_s4 + $0x10] sm:$0xff]  ;;  %vm4454_vm1 = vcmask 1041409   ;;  %vm4456_vm2 = vcmask 1042434  }
   0xd   :  { %v36_v14 = vld [vmem:[%s6909_s4 + $0x18] sm:$0xff]  ;;  %v4524_v15 = vld [vmem:[%s6909_s4 + $0x20] sm:$0xff]  ;;  %v4525_v16 = vld [vmem:[%s6909_s4 + $0x28] sm:$0xff]  ;;  %vm4458_vm3 = vcmask 1043459   ;;  %vm4460_vm4 = vcmask 1044484   ;;  %vm4462_vm5 = vcmask 1045509  }
   0xe   :  { %54 = vperm.xlu0 %5957, %v31_v11   ;;  %v4526_v17 = vld [vmem:[%s6909_s4 + $0x30] sm:$0xff]  ;;  %v4527_v18 = vld [vmem:[%s6909_s4 + $0x38] sm:$0xff]  ;;  %v4600_v19 = vld [vmem:[%s6909_s4 + $0x40] sm:$0xff]  ;;  %vm4464_vm6 = vcmask 1046534   ;;  %vm4466_vm7 = vcmask 1047559  }
   0xf   :  { %v4601_v20 = vld [vmem:[%s6909_s4 + $0x48] sm:$0xff]  ;;  %v4602_v21 = vld [vmem:[%s6909_s4 + $0x50] sm:$0xff]  ;;  %v4603_v22 = vld [vmem:[%s6909_s4 + $0x58] sm:$0xff] }
  0x10   :  { %59 = vperm.xlu1 %5958, %v32_v12   ;;  %v4266_v23 = vld [vmem:[%s6910_s5] sm:$0xff]  ;;  %v4267_v24 = vld [vmem:[%s6910_s5 + $0x8] sm:$0xff]  ;;  %v4268_v25 = vld [vmem:[%s6910_s5 + $0x10] sm:$0xff] }
  0x11   :  { %v4269_v26 = vld [vmem:[%s6910_s5 + $0x18] sm:$0xff]  ;;  %v4672_v27 = vld [vmem:[#allocation3] ss:$0 sm:$0xff]  ;;  %v4485_v28 = vld [vmem:[%s6905_s0 + $0x1] ss:$0 sm:$0xff] }
  0x12   :  { %78 = vperm.xlu0 %5957, %v35_v13   ;;  %v4486_v29 = vld [vmem:[%s6905_s0 + $0x2] ss:$0 sm:$0xff]  ;;  %v4487_v30 = vld [vmem:[%s6905_s0 + $0x3] ss:$0 sm:$0xff]  ;;  %v4488_v31 = vld [vmem:[%s6905_s0 + $0x4] ss:$0 sm:$0xff] }
  0x13   :  { %v4489_v32 = vld [vmem:[%s6905_s0 + $0x5] ss:$0 sm:$0xff]  ;;  %v4490_v33 = vld [vmem:[%s6905_s0 + $0x6] ss:$0 sm:$0xff]  ;;  %v4491_v34 = vld [vmem:[%s6905_s0 + $0x7] ss:$0 sm:$0xff] }
  0x14   :  { %83 = vperm.xlu1 %5958, %v36_v14  }
  0x16   :  { %1060 = vperm.xlu0 %5957, %v4524_v15  }
  0x18   :  { %1065 = vperm.xlu1 %5958, %v4525_v16  }
  0x1a   :  { %1070 = vperm.xlu0 %5957, %v4526_v17  }
  0x1c   :  { %1075 = vperm.xlu1 %5958, %v4527_v18  }
  0x1e   :  { %2671 = vperm.xlu0 %5957, %v4600_v19  }
  0x20   :  { %2676 = vperm.xlu1 %5958, %v4601_v20  }
  0x22   :  { %2681 = vperm.xlu0 %5957, %v4602_v21  }
  0x24   :  { %2686 = vperm.xlu1 %5958, %v4603_v22  }
  0x26   :  { %4307 = vperm.xlu0 %5957, %v4266_v23  }
  0x28   :  { %4312 = vperm.xlu1 %5958, %v4267_v24  }
  0x2a   :  { %4317 = vperm.xlu0 %5957, %v4268_v25  }
  0x2c   :  { %4322 = vperm.xlu1 %5958, %v4269_v26  }
  0x2e   :  { %4435 = vperm.xlu0 %5957, %v4672_v27  }
  0x85   :  { %v6144_v35 = vpop.permute.xlu0 %44 }
  0x86   :  { %v99_v36 = vmul.f32 %v4485_v28, %v6144_v35  ;;  %v117_v37 = vmul.f32 %v4486_v29, %v6144_v35  ;;  %v135_v38 = vmul.f32 %v4487_v30, %v6144_v35  ;;  %v153_v40 = vmul.f32 %v4488_v31, %v6144_v35 }
  0x87   :  { %v6149_v39 = vpop.permute.xlu1 %68  ;;  %v171_v41 = vmul.f32 %v4489_v32, %v6144_v35  ;;  %v189_v42 = vmul.f32 %v4490_v33, %v6144_v35  ;;  %v207_v43 = vmul.f32 %v4491_v34, %v6144_v35 }
  0x88   :  { %v6156_v44 = vadd.f32 %v99_v36, %v6149_v39  ;;  %v6159_v45 = vadd.f32 %v117_v37, %v6149_v39  ;;  %v6162_v46 = vadd.f32 %v135_v38, %v6149_v39  ;;  %v6165_v48 = vadd.f32 %v153_v40, %v6149_v39 }
  0x89   :  { %v50_v47 = vpop.permute.xlu0 %49  ;;  %v6168_v49 = vadd.f32 %v171_v41, %v6149_v39  ;;  %v6171_v50 = vadd.f32 %v189_v42, %v6149_v39  ;;  %v6174_v51 = vadd.f32 %v207_v43, %v6149_v39  ;;  %v4484_v42 = vld [vmem:[%s6905_s0] ss:$0 sm:$0xff] }
  0x8a   :  { %v100_v52 = vmul.f32 %v4485_v28, %v50_v47  ;;  %v118_v53 = vmul.f32 %v4486_v29, %v50_v47  ;;  %v136_v54 = vmul.f32 %v4487_v30, %v50_v47  ;;  %v154_v56 = vmul.f32 %v4488_v31, %v50_v47 }
  0x8b   :  { %v74_v55 = vpop.permute.xlu1 %73  ;;  %v172_v57 = vmul.f32 %v4489_v32, %v50_v47  ;;  %v190_v58 = vmul.f32 %v4490_v33, %v50_v47  ;;  %v208_v59 = vmul.f32 %v4491_v34, %v50_v47  ;;  %v63_v43 = vmul.f32 %v4484_v42, %v50_v47 }
  0x8c   :  { %v6176_v60 = vadd.f32 %v100_v52, %v74_v55  ;;  %v6178_v61 = vadd.f32 %v118_v53, %v74_v55  ;;  %v6180_v62 = vadd.f32 %v136_v54, %v74_v55  ;;  %v6182_v0 = vadd.f32 %v154_v56, %v74_v55 }
  0x8d   :  { %v55_v63 = vpop.permute.xlu0 %54  ;;  %v6184_v5 = vadd.f32 %v172_v57, %v74_v55  ;;  %v6186_v6 = vadd.f32 %v190_v58, %v74_v55  ;;  %v6188_v7 = vadd.f32 %v208_v59, %v74_v55  ;;  %v62_v52 = vmul.f32 %v4484_v42, %v6144_v35 }
  0x8e   :  { %v101_v9 = vmul.f32 %v4485_v28, %v55_v63  ;;  %v119_v10 = vmul.f32 %v4486_v29, %v55_v63  ;;  %v137_v11 = vmul.f32 %v4487_v30, %v55_v63  ;;  %v155_v13 = vmul.f32 %v4488_v31, %v55_v63 }
  0x8f   :  { %v60_v12 = vpop.permute.xlu1 %59  ;;  %v173_v14 = vmul.f32 %v4489_v32, %v55_v63  ;;  %v191_v15 = vmul.f32 %v4490_v33, %v55_v63  ;;  %v209_v16 = vmul.f32 %v4491_v34, %v55_v63  ;;  %v87_v53 = vadd.f32 %v74_v55, %v63_v43 }
  0x90   :  { %v102_v17 = vmul.f32 %v4485_v28, %v60_v12  ;;  %v120_v18 = vmul.f32 %v4486_v29, %v60_v12  ;;  %v138_v19 = vmul.f32 %v4487_v30, %v60_v12  ;;  %v156_v21 = vmul.f32 %v4488_v31, %v60_v12 }
  0x91   :  { %v79_v20 = vpop.permute.xlu0 %78  ;;  %v174_v22 = vmul.f32 %v4489_v32, %v60_v12  ;;  %v192_v23 = vmul.f32 %v4490_v33, %v60_v12  ;;  %v210_v24 = vmul.f32 %v4491_v34, %v60_v12  ;;  %v65_v54 = vmul.f32 %v4484_v42, %v60_v12 }
  0x92   :  { %v105_v25 = vadd.f32 %v101_v9, %v79_v20  ;;  %v6190_v26 = vadd.f32 %v119_v10, %v79_v20  ;;  %v6192_v27 = vadd.f32 %v137_v11, %v79_v20  ;;  %v6194_v37 = vadd.f32 %v155_v13, %v79_v20 }
  0x93   :  { %v84_v36 = vpop.permute.xlu1 %83  ;;  %v6196_v38 = vadd.f32 %v173_v14, %v79_v20  ;;  %v6198_v40 = vadd.f32 %v191_v15, %v79_v20  ;;  %v6200_v28 = vadd.f32 %v209_v16, %v79_v20  ;;  %v86_v57 = vadd.f32 %v6149_v39, %v62_v52 }
  0x94   :  { %v106_v29 = vadd.f32 %v102_v17, %v84_v36  ;;  %v6202_v30 = vadd.f32 %v120_v18, %v84_v36  ;;  %v6204_v31 = vadd.f32 %v138_v19, %v84_v36  ;;  %v6206_v32 = vadd.f32 %v156_v21, %v84_v36 }
  0x95   :  { %v6208_v33 = vadd.f32 %v174_v22, %v84_v36  ;;  %v6210_v34 = vadd.f32 %v192_v23, %v84_v36  ;;  %v6212_v41 = vadd.f32 %v210_v24, %v84_v36  ;;  %v64_v58 = vmul.f32 %v4484_v42, %v55_v63 }
  0x96   :  { %v89_v13 = vadd.f32 %v84_v36, %v65_v54 }
  0x97   :  { %v88_v16 = vadd.f32 %v79_v20, %v64_v58 }
  0xd9   :  { %v4988_v56 = vpop.f32.mrb[0].mxu0 }
  0xda   :  { %v327_v59 = vadd.f32 %v4988_v56, %v87_v53  ;;  %v307_v9 = vpop.f32.mrb[1].mxu0 }
  0xdb   :  { %v326_v10 = vadd.f32 %v307_v9, %v86_v57 }
  0xdc   :  { %v331_v11 = vmax.f32 %v327_v59, 0.0 }
  0xdd   :  { %v330_v14 = vmax.f32 %v326_v10, 0.0  ;;  %v4991_v15 = vpop.f32.mrb[2].mxu0 }
  0xde   :  { %v329_v17 = vadd.f32 %v4991_v15, %v89_v13  ;;  %v317_v18 = vpop.f32.mrb[3].mxu0 }
  0xdf   :  { %v6219_v19 = vpack.c.bf16 %v331_v11, %v330_v14  ;;  %v328_v47 = vadd.f32 %v317_v18, %v88_v16 }
  0xe0   :  { %v333_v35 = vmax.f32 %v329_v17, 0.0 }
  0xe1   :  { %v332_v55 = vmax.f32 %v328_v47, 0.0  ;;  %5527 = vmatprep.subr.bf16.mxu1 %v6219_v19 }
  0xe2   :  { %5529 = vmatpush3.bf16.msra.mxu1 %v6219_v19 }
  0xe3   :  { %v6223_v39 = vpack.c.bf16 %v333_v35, %v332_v55 }
  0xe5   :  { %5531 = vmatprep.subr.bf16.mxu1 %v6223_v39 }
  0xe6   :  { %5533 = vmatpush3.bf16.msra.mxu1 %v6223_v39 }
  0xe9   :  { %5001 = vmatmul.mubr.msk.f32.vlgmr.msra.gmra.mrb[0].mxu1 %vm228_vm0, %v6037_v2 }
  0xea   :  { %5003 = vmatprep.mubr.msk.f32.mxu1 %vm228_vm0, %v6045_v4 }
  0xed   :  { %5004 = vmatmul.mubr.msk.f32.gmra.mrb[2].mxu1 %vm228_vm0, %v6061_v8 }
  0xee   :  { %5028 = vmatprep.mubr.msk.f32.mxu1 %vm228_vm0, %v6032_v1 }
 0x1bc   :  { %v5002_v63 = vpop.f32.mrb[0].mxu1 }
 0x1bd   :  { %v428_v12 = vadd.f32 %v5002_v63, %v6176_v60  ;;  %v408_v20 = vpop.f32.mrb[1].mxu1 }
 0x1be   :  { %v427_v21 = vadd.f32 %v408_v20, %v6156_v44 }
 0x1bf   :  { %v432_v22 = vmax.f32 %v428_v12, 0.0 }
 0x1c0   :  { %v431_v23 = vmax.f32 %v427_v21, 0.0  ;;  %v5005_v24 = vpop.f32.mrb[2].mxu1 }
 0x1c1   :  { %v430_v36 = vadd.f32 %v5005_v24, %v106_v29  ;;  %v418_v42 = vpop.f32.mrb[3].mxu1 }
 0x1c2   :  { %v6237_v43 = vpack.c.bf16 %v432_v22, %v431_v23  ;;  %v429_v52 = vadd.f32 %v418_v42, %v105_v25 }
 0x1c3   :  { %v434_v53 = vmax.f32 %v430_v36, 0.0 }
 0x1c4   :  { %v433_v54 = vmax.f32 %v429_v52, 0.0  ;;  %5535 = vmatprep.subr.bf16.mxu0 %v6237_v43 }
 0x1c5   :  { %5537 = vmatpush3.bf16.msra.mxu0 %v6237_v43 }
 0x1c6   :  { %v6241_v56 = vpack.c.bf16 %v434_v53, %v433_v54 }
 0x1c8   :  { %5539 = vmatprep.subr.bf16.mxu0 %v6241_v56 }
 0x1c9   :  { %5541 = vmatpush3.bf16.msra.mxu0 %v6241_v56 }
 0x1cc   :  { %5015 = vmatmul.mubr.msk.f32.vlgmr.msra.gmra.mrb[4].mxu0 %vm228_vm0, %v6037_v2 }
 0x1cd   :  { %5017 = vmatprep.mubr.msk.f32.mxu0 %vm228_vm0, %v6045_v4 }
 0x1d0   :  { %5018 = vmatmul.mubr.msk.f32.gmra.mrb[6].mxu0 %vm228_vm0, %v6061_v8 }
 0x1d1   :  { %5042 = vmatprep.mubr.msk.f32.mxu0 %vm228_vm0, %v6032_v1 }
 0x29f   :  { %v5016_v44 = vpop.f32.mrb[4].mxu0 }
 0x2a0   :  { %v529_v60 = vadd.f32 %v5016_v44, %v6178_v61  ;;  %v509_v25 = vpop.f32.mrb[5].mxu0 }
 0x2a1   :  { %v528_v29 = vadd.f32 %v509_v25, %v6159_v45 }
 0x2a2   :  { %v533_v57 = vmax.f32 %v529_v60, 0.0 }
 0x2a3   :  { %v532_v58 = vmax.f32 %v528_v29, 0.0  ;;  %v5019_v59 = vpop.f32.mrb[6].mxu0 }
 0x2a4   :  { %v531_v9 = vadd.f32 %v5019_v59, %v6202_v30  ;;  %v519_v10 = vpop.f32.mrb[7].mxu0 }
 0x2a5   :  { %v6256_v11 = vpack.c.bf16 %v533_v57, %v532_v58  ;;  %v530_v13 = vadd.f32 %v519_v10, %v6190_v26 }
 0x2a6   :  { %v535_v14 = vmax.f32 %v531_v9, 0.0 }
 0x2a7   :  { %v534_v15 = vmax.f32 %v530_v13, 0.0  ;;  %5543 = vmatprep.subr.bf16.mxu1 %v6256_v11 }
 0x2a8   :  { %5545 = vmatpush3.bf16.msra.mxu1 %v6256_v11 }
 0x2a9   :  { %v6261_v61 = vpack.c.bf16 %v535_v14, %v534_v15 }
 0x2ab   :  { %5547 = vmatprep.subr.bf16.mxu1 %v6261_v61 }
 0x2ac   :  { %5549 = vmatpush3.bf16.msra.mxu1 %v6261_v61 }
 0x2af   :  { %5029 = vmatmul.mubr.msk.f32.vlgmr.msra.gmra.mrb[4].mxu1 %vm228_vm0, %v6037_v2 }
 0x2b0   :  { %5031 = vmatprep.mubr.msk.f32.mxu1 %vm228_vm0, %v6045_v4 }
 0x2b3   :  { %5032 = vmatmul.mubr.msk.f32.gmra.mrb[6].mxu1 %vm228_vm0, %v6061_v8 }
 0x2b4   :  { %5056 = vmatprep.mubr.msk.f32.mxu1 %vm228_vm0, %v6032_v1 }
 0x382   :  { %v5030_v45 = vpop.f32.mrb[4].mxu1 }
 0x383   :  { %v630_v26 = vadd.f32 %v5030_v45, %v6180_v62  ;;  %v610_v30 = vpop.f32.mrb[5].mxu1 }
 0x384   :  { %v629_v16 = vadd.f32 %v610_v30, %v6162_v46 }
 0x385   :  { %v634_v17 = vmax.f32 %v630_v26, 0.0 }
 0x386   :  { %v633_v18 = vmax.f32 %v629_v16, 0.0  ;;  %v5033_v47 = vpop.f32.mrb[6].mxu1 }
 0x387   :  { %v632_v35 = vadd.f32 %v5033_v47, %v6204_v31  ;;  %v620_v55 = vpop.f32.mrb[7].mxu1 }
 0x388   :  { %v6276_v63 = vpack.c.bf16 %v634_v17, %v633_v18  ;;  %v631_v12 = vadd.f32 %v620_v55, %v6192_v27 }
 0x389   :  { %v636_v20 = vmax.f32 %v632_v35, 0.0 }
 0x38a   :  { %v635_v21 = vmax.f32 %v631_v12, 0.0  ;;  %5551 = vmatprep.subr.bf16.mxu0 %v6276_v63 }
 0x38b   :  { %5553 = vmatpush3.bf16.msra.mxu0 %v6276_v63 }
 0x38c   :  { %v6281_v62 = vpack.c.bf16 %v636_v20, %v635_v21 }
 0x38e   :  { %5555 = vmatprep.subr.bf16.mxu0 %v6281_v62 }
 0x38f   :  { %5557 = vmatpush3.bf16.msra.mxu0 %v6281_v62 }
 0x392   :  { %5043 = vmatmul.mubr.msk.f32.vlgmr.msra.gmra.mrb[8].mxu0 %vm228_vm0, %v6037_v2 }
 0x393   :  { %5045 = vmatprep.mubr.msk.f32.mxu0 %vm228_vm0, %v6045_v4 }
 0x396   :  { %5046 = vmatmul.mubr.msk.f32.gmra.mrb[10].mxu0 %vm228_vm0, %v6061_v8 }
 0x397   :  { %5070 = vmatprep.mubr.msk.f32.mxu0 %vm228_vm0, %v6032_v1 }
 0x465   :  { %v5044_v46 = vpop.f32.mrb[8].mxu0 }
 0x466   :  { %v731_v27 = vadd.f32 %v5044_v46, %v6182_v0  ;;  %v711_v31 = vpop.f32.mrb[9].mxu0  ;;  %v6466_v46 = vpop.permute.xlu1 %1065 }
 0x467   :  { %v730_v22 = vadd.f32 %v711_v31, %v6165_v48 }
 0x468   :  { %v735_v23 = vmax.f32 %v731_v27, 0.0 }
 0x469   :  { %v734_v24 = vmax.f32 %v730_v22, 0.0  ;;  %v5047_v36 = vpop.f32.mrb[10].mxu0  ;;  %v6469_v22 = vpop.permute.xlu0 %1060 }
 0x46a   :  { %v733_v42 = vadd.f32 %v5047_v36, %v6206_v32  ;;  %v721_v52 = vpop.f32.mrb[11].mxu0 }
 0x46b   :  { %v5558_v53 = vpack.c.bf16 %v735_v23, %v734_v24  ;;  %v732_v54 = vadd.f32 %v721_v52, %v6194_v37 }
 0x46c   :  { %v737_v44 = vmax.f32 %v733_v42, 0.0 }
 0x46d   :  { %v736_v60 = vmax.f32 %v732_v54, 0.0  ;;  %5559 = vmatprep.subr.bf16.mxu1 %v5558_v53 }
 0x46e   :  { %5561 = vmatpush3.bf16.msra.mxu1 %v5558_v53 }
 0x46f   :  { %v5562_v25 = vpack.c.bf16 %v737_v44, %v736_v60 }
 0x471   :  { %5563 = vmatprep.subr.bf16.mxu1 %v5562_v25 }
 0x472   :  { %5565 = vmatpush3.bf16.msra.mxu1 %v5562_v25 }
 0x475   :  { %5057 = vmatmul.mubr.msk.f32.vlgmr.msra.gmra.mrb[8].mxu1 %vm228_vm0, %v6037_v2 }
 0x476   :  { %5059 = vmatprep.mubr.msk.f32.mxu1 %vm228_vm0, %v6045_v4 }
 0x479   :  { %5060 = vmatmul.mubr.msk.f32.gmra.mrb[10].mxu1 %vm228_vm0, %v6061_v8 }
 0x47a   :  { %5084 = vmatprep.mubr.msk.f32.mxu1 %vm228_vm0, %v6032_v1 }
 0x548   :  { %v5058_v48 = vpop.f32.mrb[8].mxu1 }
 0x549   :  { %v832_v0 = vadd.f32 %v5058_v48, %v6184_v5  ;;  %v812_v37 = vpop.f32.mrb[9].mxu1  ;;  %v6337_v5 = vld [vmem:[%s6907_s2 + $0x8] sm:$0xff] }
 0x54a   :  { %v831_v32 = vadd.f32 %v812_v37, %v6168_v49  ;;  %v6327_v49 = vld [vmem:[%s6907_s2] sm:$0xff] }
 0x54b   :  { %v836_v29 = vmax.f32 %v832_v0, 0.0 }
 0x54c   :  { %v835_v57 = vmax.f32 %v831_v32, 0.0  ;;  %v5061_v58 = vpop.f32.mrb[10].mxu1 }
 0x54d   :  { %v834_v59 = vadd.f32 %v5061_v58, %v6208_v33  ;;  %v822_v9 = vpop.f32.mrb[11].mxu1  ;;  %v6353_v33 = vld [vmem:[%s6907_s2 + $0x18] sm:$0xff] }
 0x54e   :  { %v6308_v10 = vpack.c.bf16 %v836_v29, %v835_v57  ;;  %v833_v13 = vadd.f32 %v822_v9, %v6196_v38  ;;  %v6343_v38 = vld [vmem:[%s6907_s2 + $0x10] sm:$0xff] }
 0x54f   :  { %v838_v14 = vmax.f32 %v834_v59, 0.0 }
 0x550   :  { %v837_v15 = vmax.f32 %v833_v13, 0.0  ;;  %5567 = vmatprep.subr.bf16.mxu0 %v6308_v10 }
 0x551   :  { %5569 = vmatpush3.bf16.msra.mxu0 %v6308_v10 }
 0x552   :  { %v6313_v1 = vpack.c.bf16 %v838_v14, %v837_v15 }
 0x554   :  { %5571 = vmatprep.subr.bf16.mxu0 %v6313_v1 }
 0x555   :  { %5573 = vmatpush3.bf16.msra.mxu0 %v6313_v1 }
 0x556   :  { %5583 = vmatprep.subr.bf16.mxu0 %v6219_v19 }
 0x558   :  { %5071 = vmatmul.mubr.msk.f32.vlgmr.msra.gmra.mrb[12].mxu0 %vm228_vm0, %v6037_v2 }
 0x559   :  { %5585 = vmatpush3.bf16.msra.mxu0 %v6219_v19  ;;  %5073 = vmatprep.mubr.msk.f32.mxu0 %vm228_vm0, %v6045_v4 }
 0x55a   :  { %5587 = vmatprep.subr.bf16.mxu0 %v6223_v39 }
 0x55c   :  { %5074 = vmatmul.mubr.msk.f32.gmra.mrb[14].mxu0 %vm228_vm0, %v6061_v8 }
 0x55d   :  { %5589 = vmatpush3.bf16.msra.mxu0 %v6223_v39  ;;  %5098 = vmatprep.mubr.msk.f32.mxu0 %vm228_vm0, %v6327_v49 }
 0x55e   :  { %5599 = vmatprep.subr.bf16.mxu0 %v6256_v11 }
 0x560   :  { %5099 = vmatmul.mubr.msk.f32.vlgmr.msra.gmra.mrb[16].mxu0 %vm228_vm0, %v6337_v5 }
 0x561   :  { %5601 = vmatpush3.bf16.msra.mxu0 %v6256_v11  ;;  %5101 = vmatprep.mubr.msk.f32.mxu0 %vm228_vm0, %v6343_v38 }
 0x562   :  { %5603 = vmatprep.subr.bf16.mxu0 %v6261_v61 }
 0x564   :  { %5102 = vmatmul.mubr.msk.f32.gmra.mrb[18].mxu0 %vm228_vm0, %v6353_v33 }
 0x565   :  { %5605 = vmatpush3.bf16.msra.mxu0 %v6261_v61  ;;  %5126 = vmatprep.mubr.msk.f32.mxu0 %vm228_vm0, %v6327_v49 }
 0x566   :  { %5615 = vmatprep.subr.bf16.mxu0 %v5558_v53 }
 0x568   :  { %5127 = vmatmul.mubr.msk.f32.vlgmr.msra.gmra.mrb[20].mxu0 %vm228_vm0, %v6337_v5 }
 0x569   :  { %5617 = vmatpush3.bf16.msra.mxu0 %v5558_v53  ;;  %5129 = vmatprep.mubr.msk.f32.mxu0 %vm228_vm0, %v6343_v38  ;;  %v6473_v53 = vpop.permute.xlu1 %1075 }
 0x56a   :  { %5619 = vmatprep.subr.bf16.mxu0 %v5562_v25 }
 0x56c   :  { %5130 = vmatmul.mubr.msk.f32.gmra.mrb[22].mxu0 %vm228_vm0, %v6353_v33 }
 0x56d   :  { %5621 = vmatpush3.bf16.msra.mxu0 %v5562_v25  ;;  %5154 = vmatprep.mubr.msk.f32.mxu0 %vm228_vm0, %v6327_v49 }
 0x570   :  { %5155 = vmatmul.mubr.msk.f32.vlgmr.msra.gmra.mrb[24].mxu0 %vm228_vm0, %v6337_v5 }
 0x571   :  { %5157 = vmatprep.mubr.msk.f32.mxu0 %vm228_vm0, %v6343_v38 }
 0x574   :  { %5158 = vmatmul.mubr.msk.f32.gmra.mrb[26].mxu0 %vm228_vm0, %v6353_v33 }
 0x575   :  { %5182 = vmatprep.mubr.msk.f32.mxu0 %vm228_vm0, %v6327_v49 }
 0x62b   :  { %v5072_v19 = vpop.f32.mrb[12].mxu0 }
 0x62c   :  { %v933_v39 = vadd.f32 %v5072_v19, %v6186_v6  ;;  %v913_v11 = vpop.f32.mrb[13].mxu0 }
 0x62d   :  { %v932_v61 = vadd.f32 %v913_v11, %v6171_v50  ;;  %v6395_v50 = vld [vmem:[%s6908_s3 + $0x20] sm:$0xff] }
 0x62e   :  { %v937_v45 = vmax.f32 %v933_v39, 0.0 }
 0x62f   :  { %v936_v26 = vmax.f32 %v932_v61, 0.0  ;;  %v5075_v30 = vpop.f32.mrb[14].mxu0 }
 0x630   :  { %v935_v16 = vadd.f32 %v5075_v30, %v6210_v34  ;;  %v923_v17 = vpop.f32.mrb[15].mxu0 }
 0x631   :  { %v5574_v18 = vpack.c.bf16 %v937_v45, %v936_v26  ;;  %v934_v47 = vadd.f32 %v923_v17, %v6198_v40 }
 0x632   :  { %v939_v35 = vmax.f32 %v935_v16, 0.0 }
 0x633   :  { %v938_v55 = vmax.f32 %v934_v47, 0.0  ;;  %5575 = vmatprep.subr.bf16.mxu1 %v5574_v18  ;;  %5631 = vmatprep.subr.bf16.mxu0 %v5574_v18 }
 0x634   :  { %5577 = vmatpush3.bf16.msra.mxu1 %v5574_v18  ;;  %5633 = vmatpush3.bf16.msra.mxu0 %v5574_v18 }
 0x635   :  { %v5578_v12 = vpack.c.bf16 %v939_v35, %v938_v55 }
 0x637   :  { %5579 = vmatprep.subr.bf16.mxu1 %v5578_v12  ;;  %5635 = vmatprep.subr.bf16.mxu0 %v5578_v12 }
 0x638   :  { %5581 = vmatpush3.bf16.msra.mxu1 %v5578_v12  ;;  %5637 = vmatpush3.bf16.msra.mxu0 %v5578_v12 }
 0x639   :  { %5591 = vmatprep.subr.bf16.mxu1 %v6237_v43  ;;  %5202 = vmatprep.subr.mxu0 %v5983_v3 }
 0x63b   :  { %5085 = vmatmul.mubr.msk.f32.vlgmr.msra.gmra.mrb[12].mxu1 %vm228_vm0, %v6037_v2  ;;  %5183 = vmatmul.mubr.msk.f32.vlgmr.msra.gmra.mrb[28].mxu0 %vm228_vm0, %v6337_v5  ;;  %v6409_v2 = vld [vmem:[%s6908_s3 + $0x28] sm:$0xff] }
 0x63c   :  { %5593 = vmatpush3.bf16.msra.mxu1 %v6237_v43  ;;  %5203 = vmatpush3.msra.mxu0 %v5983_v3 }
 0x63d   :  { %5595 = vmatprep.subr.bf16.mxu1 %v6241_v56  ;;  %5087 = vmatprep.mubr.msk.f32.mxu1 %vm228_vm0, %v6045_v4  ;;  %v6417_v4 = vld [vmem:[%s6908_s3 + $0x30] sm:$0xff] }
 0x63e   :  { %5185 = vmatprep.mubr.msk.f32.mxu0 %vm228_vm0, %v6343_v38 }
 0x63f   :  { %5088 = vmatmul.mubr.msk.f32.gmra.mrb[14].mxu1 %vm228_vm0, %v6061_v8  ;;  %5186 = vmatmul.mubr.msk.f32.gmra.mrb[30].mxu0 %vm228_vm0, %v6353_v33  ;;  %v6429_v8 = vld [vmem:[%s6908_s3 + $0x38] sm:$0xff] }
 0x640   :  { %5597 = vmatpush3.bf16.msra.mxu1 %v6241_v56  ;;  %5204 = vmatprep.mubr.msk.f32.mxu0 %vm228_vm0, %v6395_v50 }
 0x641   :  { %5607 = vmatprep.subr.bf16.mxu1 %v6276_v63  ;;  %5112 = vmatprep.mubr.msk.f32.mxu1 %vm228_vm0, %v6327_v49 }
 0x643   :  { %5205 = vmatmul.mubr.msk.f32.vlgmr.msra.gmra.mrb[16].mxu0 %vm228_vm0, %v6409_v2  ;;  %5113 = vmatmul.mubr.msk.f32.vlgmr.msra.gmra.mrb[16].mxu1 %vm228_vm0, %v6337_v5 }
 0x644   :  { %5609 = vmatpush3.bf16.msra.mxu1 %v6276_v63  ;;  %5207 = vmatprep.mubr.msk.f32.mxu0 %vm228_vm0, %v6417_v4 }
 0x645   :  { %5611 = vmatprep.subr.bf16.mxu1 %v6281_v62  ;;  %5115 = vmatprep.mubr.msk.f32.mxu1 %vm228_vm0, %v6343_v38 }
 0x647   :  { %5208 = vmatmul.mubr.msk.f32.gmra.mrb[18].mxu0 %vm228_vm0, %v6429_v8  ;;  %5116 = vmatmul.mubr.msk.f32.gmra.mrb[18].mxu1 %vm228_vm0, %v6353_v33 }
 0x648   :  { %5613 = vmatpush3.bf16.msra.mxu1 %v6281_v62  ;;  %5140 = vmatprep.mubr.msk.f32.mxu1 %vm228_vm0, %v6327_v49 }
 0x649   :  { %5623 = vmatprep.subr.bf16.mxu1 %v6308_v10  ;;  %5232 = vmatprep.mubr.msk.f32.mxu0 %vm228_vm0, %v6395_v50 }
 0x64b   :  { %5141 = vmatmul.mubr.msk.f32.vlgmr.msra.gmra.mrb[20].mxu1 %vm228_vm0, %v6337_v5 }
 0x64c   :  { %5625 = vmatpush3.bf16.msra.mxu1 %v6308_v10  ;;  %5143 = vmatprep.mubr.msk.f32.mxu1 %vm228_vm0, %v6343_v38 }
 0x64d   :  { %5627 = vmatprep.subr.bf16.mxu1 %v6313_v1 }
 0x64f   :  { %5144 = vmatmul.mubr.msk.f32.gmra.mrb[22].mxu1 %vm228_vm0, %v6353_v33 }
 0x650   :  { %5629 = vmatpush3.bf16.msra.mxu1 %v6313_v1  ;;  %5168 = vmatprep.mubr.msk.f32.mxu1 %vm228_vm0, %v6327_v49 }
 0x653   :  { %5169 = vmatmul.mubr.msk.f32.vlgmr.msra.gmra.mrb[24].mxu1 %vm228_vm0, %v6337_v5 }
 0x654   :  { %5171 = vmatprep.mubr.msk.f32.mxu1 %vm228_vm0, %v6343_v38 }
 0x657   :  { %5172 = vmatmul.mubr.msk.f32.gmra.mrb[26].mxu1 %vm228_vm0, %v6353_v33 }
 0x658   :  { %5196 = vmatprep.mubr.msk.f32.mxu1 %vm228_vm0, %v6327_v49 }
 0x70e   :  { %v5086_v6 = vpop.f32.mrb[12].mxu1 }
 0x70f   :  { %v1034_v40 = vadd.f32 %v5086_v6, %v6188_v7  ;;  %v1014_v34 = vpop.f32.mrb[13].mxu1 }
 0x710   :  { %v1033_v43 = vadd.f32 %v1014_v34, %v6174_v51 }
 0x711   :  { %v1038_v56 = vmax.f32 %v1034_v40, 0.0 }
 0x712   :  { %v1037_v63 = vmax.f32 %v1033_v43, 0.0  ;;  %v5089_v20 = vpop.f32.mrb[14].mxu1 }
 0x713   :  { %v1036_v21 = vadd.f32 %v5089_v20, %v6212_v41  ;;  %v1024_v62 = vpop.f32.mrb[15].mxu1 }
 0x714   :  { %v5638_v27 = vpack.c.bf16 %v1038_v56, %v1037_v63  ;;  %v1035_v31 = vadd.f32 %v1024_v62, %v6200_v28  ;;  %v6475_v28 = vpop.permute.xlu0 %1070 }
 0x715   :  { %v1040_v23 = vmax.f32 %v1036_v21, 0.0 }
 0x716   :  { %v1039_v24 = vmax.f32 %v1035_v31, 0.0  ;;  %5639 = vmatprep.subr.bf16.mxu1 %v5638_v27  ;;  %v5206_v7 = vpop.f32.mrb[16].mxu0 }
 0x717   :  { %v5826_v36 = vadd.f32 %v5206_v7, %v6466_v46  ;;  %5641 = vmatpush3.bf16.msra.mxu1 %v5638_v27  ;;  %v1917_v51 = vpop.f32.mrb[17].mxu0 }
 0x718   :  { %v5642_v42 = vpack.c.bf16 %v1040_v23, %v1039_v24  ;;  %v5827_v52 = vadd.f32 %v1917_v51, %v6469_v22 }
 0x719   :  { %v1941_v41 = vmax.f32 %v5826_v36, 0.0 }
 0x71a   :  { %v1940_v54 = vmax.f32 %v5827_v52, 0.0  ;;  %5643 = vmatprep.subr.bf16.mxu1 %v5642_v42  ;;  %v5209_v44 = vpop.f32.mrb[18].mxu0 }
 0x71b   :  { %v5828_v60 = vadd.f32 %v5209_v44, %v6473_v53  ;;  %5645 = vmatpush3.bf16.msra.mxu1 %v5642_v42  ;;  %v1927_v25 = vpop.f32.mrb[19].mxu0 }
 0x71c   :  { %v6478_v48 = vpack.c.bf16 %v1941_v41, %v1940_v54  ;;  %v5829_v0 = vadd.f32 %v1927_v25, %v6475_v28 }
 0x71d   :  { %v1943_v37 = vmax.f32 %v5828_v60, 0.0 }
 0x71e   :  { %v1942_v32 = vmax.f32 %v5829_v0, 0.0  ;;  %5197 = vmatmul.mubr.msk.f32.vlgmr.msra.gmra.mrb[28].mxu1 %vm228_vm0, %v6337_v5  ;;  %5647 = vmatprep.subr.bf16.mxu1 %v6478_v48 }
 0x71f   :  { %5649 = vmatpush3.bf16.msra.mxu1 %v6478_v48  ;;  %5199 = vmatprep.mubr.msk.f32.mxu1 %vm228_vm0, %v6343_v38 }
 0x720   :  { %v6487_v29 = vpack.c.bf16 %v1943_v37, %v1942_v32 }
 0x722   :  { %5200 = vmatmul.mubr.msk.f32.gmra.mrb[30].mxu1 %vm228_vm0, %v6353_v33  ;;  %5651 = vmatprep.subr.bf16.mxu1 %v6487_v29 }
 0x723   :  { %5653 = vmatpush3.bf16.msra.mxu1 %v6487_v29  ;;  %5218 = vmatprep.mubr.msk.f32.mxu1 %vm228_vm0, %v6395_v50 }
 0x726   :  { %5219 = vmatmul.mubr.msk.f32.vlgmr.msra.gmra.mrb[16].mxu1 %vm228_vm0, %v6409_v2 }
 0x727   :  { %5221 = vmatprep.mubr.msk.f32.mxu1 %vm228_vm0, %v6417_v4 }
 0x72a   :  { %5222 = vmatmul.mubr.msk.f32.gmra.mrb[18].mxu1 %vm228_vm0, %v6429_v8 }
 0x72b   :  { %5246 = vmatprep.mubr.msk.f32.mxu1 %vm228_vm0, %v6395_v50 }
 0x7f9   :  { %v5220_v57 = vpop.f32.mrb[16].mxu1 }
 0x7fa   :  { %v5830_v58 = vadd.f32 %v5220_v57, %v6466_v46  ;;  %v2018_v59 = vpop.f32.mrb[17].mxu1 }
 0x7fb   :  { %v5831_v9 = vadd.f32 %v2018_v59, %v6469_v22 }
 0x7fc   :  { %v2042_v10 = vmax.f32 %v5830_v58, 0.0 }
 0x7fd   :  { %v2041_v13 = vmax.f32 %v5831_v9, 0.0  ;;  %v5223_v14 = vpop.f32.mrb[18].mxu1 }
 0x7fe   :  { %v5832_v15 = vadd.f32 %v5223_v14, %v6473_v53  ;;  %v2028_v1 = vpop.f32.mrb[19].mxu1 }
 0x7ff   :  { %v6506_v49 = vpack.c.bf16 %v2042_v10, %v2041_v13  ;;  %v5833_v5 = vadd.f32 %v2028_v1, %v6475_v28 }
 0x800   :  { %v2044_v38 = vmax.f32 %v5832_v15, 0.0 }
 0x801   :  { %v2043_v33 = vmax.f32 %v5833_v5, 0.0  ;;  %5655 = vmatprep.subr.bf16.mxu0 %v6506_v49 }
 0x802   :  { %5657 = vmatpush3.bf16.msra.mxu0 %v6506_v49 }
 0x803   :  { %v6511_v19 = vpack.c.bf16 %v2044_v38, %v2043_v33 }
 0x805   :  { %5659 = vmatprep.subr.bf16.mxu0 %v6511_v19 }
 0x806   :  { %5661 = vmatpush3.bf16.msra.mxu0 %v6511_v19 }
 0x809   :  { %5233 = vmatmul.mubr.msk.f32.vlgmr.msra.gmra.mrb[20].mxu0 %vm228_vm0, %v6409_v2 }
 0x80a   :  { %5235 = vmatprep.mubr.msk.f32.mxu0 %vm228_vm0, %v6417_v4 }
 0x80d   :  { %5236 = vmatmul.mubr.msk.f32.gmra.mrb[22].mxu0 %vm228_vm0, %v6429_v8 }
 0x80e   :  { %5260 = vmatprep.mubr.msk.f32.mxu0 %vm228_vm0, %v6395_v50 }
 0x8dc   :  { %v5234_v39 = vpop.f32.mrb[20].mxu0 }
 0x8dd   :  { %v5834_v11 = vadd.f32 %v5234_v39, %v6466_v46  ;;  %v2119_v61 = vpop.f32.mrb[21].mxu0 }
 0x8de   :  { %v5835_v45 = vadd.f32 %v2119_v61, %v6469_v22 }
 0x8df   :  { %v2143_v26 = vmax.f32 %v5834_v11, 0.0 }
 0x8e0   :  { %v2142_v30 = vmax.f32 %v5835_v45, 0.0  ;;  %v5237_v16 = vpop.f32.mrb[22].mxu0 }
 0x8e1   :  { %v5836_v17 = vadd.f32 %v5237_v16, %v6473_v53  ;;  %v2129_v18 = vpop.f32.mrb[23].mxu0 }
 0x8e2   :  { %v6526_v47 = vpack.c.bf16 %v2143_v26, %v2142_v30  ;;  %v5837_v35 = vadd.f32 %v2129_v18, %v6475_v28  ;;  %v6597_v26 = vld [vmem:[%s6907_s2 + $0x20] sm:$0xff]  ;;  %v6613_v30 = vld [vmem:[%s6907_s2 + $0x30] sm:$0xff] }
 0x8e3   :  { %v2145_v55 = vmax.f32 %v5836_v17, 0.0 }
 0x8e4   :  { %v2144_v12 = vmax.f32 %v5837_v35, 0.0  ;;  %5663 = vmatprep.subr.bf16.mxu1 %v6526_v47 }
 0x8e5   :  { %5665 = vmatpush3.bf16.msra.mxu1 %v6526_v47 }
 0x8e6   :  { %v6531_v6 = vpack.c.bf16 %v2145_v55, %v2144_v12 }
 0x8e8   :  { %5667 = vmatprep.subr.bf16.mxu1 %v6531_v6 }
 0x8e9   :  { %5669 = vmatpush3.bf16.msra.mxu1 %v6531_v6 }
 0x8ec   :  { %5247 = vmatmul.mubr.msk.f32.vlgmr.msra.gmra.mrb[20].mxu1 %vm228_vm0, %v6409_v2 }
 0x8ed   :  { %5249 = vmatprep.mubr.msk.f32.mxu1 %vm228_vm0, %v6417_v4 }
 0x8f0   :  { %5250 = vmatmul.mubr.msk.f32.gmra.mrb[22].mxu1 %vm228_vm0, %v6429_v8 }
 0x8f1   :  { %5274 = vmatprep.mubr.msk.f32.mxu1 %vm228_vm0, %v6395_v50 }
 0x9bf   :  { %v5248_v40 = vpop.f32.mrb[20].mxu1 }
 0x9c0   :  { %v5838_v34 = vadd.f32 %v5248_v40, %v6466_v46  ;;  %v2220_v43 = vpop.f32.mrb[21].mxu1 }
 0x9c1   :  { %v5839_v56 = vadd.f32 %v2220_v43, %v6469_v22 }
 0x9c2   :  { %v2244_v63 = vmax.f32 %v5838_v34, 0.0 }
 0x9c3   :  { %v2243_v20 = vmax.f32 %v5839_v56, 0.0  ;;  %v5251_v21 = vpop.f32.mrb[22].mxu1 }
 0x9c4   :  { %v5840_v62 = vadd.f32 %v5251_v21, %v6473_v53  ;;  %v2230_v27 = vpop.f32.mrb[23].mxu1  ;;  %v6665_v21 = vld [vmem:[%s6908_s3 + $0x40] sm:$0xff] }
 0x9c5   :  { %v6546_v31 = vpack.c.bf16 %v2244_v63, %v2243_v20  ;;  %v5841_v23 = vadd.f32 %v2230_v27, %v6475_v28 }
 0x9c6   :  { %v2246_v24 = vmax.f32 %v5840_v62, 0.0 }
 0x9c7   :  { %v2245_v7 = vmax.f32 %v5841_v23, 0.0  ;;  %5671 = vmatprep.subr.bf16.mxu0 %v6546_v31 }
 0x9c8   :  { %5673 = vmatpush3.bf16.msra.mxu0 %v6546_v31 }
 0x9c9   :  { %v6551_v36 = vpack.c.bf16 %v2246_v24, %v2245_v7 }
 0x9cb   :  { %5675 = vmatprep.subr.bf16.mxu0 %v6551_v36 }
 0x9cc   :  { %5677 = vmatpush3.bf16.msra.mxu0 %v6551_v36 }
 0x9cf   :  { %5261 = vmatmul.mubr.msk.f32.vlgmr.msra.gmra.mrb[24].mxu0 %vm228_vm0, %v6409_v2 }
 0x9d0   :  { %5263 = vmatprep.mubr.msk.f32.mxu0 %vm228_vm0, %v6417_v4 }
 0x9d3   :  { %5264 = vmatmul.mubr.msk.f32.gmra.mrb[26].mxu0 %vm228_vm0, %v6429_v8 }
 0x9d4   :  { %5288 = vmatprep.mubr.msk.f32.mxu0 %vm228_vm0, %v6395_v50 }
 0xaa2   :  { %v5262_v51 = vpop.f32.mrb[24].mxu0 }
 0xaa3   :  { %v5842_v42 = vadd.f32 %v5262_v51, %v6466_v46  ;;  %v2321_v52 = vpop.f32.mrb[25].mxu0 }
 0xaa4   :  { %v5843_v41 = vadd.f32 %v2321_v52, %v6469_v22 }
 0xaa5   :  { %v2345_v54 = vmax.f32 %v5842_v42, 0.0 }
 0xaa6   :  { %v2344_v44 = vmax.f32 %v5843_v41, 0.0  ;;  %v5265_v60 = vpop.f32.mrb[26].mxu0 }
 0xaa7   :  { %v5844_v25 = vadd.f32 %v5265_v60, %v6473_v53  ;;  %v2331_v0 = vpop.f32.mrb[27].mxu0 }
 0xaa8   :  { %v5678_v37 = vpack.c.bf16 %v2345_v54, %v2344_v44  ;;  %v5845_v32 = vadd.f32 %v2331_v0, %v6475_v28 }
 0xaa9   :  { %v2347_v57 = vmax.f32 %v5844_v25, 0.0 }
 0xaaa   :  { %v2346_v58 = vmax.f32 %v5845_v32, 0.0  ;;  %5679 = vmatprep.subr.bf16.mxu1 %v5678_v37 }
 0xaab   :  { %5681 = vmatpush3.bf16.msra.mxu1 %v5678_v37 }
 0xaac   :  { %v5682_v59 = vpack.c.bf16 %v2347_v57, %v2346_v58 }
 0xaae   :  { %5683 = vmatprep.subr.bf16.mxu1 %v5682_v59 }
 0xaaf   :  { %5685 = vmatpush3.bf16.msra.mxu1 %v5682_v59 }
 0xab2   :  { %5275 = vmatmul.mubr.msk.f32.vlgmr.msra.gmra.mrb[24].mxu1 %vm228_vm0, %v6409_v2 }
 0xab3   :  { %5277 = vmatprep.mubr.msk.f32.mxu1 %vm228_vm0, %v6417_v4 }
 0xab6   :  { %5278 = vmatmul.mubr.msk.f32.gmra.mrb[26].mxu1 %vm228_vm0, %v6429_v8 }
 0xab7   :  { %5302 = vmatprep.mubr.msk.f32.mxu1 %vm228_vm0, %v6395_v50 }
 0xb85   :  { %v5276_v9 = vpop.f32.mrb[24].mxu1 }
 0xb86   :  { %v5846_v10 = vadd.f32 %v5276_v9, %v6466_v46  ;;  %v2422_v13 = vpop.f32.mrb[25].mxu1 }
 0xb87   :  { %v5847_v14 = vadd.f32 %v2422_v13, %v6469_v22 }
 0xb88   :  { %v2446_v15 = vmax.f32 %v5846_v10, 0.0 }
 0xb89   :  { %v2445_v1 = vmax.f32 %v5847_v14, 0.0  ;;  %v5279_v5 = vpop.f32.mrb[26].mxu1 }
 0xb8a   :  { %v5848_v38 = vadd.f32 %v5279_v5, %v6473_v53  ;;  %v2432_v33 = vpop.f32.mrb[27].mxu1 }
 0xb8b   :  { %v6578_v39 = vpack.c.bf16 %v2446_v15, %v2445_v1  ;;  %v5849_v11 = vadd.f32 %v2432_v33, %v6475_v28 }
 0xb8c   :  { %v2448_v61 = vmax.f32 %v5848_v38, 0.0 }
 0xb8d   :  { %v2447_v45 = vmax.f32 %v5849_v11, 0.0  ;;  %5687 = vmatprep.subr.bf16.mxu0 %v6578_v39 }
 0xb8e   :  { %5689 = vmatpush3.bf16.msra.mxu0 %v6578_v39 }
 0xb8f   :  { %v6583_v50 = vpack.c.bf16 %v2448_v61, %v2447_v45 }
 0xb91   :  { %5691 = vmatprep.subr.bf16.mxu0 %v6583_v50 }
 0xb92   :  { %5693 = vmatpush3.bf16.msra.mxu0 %v6583_v50 }
 0xb93   :  { %5703 = vmatprep.subr.bf16.mxu0 %v6478_v48 }
 0xb95   :  { %5289 = vmatmul.mubr.msk.f32.vlgmr.msra.gmra.mrb[28].mxu0 %vm228_vm0, %v6409_v2 }
 0xb96   :  { %5705 = vmatpush3.bf16.msra.mxu0 %v6478_v48  ;;  %5291 = vmatprep.mubr.msk.f32.mxu0 %vm228_vm0, %v6417_v4  ;;  %v6607_v48 = vld [vmem:[%s6907_s2 + $0x28] sm:$0xff] }
 0xb97   :  { %5707 = vmatprep.subr.bf16.mxu0 %v6487_v29 }
 0xb99   :  { %5292 = vmatmul.mubr.msk.f32.gmra.mrb[30].mxu0 %vm228_vm0, %v6429_v8 }
 0xb9a   :  { %5709 = vmatpush3.bf16.msra.mxu0 %v6487_v29  ;;  %5316 = vmatprep.mubr.msk.f32.mxu0 %vm228_vm0, %v6597_v26  ;;  %v6623_v29 = vld [vmem:[%s6907_s2 + $0x38] sm:$0xff] }
 0xb9b   :  { %5719 = vmatprep.subr.bf16.mxu0 %v6526_v47 }
 0xb9d   :  { %5317 = vmatmul.mubr.msk.f32.vlgmr.msra.gmra.mrb[32].mxu0 %vm228_vm0, %v6607_v48 }
 0xb9e   :  { %5721 = vmatpush3.bf16.msra.mxu0 %v6526_v47  ;;  %5319 = vmatprep.mubr.msk.f32.mxu0 %vm228_vm0, %v6613_v30 }
 0xb9f   :  { %5723 = vmatprep.subr.bf16.mxu0 %v6531_v6 }
 0xba1   :  { %5320 = vmatmul.mubr.msk.f32.gmra.mrb[34].mxu0 %vm228_vm0, %v6623_v29 }
 0xba2   :  { %5725 = vmatpush3.bf16.msra.mxu0 %v6531_v6  ;;  %5344 = vmatprep.mubr.msk.f32.mxu0 %vm228_vm0, %v6597_v26 }
 0xba3   :  { %5735 = vmatprep.subr.bf16.mxu0 %v5678_v37 }
 0xba5   :  { %5345 = vmatmul.mubr.msk.f32.vlgmr.msra.gmra.mrb[36].mxu0 %vm228_vm0, %v6607_v48 }
 0xba6   :  { %5737 = vmatpush3.bf16.msra.mxu0 %v5678_v37  ;;  %5347 = vmatprep.mubr.msk.f32.mxu0 %vm228_vm0, %v6613_v30 }
 0xba7   :  { %5739 = vmatprep.subr.bf16.mxu0 %v5682_v59 }
 0xba9   :  { %5348 = vmatmul.mubr.msk.f32.gmra.mrb[38].mxu0 %vm228_vm0, %v6623_v29 }
 0xbaa   :  { %5741 = vmatpush3.bf16.msra.mxu0 %v5682_v59  ;;  %5372 = vmatprep.mubr.msk.f32.mxu0 %vm228_vm0, %v6597_v26 }
 0xbad   :  { %5373 = vmatmul.mubr.msk.f32.vlgmr.msra.gmra.mrb[40].mxu0 %vm228_vm0, %v6607_v48 }
 0xbae   :  { %5375 = vmatprep.mubr.msk.f32.mxu0 %vm228_vm0, %v6613_v30 }
 0xbb1   :  { %5376 = vmatmul.mubr.msk.f32.gmra.mrb[42].mxu0 %vm228_vm0, %v6623_v29 }
 0xbb2   :  { %5400 = vmatprep.mubr.msk.f32.mxu0 %vm228_vm0, %v6597_v26 }
 0xc68   :  { %v5290_v16 = vpop.f32.mrb[28].mxu0 }
 0xc69   :  { %v5850_v17 = vadd.f32 %v5290_v16, %v6466_v46  ;;  %v2523_v18 = vpop.f32.mrb[29].mxu0 }
 0xc6a   :  { %v5851_v47 = vadd.f32 %v2523_v18, %v6469_v22 }
 0xc6b   :  { %v2547_v35 = vmax.f32 %v5850_v17, 0.0 }
 0xc6c   :  { %v2546_v55 = vmax.f32 %v5851_v47, 0.0  ;;  %v5293_v12 = vpop.f32.mrb[30].mxu0 }
 0xc6d   :  { %v5852_v6 = vadd.f32 %v5293_v12, %v6473_v53  ;;  %v2533_v40 = vpop.f32.mrb[31].mxu0 }
 0xc6e   :  { %v5694_v34 = vpack.c.bf16 %v2547_v35, %v2546_v55  ;;  %v5853_v43 = vadd.f32 %v2533_v40, %v6475_v28 }
 0xc6f   :  { %v2549_v56 = vmax.f32 %v5852_v6, 0.0 }
 0xc70   :  { %v2548_v63 = vmax.f32 %v5853_v43, 0.0  ;;  %5695 = vmatprep.subr.bf16.mxu1 %v5694_v34  ;;  %5751 = vmatprep.subr.bf16.mxu0 %v5694_v34 }
 0xc71   :  { %5697 = vmatpush3.bf16.msra.mxu1 %v5694_v34  ;;  %5753 = vmatpush3.bf16.msra.mxu0 %v5694_v34 }
 0xc72   :  { %v5698_v20 = vpack.c.bf16 %v2549_v56, %v2548_v63 }
 0xc74   :  { %5699 = vmatprep.subr.bf16.mxu1 %v5698_v20  ;;  %5755 = vmatprep.subr.bf16.mxu0 %v5698_v20 }
 0xc75   :  { %5701 = vmatpush3.bf16.msra.mxu1 %v5698_v20  ;;  %5757 = vmatpush3.bf16.msra.mxu0 %v5698_v20 }
 0xc76   :  { %5711 = vmatprep.subr.bf16.mxu1 %v6506_v49  ;;  %5420 = vmatprep.subr.mxu0 %v5983_v3 }
 0xc78   :  { %5303 = vmatmul.mubr.msk.f32.vlgmr.msra.gmra.mrb[28].mxu1 %vm228_vm0, %v6409_v2  ;;  %5401 = vmatmul.mubr.msk.f32.vlgmr.msra.gmra.mrb[44].mxu0 %vm228_vm0, %v6607_v48  ;;  %v6687_v2 = vld [vmem:[%s6908_s3 + $0x50] sm:$0xff] }
 0xc79   :  { %5713 = vmatpush3.bf16.msra.mxu1 %v6506_v49  ;;  %5421 = vmatpush3.msra.mxu0 %v5983_v3  ;;  %v6679_v3 = vld [vmem:[%s6908_s3 + $0x48] sm:$0xff]  ;;  %v6735_v49 = vpop.permute.xlu1 %2676 }
 0xc7a   :  { %5715 = vmatprep.subr.bf16.mxu1 %v6511_v19  ;;  %5305 = vmatprep.mubr.msk.f32.mxu1 %vm228_vm0, %v6417_v4  ;;  %v6699_v4 = vld [vmem:[%s6908_s3 + $0x58] sm:$0xff]  ;;  %s5985_s3 = smov [#allocation4]  }
 0xc7b   :  { %5403 = vmatprep.mubr.msk.f32.mxu0 %vm228_vm0, %v6613_v30  ;;  %s4476_s16 = sshll.u32 %s5985_s3, 4  ;;  %s4477_s16 = int_to_ptr.vmem [resolvable:$true] %s4476_s16 }
 0xc7c   :  { %5306 = vmatmul.mubr.msk.f32.gmra.mrb[30].mxu1 %vm228_vm0, %v6429_v8  ;;  %5404 = vmatmul.mubr.msk.f32.gmra.mrb[46].mxu0 %vm228_vm0, %v6623_v29  ;;  %v6733_v8 = vpop.permute.xlu0 %2671  ;;  %s5959_s17 = scalar_lea.vmem %s4477_s16, 128  ;;  %p5964_p1 = scmp.lt.s32.totalorder %s4477_s16, %s4477_s16 }
 0xc7d   :  { %5717 = vmatpush3.bf16.msra.mxu1 %v6511_v19  ;;  %5422 = vmatprep.mubr.msk.f32.mxu0 %vm228_vm0, %v6665_v21  ;;  %v6742_v52 = vpop.permute.xlu1 %2686  ;;  %p5960_p0 = scmp.ne.s32.totalorder %s4477_s16, %s5959_s17  ;;  %p5965_p2 = scmp.lt.s32.totalorder %s5959_s17, %s5959_s17 }
 0xc7e   :  { %5727 = vmatprep.subr.bf16.mxu1 %v6546_v31  ;;  %5330 = vmatprep.mubr.msk.f32.mxu1 %vm228_vm0, %v6597_v26 }
 0xc7f   :  { %p5966_p3 = por %p5965_p2, %p5964_p1 }
 0xc80   :  { %5423 = vmatmul.mubr.msk.f32.vlgmr.msra.gmra.mrb[32].mxu0 %vm228_vm0, %v6679_v3  ;;  %5331 = vmatmul.mubr.msk.f32.vlgmr.msra.gmra.mrb[32].mxu1 %vm228_vm0, %v6607_v48 }
 0xc81   :  { %5729 = vmatpush3.bf16.msra.mxu1 %v6546_v31  ;;  %5425 = vmatprep.mubr.msk.f32.mxu0 %vm228_vm0, %v6687_v2  ;;  %v6749_v57 = vpop.permute.xlu1 %4312  ;;  %p5967_p4 = pnand %p5966_p3, %p5960_p0 }
 0xc82   :  { %5731 = vmatprep.subr.bf16.mxu1 %v6551_v36  ;;  %5333 = vmatprep.mubr.msk.f32.mxu1 %vm228_vm0, %v6613_v30 }
 0xc84   :  { %5426 = vmatmul.mubr.msk.f32.gmra.mrb[34].mxu0 %vm228_vm0, %v6699_v4  ;;  %5334 = vmatmul.mubr.msk.f32.gmra.mrb[34].mxu1 %vm228_vm0, %v6623_v29 }
 0xc85   :  { %5733 = vmatpush3.bf16.msra.mxu1 %v6551_v36  ;;  %5358 = vmatprep.mubr.msk.f32.mxu1 %vm228_vm0, %v6597_v26  ;;  %v6739_v36 = vpop.permute.xlu0 %2681  ;;  %v6762_v61 = vpop.permute.xlu1 %4322 }
 0xc86   :  { %5743 = vmatprep.subr.bf16.mxu1 %v6578_v39  ;;  %5450 = vmatprep.mubr.msk.f32.mxu0 %vm228_vm0, %v6665_v21 }
 0xc88   :  { %5359 = vmatmul.mubr.msk.f32.vlgmr.msra.gmra.mrb[36].mxu1 %vm228_vm0, %v6607_v48 }
 0xc89   :  { %5745 = vmatpush3.bf16.msra.mxu1 %v6578_v39  ;;  %5361 = vmatprep.mubr.msk.f32.mxu1 %vm228_vm0, %v6613_v30  ;;  %v6747_v32 = vpop.permute.xlu0 %4307 }
 0xc8a   :  { %5747 = vmatprep.subr.bf16.mxu1 %v6583_v50 }
 0xc8c   :  { %5362 = vmatmul.mubr.msk.f32.gmra.mrb[38].mxu1 %vm228_vm0, %v6623_v29 }
 0xc8d   :  { %5749 = vmatpush3.bf16.msra.mxu1 %v6583_v50  ;;  %5386 = vmatprep.mubr.msk.f32.mxu1 %vm228_vm0, %v6597_v26  ;;  %v6757_v33 = vpop.permute.xlu0 %4317 }
 0xc90   :  { %5387 = vmatmul.mubr.msk.f32.vlgmr.msra.gmra.mrb[40].mxu1 %vm228_vm0, %v6607_v48 }
 0xc91   :  { %5389 = vmatprep.mubr.msk.f32.mxu1 %vm228_vm0, %v6613_v30 }
 0xc94   :  { %5390 = vmatmul.mubr.msk.f32.gmra.mrb[42].mxu1 %vm228_vm0, %v6623_v29 }
 0xc95   :  { %5414 = vmatprep.mubr.msk.f32.mxu1 %vm228_vm0, %v6597_v26 }
 0xd4b   :  { %v5304_v19 = vpop.f32.mrb[28].mxu1 }
 0xd4c   :  { %v5854_v62 = vadd.f32 %v5304_v19, %v6466_v46  ;;  %v2624_v27 = vpop.f32.mrb[29].mxu1 }
 0xd4d   :  { %v5855_v31 = vadd.f32 %v2624_v27, %v6469_v22 }
 0xd4e   :  { %v2648_v23 = vmax.f32 %v5854_v62, 0.0 }
 0xd4f   :  { %v2647_v24 = vmax.f32 %v5855_v31, 0.0  ;;  %v5307_v7 = vpop.f32.mrb[30].mxu1 }
 0xd50   :  { %v5856_v51 = vadd.f32 %v5307_v7, %v6473_v53  ;;  %v2634_v42 = vpop.f32.mrb[31].mxu1 }
 0xd51   :  { %v5758_v41 = vpack.c.bf16 %v2648_v23, %v2647_v24  ;;  %v5857_v54 = vadd.f32 %v2634_v42, %v6475_v28 }
 0xd52   :  { %v2650_v44 = vmax.f32 %v5856_v51, 0.0 }
 0xd53   :  { %v2649_v60 = vmax.f32 %v5857_v54, 0.0  ;;  %5759 = vmatprep.subr.bf16.mxu1 %v5758_v41  ;;  %v5424_v46 = vpop.f32.mrb[32].mxu0 }
 0xd54   :  { %v5858_v25 = vadd.f32 %v5424_v46, %v6735_v49  ;;  %5761 = vmatpush3.bf16.msra.mxu1 %v5758_v41  ;;  %v3528_v22 = vpop.f32.mrb[33].mxu0 }
 0xd55   :  { %v5762_v0 = vpack.c.bf16 %v2650_v44, %v2649_v60  ;;  %v5859_v37 = vadd.f32 %v3528_v22, %v6733_v8 }
 0xd56   :  { %v3552_v53 = vmax.f32 %v5858_v25, 0.0 }
 0xd57   :  { %v3551_v58 = vmax.f32 %v5859_v37, 0.0  ;;  %5763 = vmatprep.subr.bf16.mxu1 %v5762_v0  ;;  %v5427_v59 = vpop.f32.mrb[34].mxu0 }
 0xd58   :  { %v4326_v28 = vmul.f32 %v6749_v57, %v3552_v53  ;;  %v5860_v9 = vadd.f32 %v5427_v59, %v6742_v52  ;;  %5765 = vmatpush3.bf16.msra.mxu1 %v5762_v0  ;;  %v3538_v10 = vpop.f32.mrb[35].mxu0 }
 0xd59   :  { %v5766_v13 = vpack.c.bf16 %v3552_v53, %v3551_v58  ;;  %v4325_v14 = vmul.f32 %v6747_v32, %v3551_v58  ;;  %v5861_v15 = vadd.f32 %v3538_v10, %v6739_v36  ;;  %v6797_v53 = vpop.permute.xlu0 %4435 }
 0xd5a   :  { %v3554_v1 = vmax.f32 %v5860_v9, 0.0 }
 0xd5b   :  { %v4357_v5 = vadd.f32 %v4326_v28, %v4325_v14  ;;  %v3553_v38 = vmax.f32 %v5861_v15, 0.0  ;;  %5415 = vmatmul.mubr.msk.f32.vlgmr.msra.gmra.mrb[44].mxu1 %vm228_vm0, %v6607_v48  ;;  %5767 = vmatprep.subr.bf16.mxu1 %v5766_v13 }
 0xd5c   :  { %5769 = vmatpush3.bf16.msra.mxu1 %v5766_v13  ;;  %5417 = vmatprep.mubr.msk.f32.mxu1 %vm228_vm0, %v6613_v30  ;;  %v4328_v45 = vmul.f32 %v6762_v61, %v3554_v1 }
 0xd5d   :  { %v5770_v39 = vpack.c.bf16 %v3554_v1, %v3553_v38  ;;  %v4327_v11 = vmul.f32 %v6757_v33, %v3553_v38 }
 0xd5f   :  { %v4358_v50 = vadd.f32 %v4357_v5, %v4327_v11  ;;  %5418 = vmatmul.mubr.msk.f32.gmra.mrb[46].mxu1 %vm228_vm0, %v6623_v29  ;;  %5771 = vmatprep.subr.bf16.mxu1 %v5770_v39 }
 0xd60   :  { %5773 = vmatpush3.bf16.msra.mxu1 %v5770_v39  ;;  %5436 = vmatprep.mubr.msk.f32.mxu1 %vm228_vm0, %v6665_v21 }
 0xd61   :  { %v4359_v26 = vadd.f32 %v4358_v50, %v4328_v45 }
 0xd63   :  { %5437 = vmatmul.mubr.msk.f32.vlgmr.msra.gmra.mrb[32].mxu1 %vm228_vm0, %v6679_v3  ;;  %v4360_v35 = vrot.slane %v4359_v26, 4 }
 0xd64   :  { %5439 = vmatprep.mubr.msk.f32.mxu1 %vm228_vm0, %v6687_v2 }
 0xd65   :  { %v4361_v19 = vadd.f32 %v4360_v35, %v4359_v26 }
 0xd67   :  { %5440 = vmatmul.mubr.msk.f32.gmra.mrb[34].mxu1 %vm228_vm0, %v6699_v4  ;;  %v4362_v24 = vrot.slane %v4361_v19, 2 }
 0xd68   :  { %5464 = vmatprep.mubr.msk.f32.mxu1 %vm228_vm0, %v6665_v21 }
 0xd69   :  { %v4363_v41 = vadd.f32 %v4362_v24, %v4361_v19 }
 0xd6b   :  { %v4364_v60 = vrot.slane %v4363_v41, 1 }
 0xd6d   :  { %v4365_v22 = vadd.f32 %v4364_v60, %v4363_v41 }
 0xd6f   :  { %v4438_v58 = vadd.f32 %v6797_v53, %v4365_v22 }
 0xe2e   :  { %v6777_v48 = vpop.f32.mrb[44].mxu1 }
 0xe2f   :  { %v6779_v30 = vpop.f32.mrb[45].mxu1 }
 0xe36   :  { %v5438_v29 = vpop.f32.mrb[32].mxu1 }
 0xe37   :  { %v5862_v16 = vadd.f32 %v5438_v29, %v6735_v49  ;;  %v3629_v17 = vpop.f32.mrb[33].mxu1 }
 0xe38   :  { %v5863_v18 = vadd.f32 %v3629_v17, %v6733_v8 }
 0xe39   :  { %v3653_v47 = vmax.f32 %v5862_v16, 0.0 }
 0xe3a   :  { %v3652_v55 = vmax.f32 %v5863_v18, 0.0  ;;  %v5441_v12 = vpop.f32.mrb[34].mxu1 }
 0xe3b   :  { %v4330_v6 = vmul.f32 %v6749_v57, %v3653_v47  ;;  %v5864_v40 = vadd.f32 %v5441_v12, %v6742_v52  ;;  %v3639_v34 = vpop.f32.mrb[35].mxu1 }
 0xe3c   :  { %v5774_v43 = vpack.c.bf16 %v3653_v47, %v3652_v55  ;;  %v4329_v56 = vmul.f32 %v6747_v32, %v3652_v55  ;;  %v5865_v63 = vadd.f32 %v3639_v34, %v6739_v36 }
 0xe3d   :  { %v3655_v20 = vmax.f32 %v5864_v40, 0.0 }
 0xe3e   :  { %v4366_v62 = vadd.f32 %v4330_v6, %v4329_v56  ;;  %v3654_v27 = vmax.f32 %v5865_v63, 0.0  ;;  %5775 = vmatprep.subr.bf16.mxu0 %v5774_v43 }
 0xe3f   :  { %5777 = vmatpush3.bf16.msra.mxu0 %v5774_v43  ;;  %v4332_v7 = vmul.f32 %v6762_v61, %v3655_v20 }
 0xe40   :  { %v5778_v31 = vpack.c.bf16 %v3655_v20, %v3654_v27  ;;  %v4331_v23 = vmul.f32 %v6757_v33, %v3654_v27 }
 0xe42   :  { %v4367_v51 = vadd.f32 %v4366_v62, %v4331_v23  ;;  %5779 = vmatprep.subr.bf16.mxu0 %v5778_v31 }
 0xe43   :  { %5781 = vmatpush3.bf16.msra.mxu0 %v5778_v31 }
 0xe44   :  { %v4368_v42 = vadd.f32 %v4367_v51, %v4332_v7 }
 0xe46   :  { %v4369_v54 = vrot.slane %v4368_v42, 4  ;;  %5451 = vmatmul.mubr.msk.f32.vlgmr.msra.gmra.mrb[36].mxu0 %vm228_vm0, %v6679_v3 }
 0xe47   :  { %5453 = vmatprep.mubr.msk.f32.mxu0 %vm228_vm0, %v6687_v2 }
 0xe48   :  { %v4370_v44 = vadd.f32 %v4369_v54, %v4368_v42 }
 0xe4a   :  { %v4371_v46 = vrot.slane %v4370_v44, 2  ;;  %5454 = vmatmul.mubr.msk.f32.gmra.mrb[38].mxu0 %vm228_vm0, %v6699_v4 }
 0xe4b   :  { %5478 = vmatprep.mubr.msk.f32.mxu0 %vm228_vm0, %v6665_v21 }
 0xe4c   :  { %v4372_v25 = vadd.f32 %v4371_v46, %v4370_v44 }
 0xe4e   :  { %v4373_v0 = vrot.slane %v4372_v25, 1 }
 0xe50   :  { %v4374_v37 = vadd.f32 %v4373_v0, %v4372_v25 }
 0xe52   :  { %v4439_v59 = vadd.f32 %v6797_v53, %v4374_v37 }
 0xe54   :  { %v4455_v28 = vsel %vm4454_vm1, %v4439_v59, %v4438_v58 }
 0xf19   :  { %v5452_v9 = vpop.f32.mrb[36].mxu0 }
 0xf1a   :  { %v5866_v10 = vadd.f32 %v5452_v9, %v6735_v49  ;;  %v3730_v13 = vpop.f32.mrb[37].mxu0 }
 0xf1b   :  { %v5867_v14 = vadd.f32 %v3730_v13, %v6733_v8 }
 0xf1c   :  { %v3754_v15 = vmax.f32 %v5866_v10, 0.0 }
 0xf1d   :  { %v3753_v1 = vmax.f32 %v5867_v14, 0.0  ;;  %v5455_v5 = vpop.f32.mrb[38].mxu0 }
 0xf1e   :  { %v4334_v38 = vmul.f32 %v6749_v57, %v3754_v15  ;;  %v5868_v39 = vadd.f32 %v5455_v5, %v6742_v52  ;;  %v3740_v11 = vpop.f32.mrb[39].mxu0 }
 0xf1f   :  { %v5782_v45 = vpack.c.bf16 %v3754_v15, %v3753_v1  ;;  %v4333_v50 = vmul.f32 %v6747_v32, %v3753_v1  ;;  %v5869_v26 = vadd.f32 %v3740_v11, %v6739_v36 }
 0xf20   :  { %v3756_v29 = vmax.f32 %v5868_v39, 0.0 }
 0xf21   :  { %v4375_v16 = vadd.f32 %v4334_v38, %v4333_v50  ;;  %v3755_v17 = vmax.f32 %v5869_v26, 0.0  ;;  %5783 = vmatprep.subr.bf16.mxu1 %v5782_v45 }
 0xf22   :  { %5785 = vmatpush3.bf16.msra.mxu1 %v5782_v45  ;;  %v4336_v35 = vmul.f32 %v6762_v61, %v3756_v29 }
 0xf23   :  { %v5786_v18 = vpack.c.bf16 %v3756_v29, %v3755_v17  ;;  %v4335_v47 = vmul.f32 %v6757_v33, %v3755_v17 }
 0xf25   :  { %v4376_v55 = vadd.f32 %v4375_v16, %v4335_v47  ;;  %5787 = vmatprep.subr.bf16.mxu1 %v5786_v18 }
 0xf26   :  { %5789 = vmatpush3.bf16.msra.mxu1 %v5786_v18 }
 0xf27   :  { %v4377_v12 = vadd.f32 %v4376_v55, %v4336_v35 }
 0xf29   :  { %v4378_v6 = vrot.slane %v4377_v12, 4  ;;  %5465 = vmatmul.mubr.msk.f32.vlgmr.msra.gmra.mrb[36].mxu1 %vm228_vm0, %v6679_v3 }
 0xf2a   :  { %5467 = vmatprep.mubr.msk.f32.mxu1 %vm228_vm0, %v6687_v2 }
 0xf2b   :  { %v4379_v40 = vadd.f32 %v4378_v6, %v4377_v12 }
 0xf2d   :  { %v4380_v34 = vrot.slane %v4379_v40, 2  ;;  %5468 = vmatmul.mubr.msk.f32.gmra.mrb[38].mxu1 %vm228_vm0, %v6699_v4 }
 0xf2e   :  { %5492 = vmatprep.mubr.msk.f32.mxu1 %vm228_vm0, %v6665_v21 }
 0xf2f   :  { %v4381_v43 = vadd.f32 %v4380_v34, %v4379_v40 }
 0xf31   :  { %v4382_v56 = vrot.slane %v4381_v43, 1 }
 0xf33   :  { %v4383_v63 = vadd.f32 %v4382_v56, %v4381_v43 }
 0xf35   :  { %v4440_v20 = vadd.f32 %v6797_v53, %v4383_v63 }
 0xf37   :  { %v4457_v19 = vsel %vm4456_vm2, %v4440_v20, %v4455_v28 }
 0xffc   :  { %v5466_v62 = vpop.f32.mrb[36].mxu1 }
 0xffd   :  { %v5870_v27 = vadd.f32 %v5466_v62, %v6735_v49  ;;  %v3831_v31 = vpop.f32.mrb[37].mxu1 }
 0xffe   :  { %v5871_v23 = vadd.f32 %v3831_v31, %v6733_v8 }
 0xfff   :  { %v3855_v24 = vmax.f32 %v5870_v27, 0.0 }
0x1000   :  { %v3854_v7 = vmax.f32 %v5871_v23, 0.0  ;;  %v5469_v51 = vpop.f32.mrb[38].mxu1 }
0x1001   :  { %v4338_v42 = vmul.f32 %v6749_v57, %v3855_v24  ;;  %v5872_v41 = vadd.f32 %v5469_v51, %v6742_v52  ;;  %v3841_v54 = vpop.f32.mrb[39].mxu1 }
0x1002   :  { %v5790_v44 = vpack.c.bf16 %v3855_v24, %v3854_v7  ;;  %v4337_v60 = vmul.f32 %v6747_v32, %v3854_v7  ;;  %v5873_v46 = vadd.f32 %v3841_v54, %v6739_v36 }
0x1003   :  { %v3857_v25 = vmax.f32 %v5872_v41, 0.0 }
0x1004   :  { %v4384_v22 = vadd.f32 %v4338_v42, %v4337_v60  ;;  %v3856_v0 = vmax.f32 %v5873_v46, 0.0  ;;  %5791 = vmatprep.subr.bf16.mxu0 %v5790_v44 }
0x1005   :  { %5793 = vmatpush3.bf16.msra.mxu0 %v5790_v44  ;;  %v4340_v59 = vmul.f32 %v6762_v61, %v3857_v25 }
0x1006   :  { %v5794_v37 = vpack.c.bf16 %v3857_v25, %v3856_v0  ;;  %v4339_v58 = vmul.f32 %v6757_v33, %v3856_v0 }
0x1008   :  { %v4385_v28 = vadd.f32 %v4384_v22, %v4339_v58  ;;  %5795 = vmatprep.subr.bf16.mxu0 %v5794_v37 }
0x1009   :  { %5797 = vmatpush3.bf16.msra.mxu0 %v5794_v37 }
0x100a   :  { %v4386_v9 = vadd.f32 %v4385_v28, %v4340_v59 }
0x100c   :  { %v4387_v10 = vrot.slane %v4386_v9, 4  ;;  %5479 = vmatmul.mubr.msk.f32.vlgmr.msra.gmra.mrb[40].mxu0 %vm228_vm0, %v6679_v3 }
0x100d   :  { %5481 = vmatprep.mubr.msk.f32.mxu0 %vm228_vm0, %v6687_v2 }
0x100e   :  { %v4388_v13 = vadd.f32 %v4387_v10, %v4386_v9 }
0x1010   :  { %v4389_v14 = vrot.slane %v4388_v13, 2  ;;  %5482 = vmatmul.mubr.msk.f32.gmra.mrb[42].mxu0 %vm228_vm0, %v6699_v4 }
0x1011   :  { %5506 = vmatprep.mubr.msk.f32.mxu0 %vm228_vm0, %v6665_v21 }
0x1012   :  { %v4390_v15 = vadd.f32 %v4389_v14, %v4388_v13 }
0x1014   :  { %v4391_v1 = vrot.slane %v4390_v15, 1 }
0x1016   :  { %v4392_v5 = vadd.f32 %v4391_v1, %v4390_v15 }
0x1018   :  { %v4441_v38 = vadd.f32 %v6797_v53, %v4392_v5 }
0x101a   :  { %v4459_v39 = vsel %vm4458_vm3, %v4441_v38, %v4457_v19 }
0x10df   :  { %v5480_v11 = vpop.f32.mrb[40].mxu0 }
0x10e0   :  { %v5874_v45 = vadd.f32 %v5480_v11, %v6735_v49  ;;  %v3932_v50 = vpop.f32.mrb[41].mxu0 }
0x10e1   :  { %v5875_v26 = vadd.f32 %v3932_v50, %v6733_v8 }
0x10e2   :  { %v3956_v29 = vmax.f32 %v5874_v45, 0.0 }
0x10e3   :  { %v3955_v16 = vmax.f32 %v5875_v26, 0.0  ;;  %v5483_v17 = vpop.f32.mrb[42].mxu0 }
0x10e4   :  { %v4342_v18 = vmul.f32 %v6749_v57, %v3956_v29  ;;  %v5876_v47 = vadd.f32 %v5483_v17, %v6742_v52  ;;  %v3942_v35 = vpop.f32.mrb[43].mxu0 }
0x10e5   :  { %v5798_v55 = vpack.c.bf16 %v3956_v29, %v3955_v16  ;;  %v4341_v12 = vmul.f32 %v6747_v32, %v3955_v16  ;;  %v5877_v6 = vadd.f32 %v3942_v35, %v6739_v36 }
0x10e6   :  { %v3958_v40 = vmax.f32 %v5876_v47, 0.0 }
0x10e7   :  { %v4393_v34 = vadd.f32 %v4342_v18, %v4341_v12  ;;  %v3957_v43 = vmax.f32 %v5877_v6, 0.0  ;;  %5799 = vmatprep.subr.bf16.mxu1 %v5798_v55 }
0x10e8   :  { %5801 = vmatpush3.bf16.msra.mxu1 %v5798_v55  ;;  %v4344_v20 = vmul.f32 %v6762_v61, %v3958_v40 }
0x10e9   :  { %v5802_v56 = vpack.c.bf16 %v3958_v40, %v3957_v43  ;;  %v4343_v63 = vmul.f32 %v6757_v33, %v3957_v43 }
0x10eb   :  { %v4394_v19 = vadd.f32 %v4393_v34, %v4343_v63  ;;  %5803 = vmatprep.subr.bf16.mxu1 %v5802_v56 }
0x10ec   :  { %5805 = vmatpush3.bf16.msra.mxu1 %v5802_v56 }
0x10ed   :  { %v4395_v62 = vadd.f32 %v4394_v19, %v4344_v20 }
0x10ef   :  { %v4396_v27 = vrot.slane %v4395_v62, 4  ;;  %5493 = vmatmul.mubr.msk.f32.vlgmr.msra.gmra.mrb[40].mxu1 %vm228_vm0, %v6679_v3 }
0x10f0   :  { %5495 = vmatprep.mubr.msk.f32.mxu1 %vm228_vm0, %v6687_v2 }
0x10f1   :  { %v4397_v31 = vadd.f32 %v4396_v27, %v4395_v62 }
0x10f3   :  { %v4398_v23 = vrot.slane %v4397_v31, 2  ;;  %5496 = vmatmul.mubr.msk.f32.gmra.mrb[42].mxu1 %vm228_vm0, %v6699_v4 }
0x10f4   :  { %5523 = vmatprep.mubr.msk.f32.mxu1 %vm228_vm0, %v6687_v2 }
0x10f5   :  { %v4399_v24 = vadd.f32 %v4398_v23, %v4397_v31 }
0x10f7   :  { %v4400_v7 = vrot.slane %v4399_v24, 1 }
0x10f9   :  { %v4401_v51 = vadd.f32 %v4400_v7, %v4399_v24 }
0x10fb   :  { %v4442_v42 = vadd.f32 %v6797_v53, %v4401_v51 }
0x10fd   :  { %v4461_v41 = vsel %vm4460_vm4, %v4442_v42, %v4459_v39 }
0x11c2   :  { %v5494_v54 = vpop.f32.mrb[40].mxu1 }
0x11c3   :  { %v5878_v44 = vadd.f32 %v5494_v54, %v6735_v49  ;;  %v4033_v60 = vpop.f32.mrb[41].mxu1 }
0x11c4   :  { %v5879_v46 = vadd.f32 %v4033_v60, %v6733_v8 }
0x11c5   :  { %v4057_v25 = vmax.f32 %v5878_v44, 0.0 }
0x11c6   :  { %v4056_v22 = vmax.f32 %v5879_v46, 0.0  ;;  %v5497_v0 = vpop.f32.mrb[42].mxu1 }
0x11c7   :  { %v4346_v37 = vmul.f32 %v6749_v57, %v4057_v25  ;;  %v5880_v58 = vadd.f32 %v5497_v0, %v6742_v52  ;;  %v4043_v59 = vpop.f32.mrb[43].mxu1 }
0x11c8   :  { %v5806_v28 = vpack.c.bf16 %v4057_v25, %v4056_v22  ;;  %v4345_v9 = vmul.f32 %v6747_v32, %v4056_v22  ;;  %v5881_v10 = vadd.f32 %v4043_v59, %v6739_v36 }
0x11c9   :  { %v4059_v13 = vmax.f32 %v5880_v58, 0.0  ;;  %v3419_v58 = vadd.f32 %v6779_v30, %v6733_v8 }
0x11ca   :  { %v4402_v14 = vadd.f32 %v4346_v37, %v4345_v9  ;;  %v4058_v15 = vmax.f32 %v5881_v10, 0.0  ;;  %5807 = vmatprep.subr.bf16.mxu0 %v5806_v28  ;;  %v3424_v37 = vadd.f32 %v6777_v48, %v6735_v49 }
0x11cb   :  { %5809 = vmatpush3.bf16.msra.mxu0 %v5806_v28  ;;  %v4348_v38 = vmul.f32 %v6762_v61, %v4059_v13 }
0x11cc   :  { %v5810_v1 = vpack.c.bf16 %v4059_v13, %v4058_v15  ;;  %v4347_v5 = vmul.f32 %v6757_v33, %v4058_v15 }
0x11ce   :  { %v4403_v39 = vadd.f32 %v4402_v14, %v4347_v5  ;;  %5811 = vmatprep.subr.bf16.mxu0 %v5810_v1 }
0x11cf   :  { %5813 = vmatpush3.bf16.msra.mxu0 %v5810_v1 }
0x11d0   :  { %v4404_v11 = vadd.f32 %v4403_v39, %v4348_v38 }
0x11d2   :  { %v4405_v45 = vrot.slane %v4404_v11, 4  ;;  %5507 = vmatmul.mubr.msk.f32.vlgmr.msra.gmra.mrb[44].mxu0 %vm228_vm0, %v6679_v3 }
0x11d3   :  { %5509 = vmatprep.mubr.msk.f32.mxu0 %vm228_vm0, %v6687_v2 }
0x11d4   :  { %v4406_v50 = vadd.f32 %v4405_v45, %v4404_v11 }
0x11d6   :  { %v4407_v26 = vrot.slane %v4406_v50, 2  ;;  %5510 = vmatmul.mubr.msk.f32.gmra.mrb[46].mxu0 %vm228_vm0, %v6699_v4 }
0x11d7   :  { %5520 = vmatprep.mubr.msk.f32.mxu0 %vm228_vm0, %v6665_v21 }
0x11d8   :  { %v4408_v29 = vadd.f32 %v4407_v26, %v4406_v50 }
0x11da   :  { %v4409_v16 = vrot.slane %v4408_v29, 1 }
0x11dc   :  { %v4410_v17 = vadd.f32 %v4409_v16, %v4408_v29 }
0x11de   :  { %v4443_v18 = vadd.f32 %v6797_v53, %v4410_v17 }
0x11e0   :  { %v4463_v47 = vsel %vm4462_vm5, %v4443_v18, %v4461_v41 }
0x12a5   :  { %v5508_v35 = vpop.f32.mrb[44].mxu0 }
0x12a6   :  { %v5882_v55 = vadd.f32 %v5508_v35, %v6735_v49  ;;  %v4134_v12 = vpop.f32.mrb[45].mxu0 }
0x12a7   :  { %v5883_v2 = vadd.f32 %v4134_v12, %v6733_v8 }
0x12a8   :  { %v4158_v6 = vmax.f32 %v5882_v55, 0.0 }
0x12a9   :  { %v4157_v40 = vmax.f32 %v5883_v2, 0.0  ;;  %v5511_v34 = vpop.f32.mrb[46].mxu0 }
0x12aa   :  { %v4350_v43 = vmul.f32 %v6749_v57, %v4158_v6  ;;  %v5884_v21 = vadd.f32 %v5511_v34, %v6742_v52  ;;  %v4144_v56 = vpop.f32.mrb[47].mxu0 }
0x12ab   :  { %v5814_v63 = vpack.c.bf16 %v4158_v6, %v4157_v40  ;;  %v4349_v20 = vmul.f32 %v6747_v32, %v4157_v40  ;;  %v5885_v19 = vadd.f32 %v4144_v56, %v6739_v36 }
0x12ac   :  { %v4160_v62 = vmax.f32 %v5884_v21, 0.0 }
0x12ad   :  { %v4411_v27 = vadd.f32 %v4350_v43, %v4349_v20  ;;  %v4159_v31 = vmax.f32 %v5885_v19, 0.0  ;;  %5815 = vmatprep.subr.bf16.mxu0 %v5814_v63  ;;  %5822 = vmatprep.subr.bf16.mxu1 %v5814_v63 }
0x12ae   :  { %5817 = vmatpush3.bf16.msra.mxu0 %v5814_v63  ;;  %5824 = vmatpush3.bf16.msra.mxu1 %v5814_v63  ;;  %v4352_v7 = vmul.f32 %v6762_v61, %v4160_v62 }
0x12af   :  { %v5818_v23 = vpack.c.bf16 %v4160_v62, %v4159_v31  ;;  %v4351_v24 = vmul.f32 %v6757_v33, %v4159_v31 }
0x12b1   :  { %v4412_v51 = vadd.f32 %v4411_v27, %v4351_v24  ;;  %5819 = vmatprep.subr.bf16.mxu0 %v5818_v23  ;;  %5823 = vmatprep.subr.bf16.mxu1 %v5818_v23 }
0x12b2   :  { %5821 = vmatpush3.bf16.msra.mxu0 %v5818_v23  ;;  %5825 = vmatpush3.bf16.msra.mxu1 %v5818_v23 }
0x12b3   :  { %v4413_v42 = vadd.f32 %v4412_v51, %v4352_v7 }
0x12b5   :  { %v4414_v41 = vrot.slane %v4413_v42, 4  ;;  %5521 = vmatmul.mubr.msk.f32.vlgmr.msra.gmra.mrb[48].mxu0 %vm228_vm0, %v6679_v3  ;;  %5524 = vmatmul.mubr.msk.f32.vlgmr.msra.gmra.mrb[46].mxu1 %vm228_vm0, %v6699_v4 }
0x12b7   :  { %v4415_v54 = vadd.f32 %v4414_v41, %v4413_v42 }
0x12b9   :  { %v4416_v44 = vrot.slane %v4415_v54, 2 }
0x12bb   :  { %v4417_v60 = vadd.f32 %v4416_v44, %v4415_v54 }
0x12bd   :  { %v4418_v46 = vrot.slane %v4417_v60, 1 }
0x12bf   :  { %v4419_v25 = vadd.f32 %v4418_v46, %v4417_v60 }
0x12c1   :  { %v4444_v22 = vadd.f32 %v6797_v53, %v4419_v25 }
0x12c3   :  { %v4465_v0 = vsel %vm4464_vm6, %v4444_v22, %v4463_v47 }
0x1388   :  { %v5522_v59 = vpop.f32.mrb[48].mxu0  ;;  %v5525_v3 = vpop.f32.mrb[46].mxu1 }
0x1389   :  { %v4255_v28 = vadd.f32 %v5522_v59, %v3424_v37  ;;  %v4235_v9 = vpop.f32.mrb[49].mxu0  ;;  %v4245_v4 = vpop.f32.mrb[47].mxu1  ;;  %v5890_v10 = vadd.f32 %v5525_v3, %v6742_v52 }
0x138a   :  { %v4254_v13 = vadd.f32 %v4235_v9, %v3419_v58  ;;  %v5891_v14 = vadd.f32 %v4245_v4, %v6739_v36 }
0x138b   :  { %v4259_v15 = vmax.f32 %v4255_v28, 0.0  ;;  %v4261_v39 = vmax.f32 %v5890_v10, 0.0 }
0x138c   :  { %v4258_v1 = vmax.f32 %v4254_v13, 0.0  ;;  %v4260_v5 = vmax.f32 %v5891_v14, 0.0 }
0x138d   :  { %v4354_v38 = vmul.f32 %v6749_v57, %v4259_v15  ;;  %v4356_v30 = vmul.f32 %v6762_v61, %v4261_v39 }
0x138e   :  { %v4353_v49 = vmul.f32 %v6747_v32, %v4258_v1  ;;  %v4355_v8 = vmul.f32 %v6757_v33, %v4260_v5 }
0x1390   :  { %v4420_v48 = vadd.f32 %v4354_v38, %v4353_v49 }
0x1392   :  { %v4421_v11 = vadd.f32 %v4420_v48, %v4355_v8 }
0x1394   :  { %v4422_v45 = vadd.f32 %v4421_v11, %v4356_v30 }
0x1396   :  { %v4423_v50 = vrot.slane %v4422_v45, 4 }
0x1398   :  { %v4424_v52 = vadd.f32 %v4423_v50, %v4422_v45 }
0x139a   :  { %v4425_v26 = vrot.slane %v4424_v52, 2 }
0x139c   :  { %v4426_v29 = vadd.f32 %v4425_v26, %v4424_v52 }
0x139e   :  { %v4427_v36 = vrot.slane %v4426_v29, 1 }
0x13a0   :  { %v4428_v16 = vadd.f32 %v4427_v36, %v4426_v29 }
0x13a2   :  { %v4445_v57 = vadd.f32 %v6797_v53, %v4428_v16 }
0x13a4   :  { %v4467_v32 = vsel %vm4466_vm7, %v4445_v57, %v4465_v0 }
0x13a5   :  { %4469 = vst [vmem:[#allocation4] sm:$0xff] %v4467_v32 }
0x13a6   :  { %5970 = shalt.err (!%p5967_p4)
}
0x13a7   :  { %s5971_s20 = scalar_lea.hbm %s6912_s7, 128 }
0x13a8   :  { %p5972_p5 = scmp.ne.s32.totalorder %s6912_s7, %s5971_s20  ;;  %p5975_p6 = scmp.lt.u32.totalorder %s5971_s20, %s6912_s7 }
0x13aa   :  { %p5977_p7 = pnand %p5975_p6, %p5972_p5 }
0x13ac   :  { %5980 = shalt.err (!%p5977_p7)
}
0x13ad   :  { %4479 = dma.vmem_to_hbm [thread:$0]  %s4477_s16, 128, %s6912_s7, [#allocation5]  }
0x13ae   :  { %5981 = dma.done.wait [#allocation5], 128  }
0x13af   :  { %5982 = vsyncadd [#allocation5], 4294967168 }
0x13b0   :  { %4483 = vsyncpa [#allocation5], 1 }

</bundles_post_ra>
